<compile_context>
chip_gen: v7x
topology: tpu7x:2x2x1
jax: 0.10.0
libtpu: 0.0.40
codegen_flags: <defaults>
</compile_context>

<pallas_src>
import numpy as np
import jax
import jax.numpy as jnp
from jax import lax
from jax.experimental import pallas as pl
from jax.experimental.pallas import tpu as pltpu

N = 4                          # SPD matrix size n
D = N * (N + 1) // 2           # basis (triu) dimension
BATCH = 32                     # demo batch (kernel pads internally to TILE_BATCH)

LANE = 128                     # lanes per vreg
SUB = 8                        # sublanes per vreg
TILE_BATCH = 2 * SUB * LANE    # 2048 matrices per grid step (2 vregs per element)
# For v7x (2 TensorCores) raise this to >= 2 so tiny batches still shard across
# both cores; real workloads (batch >> TILE_BATCH) already produce many steps.
MIN_GRID_STEPS = 1

SWEEPS = 5                     # cyclic Jacobi sweeps (4x4 fp32 converges in <= 4-5)
_TINY = 1e-30                  # denominator / rsqrt guard (scale-free, never biases)
_EPS = 1e-30                   # Cholesky pivot & log clamp (degenerate inputs only)


# ---------------------------------------------------------------------------
# In-kernel helpers (traced inside the Pallas kernel; everything elementwise
# over (2*SUB, LANE) batch tiles — the matrix indices are Python ints)
# ---------------------------------------------------------------------------
def _givens(app, aqq, apq):
    """Lane-batched Jacobi rotation (c, s, t) annihilating the (p, q) entry.

    3 EUP ops (rsqrt, approx reciprocal, rsqrt) + cheap VALU; the approx
    reciprocal is refined by one Newton step on the VALU so t is ~f32-exact
    (keeps the shortcut diagonal update backward-stable)."""
    d = aqq - app
    e = 2.0 * apq
    h = d * d + e * e
    inv_rad = lax.rsqrt(h + _TINY)            # EUP
    rad = h * inv_rad                         # == sqrt(h) without a sqrt pass
    denom = jnp.abs(d) + rad + _TINY          # tiny guard instead of a select mask
    sgn_d = jnp.where(d >= 0.0, 1.0, -1.0)
    r0 = pl.reciprocal(denom, approx=True)    # EUP approx reciprocal
    r1 = r0 * (2.0 - denom * r0)              # one Newton step (VALU, ~free slots)
    t = sgn_d * e * r1                        # tan(theta)
    c = lax.rsqrt(1.0 + t * t)                # EUP
    s = t * c
    return c, s, t


def _sym_reader(ref, n):
    """Lazy symmetric-element reader: get(i, j) loads the stored triu tile."""
    def get(i, j):
        if i > j:
            i, j = j, i
        return ref[i * n + j]
    return get


# ---------------------------------------------------------------------------
# Pallas kernel: one batch tile (TILE_BATCH matrices) of the full VVD hot path
# ---------------------------------------------------------------------------
def spd_vvd_kernel(a_ref, b_ref, o_ref):
    n = o_ref.shape[0]

    aget = _sym_reader(a_ref, n)
    bget = _sym_reader(b_ref, n)

    # --- A = L L^T (strictly-lower L and reciprocal diagonal only) ---
    L = [[None] * n for _ in range(n)]
    rdiag = [None] * n
    for j in range(n):
        d = aget(j, j)
        for k in range(j):
            d = d - L[j][k] * L[j][k]
        d = jnp.maximum(d, _EPS)              # guard near-singular A
        rdiag[j] = lax.rsqrt(d)               # 1 / L[j][j]
        for i in range(j + 1, n):
            v = aget(i, j)
            for k in range(j):
                v = v - L[i][k] * L[j][k]
            L[i][j] = v * rdiag[j]

    # --- M = L^{-1} B L^{-T}  (same spectrum as A^{-1/2} B A^{-1/2}) ---
    # Only the upper triangle of M is needed (triu-only Jacobi below), so:
    #   * W = L^{-1} B: keep only the lower part W[j][k], j >= k
    #   * M column k = forward solve of row k of W, truncated at row k
    Wlow = [[None] * n for _ in range(n)]     # Wlow[row][col], row >= col
    M = [[None] * n for _ in range(n)]        # upper triangle only (i <= j)
    for k in range(n):
        # column k of W = L^{-1} (column k of B)
        xw = [None] * n
        for i in range(n):
            v = bget(i, k)
            for m in range(i):
                v = v - L[i][m] * xw[m]
            xw[i] = v * rdiag[i]
        for j in range(k, n):
            Wlow[j][k] = xw[j]
        # column k of M (rows 0..k) = L^{-1} (row k of W), truncated at row k
        xm = [None] * (k + 1)
        for i in range(k + 1):
            v = Wlow[k][i]
            for m in range(i):
                v = v - L[i][m] * xm[m]
            xm[i] = v * rdiag[i]
            M[i][k] = xm[i]

    # --- eigenvalues of M: unrolled cyclic Jacobi on the upper triangle ---
    for _ in range(SWEEPS):
        for p in range(n - 1):
            for q in range(p + 1, n):
                app, aqq, apq = M[p][p], M[q][q], M[p][q]
                c, s, t = _givens(app, aqq, apq)
                tap = t * apq
                M[p][p] = app - tap
                M[q][q] = aqq + tap
                M[p][q] = jnp.zeros_like(tap)
                for j in range(n):
                    if j == p or j == q:
                        continue
                    apj = M[p][j] if p <= j else M[j][p]
                    aqj = M[q][j] if q <= j else M[j][q]
                    new_pj = c * apj - s * aqj
                    new_qj = s * apj + c * aqj
                    if p <= j:
                        M[p][j] = new_pj
                    else:
                        M[j][p] = new_pj
                    if q <= j:
                        M[q][j] = new_qj
                    else:
                        M[j][q] = new_qj

    ev = [M[i][i] for i in range(n)]

    # --- ascending sort via odd-even transposition network (pure min/max) ---
    for step in range(n):
        for i in range(step % 2, n - 1, 2):
            lo = jnp.minimum(ev[i], ev[i + 1])
            hi = jnp.maximum(ev[i], ev[i + 1])
            ev[i], ev[i + 1] = lo, hi

    # --- log eigenvalues (clamp maps degenerate inputs to a finite log) ---
    for i in range(n):
        o_ref[i] = jnp.log(jnp.maximum(ev[i], _EPS))


# ---------------------------------------------------------------------------
# Wrapper: from_basis + lane-batched relayout fused into one gather, pad, call
# ---------------------------------------------------------------------------
def _triu_index_map(n):
    """Flat (i, j) -> row-major triu basis index of (min(i,j), max(i,j))."""
    idx = np.zeros((n, n), dtype=np.int32)
    k = 0
    for i in range(n):
        for j in range(i, n):
            idx[i, j] = k
            idx[j, i] = k
            k += 1
    return idx.reshape(n * n)


@jax.jit
def spd_vvd(x, y):
    """x, y: [batch, n(n+1)/2] SPD points in triu-basis representation.
    Returns [batch, n] log-eigenvalues of A^{-1/2} B A^{-1/2} (ascending)."""
    batch, dd = x.shape
    n = int(round((np.sqrt(8 * dd + 1) - 1) / 2))
    assert n * (n + 1) // 2 == dd

    idx = _triu_index_map(n)                      # static numpy index map
    # from_basis + lane relayout in one shot: dense[i,j] = x[triu(min,max)]
    a_flat = x.astype(jnp.float32).T[idx]         # [n*n, batch]
    b_flat = y.astype(jnp.float32).T[idx]

    steps = max(MIN_GRID_STEPS, -(-batch // TILE_BATCH))
    bp = steps * TILE_BATCH
    pad = bp - batch
    if pad:
        eye_col = jnp.eye(n, dtype=jnp.float32).reshape(n * n, 1)
        pad_block = jnp.broadcast_to(eye_col, (n * n, pad))
        a_flat = jnp.concatenate([a_flat, pad_block], axis=1)
        b_flat = jnp.concatenate([b_flat, pad_block], axis=1)

    rows = bp // LANE                              # multiple of 2*SUB
    a_t = a_flat.reshape(n * n, rows, LANE)
    b_t = b_flat.reshape(n * n, rows, LANE)

    out = pl.pallas_call(
        spd_vvd_kernel,
        out_shape=jax.ShapeDtypeStruct((n, rows, LANE), jnp.float32),
        grid_spec=pltpu.PrefetchScalarGridSpec(
            num_scalar_prefetch=0,
            grid=(steps,),
            in_specs=[
                pl.BlockSpec((n * n, 2 * SUB, LANE), lambda i: (0, i, 0)),
                pl.BlockSpec((n * n, 2 * SUB, LANE), lambda i: (0, i, 0)),
            ],
            out_specs=pl.BlockSpec((n, 2 * SUB, LANE), lambda i: (0, i, 0)),
        ),
        compiler_params=pltpu.CompilerParams(dimension_semantics=("parallel",)),
    )(a_t, b_t)

    # [n, rows, LANE] -> [batch, n]
    return out.reshape(n, bp).T[:batch]


if __name__ == "__main__":
    key = jax.random.PRNGKey(0)
    k1, k2 = jax.random.split(key)

    # Deterministic SPD inputs; module consumes the triu-basis representation.
    ga = jax.random.normal(k1, (BATCH, N, N), dtype=jnp.float32)
    gb = jax.random.normal(k2, (BATCH, N, N), dtype=jnp.float32)
    A_full = jnp.einsum("bij,bkj->bik", ga, ga) + N * jnp.eye(N, dtype=jnp.float32)[None]
    B_full = jnp.einsum("bij,bkj->bik", gb, gb) + N * jnp.eye(N, dtype=jnp.float32)[None]
    iu = np.triu_indices(N)
    x = A_full[:, iu[0], iu[1]]   # [BATCH, D] basis representation
    y = B_full[:, iu[0], iu[1]]

    out = jax.block_until_ready(spd_vvd(x, y))

    # pure-JAX reference (eigh-based, mirrors the PyTorch module)
    lam, v = jnp.linalg.eigh(A_full)
    a_inv_sqrt = jnp.einsum("bij,bj,bkj->bik", v, 1.0 / jnp.sqrt(lam), v)
    Mref = a_inv_sqrt @ B_full @ a_inv_sqrt
    Mref = 0.5 * (Mref + jnp.swapaxes(Mref, -1, -2))
    ref = jnp.log(jnp.linalg.eigvalsh(Mref))

    err = float(jnp.max(jnp.abs(out - ref)))
    assert out.shape == (BATCH, N)
    assert err < 1e-2, f"mismatch vs reference: max abs err = {err}"

    print("KERNEL_OK")
</pallas_src>

<mosaic_0001>
module attributes {stable_mosaic.version = 11 : i64} {
  func.func @spd_vvd_kernel(%arg0: i32, %arg1: memref<16x16x128xf32, #tpu.memory_space<vmem>>, %arg2: memref<16x16x128xf32, #tpu.memory_space<vmem>>, %arg3: memref<4x16x128xf32, #tpu.memory_space<vmem>>) attributes {dimension_semantics = [#tpu.dimension_semantics<parallel>], iteration_bounds = array<i64: 1>, scalar_prefetch = 0 : i64, scratch_operands = 0 : i64, tpu.core_type = #tpu.core_type<tc>, window_params = [{transform_indices = @transform_0, window_bounds = array<i64: 16, 16, 128>}, {transform_indices = @transform_1, window_bounds = array<i64: 16, 16, 128>}, {transform_indices = @transform_2, window_bounds = array<i64: 4, 16, 128>}]} {
    %c0 = arith.constant 0 : index
    %c0_0 = arith.constant 0 : index
    %c0_1 = arith.constant 0 : index
    %0 = vector.load %arg1[%c0, %c0_0, %c0_1] : memref<16x16x128xf32, #tpu.memory_space<vmem>>, vector<1x16x128xf32>
    %1 = vector.shape_cast %0 : vector<1x16x128xf32> to vector<16x128xf32>
    %cst = arith.constant 1.000000e-30 : f32
    %2 = vector.broadcast %cst : f32 to vector<16x128xf32>
    %3 = arith.maximumf %1, %2 : vector<16x128xf32>
    %4 = math.rsqrt %3 : vector<16x128xf32>
    %c1 = arith.constant 1 : index
    %c0_2 = arith.constant 0 : index
    %c0_3 = arith.constant 0 : index
    %5 = vector.load %arg1[%c1, %c0_2, %c0_3] : memref<16x16x128xf32, #tpu.memory_space<vmem>>, vector<1x16x128xf32>
    %6 = vector.shape_cast %5 : vector<1x16x128xf32> to vector<16x128xf32>
    %7 = arith.mulf %6, %4 : vector<16x128xf32>
    %c2 = arith.constant 2 : index
    %c0_4 = arith.constant 0 : index
    %c0_5 = arith.constant 0 : index
    %8 = vector.load %arg1[%c2, %c0_4, %c0_5] : memref<16x16x128xf32, #tpu.memory_space<vmem>>, vector<1x16x128xf32>
    %9 = vector.shape_cast %8 : vector<1x16x128xf32> to vector<16x128xf32>
    %10 = arith.mulf %9, %4 : vector<16x128xf32>
    %c3 = arith.constant 3 : index
    %c0_6 = arith.constant 0 : index
    %c0_7 = arith.constant 0 : index
    %11 = vector.load %arg1[%c3, %c0_6, %c0_7] : memref<16x16x128xf32, #tpu.memory_space<vmem>>, vector<1x16x128xf32>
    %12 = vector.shape_cast %11 : vector<1x16x128xf32> to vector<16x128xf32>
    %13 = arith.mulf %12, %4 : vector<16x128xf32>
    %c5 = arith.constant 5 : index
    %c0_8 = arith.constant 0 : index
    %c0_9 = arith.constant 0 : index
    %14 = vector.load %arg1[%c5, %c0_8, %c0_9] : memref<16x16x128xf32, #tpu.memory_space<vmem>>, vector<1x16x128xf32>
    %15 = vector.shape_cast %14 : vector<1x16x128xf32> to vector<16x128xf32>
    %16 = arith.mulf %7, %7 : vector<16x128xf32>
    %17 = arith.subf %15, %16 : vector<16x128xf32>
    %cst_10 = arith.constant 1.000000e-30 : f32
    %18 = vector.broadcast %cst_10 : f32 to vector<16x128xf32>
    %19 = arith.maximumf %17, %18 : vector<16x128xf32>
    %20 = math.rsqrt %19 : vector<16x128xf32>
    %c6 = arith.constant 6 : index
    %c0_11 = arith.constant 0 : index
    %c0_12 = arith.constant 0 : index
    %21 = vector.load %arg1[%c6, %c0_11, %c0_12] : memref<16x16x128xf32, #tpu.memory_space<vmem>>, vector<1x16x128xf32>
    %22 = vector.shape_cast %21 : vector<1x16x128xf32> to vector<16x128xf32>
    %23 = arith.mulf %10, %7 : vector<16x128xf32>
    %24 = arith.subf %22, %23 : vector<16x128xf32>
    %25 = arith.mulf %24, %20 : vector<16x128xf32>
    %c7 = arith.constant 7 : index
    %c0_13 = arith.constant 0 : index
    %c0_14 = arith.constant 0 : index
    %26 = vector.load %arg1[%c7, %c0_13, %c0_14] : memref<16x16x128xf32, #tpu.memory_space<vmem>>, vector<1x16x128xf32>
    %27 = vector.shape_cast %26 : vector<1x16x128xf32> to vector<16x128xf32>
    %28 = arith.mulf %13, %7 : vector<16x128xf32>
    %29 = arith.subf %27, %28 : vector<16x128xf32>
    %30 = arith.mulf %29, %20 : vector<16x128xf32>
    %c10 = arith.constant 10 : index
    %c0_15 = arith.constant 0 : index
    %c0_16 = arith.constant 0 : index
    %31 = vector.load %arg1[%c10, %c0_15, %c0_16] : memref<16x16x128xf32, #tpu.memory_space<vmem>>, vector<1x16x128xf32>
    %32 = vector.shape_cast %31 : vector<1x16x128xf32> to vector<16x128xf32>
    %33 = arith.mulf %10, %10 : vector<16x128xf32>
    %34 = arith.subf %32, %33 : vector<16x128xf32>
    %35 = arith.mulf %25, %25 : vector<16x128xf32>
    %36 = arith.subf %34, %35 : vector<16x128xf32>
    %cst_17 = arith.constant 1.000000e-30 : f32
    %37 = vector.broadcast %cst_17 : f32 to vector<16x128xf32>
    %38 = arith.maximumf %36, %37 : vector<16x128xf32>
    %39 = math.rsqrt %38 : vector<16x128xf32>
    %c11 = arith.constant 11 : index
    %c0_18 = arith.constant 0 : index
    %c0_19 = arith.constant 0 : index
    %40 = vector.load %arg1[%c11, %c0_18, %c0_19] : memref<16x16x128xf32, #tpu.memory_space<vmem>>, vector<1x16x128xf32>
    %41 = vector.shape_cast %40 : vector<1x16x128xf32> to vector<16x128xf32>
    %42 = arith.mulf %13, %10 : vector<16x128xf32>
    %43 = arith.subf %41, %42 : vector<16x128xf32>
    %44 = arith.mulf %30, %25 : vector<16x128xf32>
    %45 = arith.subf %43, %44 : vector<16x128xf32>
    %46 = arith.mulf %45, %39 : vector<16x128xf32>
    %c15 = arith.constant 15 : index
    %c0_20 = arith.constant 0 : index
    %c0_21 = arith.constant 0 : index
    %47 = vector.load %arg1[%c15, %c0_20, %c0_21] : memref<16x16x128xf32, #tpu.memory_space<vmem>>, vector<1x16x128xf32>
    %48 = vector.shape_cast %47 : vector<1x16x128xf32> to vector<16x128xf32>
    %49 = arith.mulf %13, %13 : vector<16x128xf32>
    %50 = arith.subf %48, %49 : vector<16x128xf32>
    %51 = arith.mulf %30, %30 : vector<16x128xf32>
    %52 = arith.subf %50, %51 : vector<16x128xf32>
    %53 = arith.mulf %46, %46 : vector<16x128xf32>
    %54 = arith.subf %52, %53 : vector<16x128xf32>
    %cst_22 = arith.constant 1.000000e-30 : f32
    %55 = vector.broadcast %cst_22 : f32 to vector<16x128xf32>
    %56 = arith.maximumf %54, %55 : vector<16x128xf32>
    %57 = math.rsqrt %56 : vector<16x128xf32>
    %c0_23 = arith.constant 0 : index
    %c0_24 = arith.constant 0 : index
    %c0_25 = arith.constant 0 : index
    %58 = vector.load %arg2[%c0_23, %c0_24, %c0_25] : memref<16x16x128xf32, #tpu.memory_space<vmem>>, vector<1x16x128xf32>
    %59 = vector.shape_cast %58 : vector<1x16x128xf32> to vector<16x128xf32>
    %60 = arith.mulf %59, %4 : vector<16x128xf32>
    %c1_26 = arith.constant 1 : index
    %c0_27 = arith.constant 0 : index
    %c0_28 = arith.constant 0 : index
    %61 = vector.load %arg2[%c1_26, %c0_27, %c0_28] : memref<16x16x128xf32, #tpu.memory_space<vmem>>, vector<1x16x128xf32>
    %62 = vector.shape_cast %61 : vector<1x16x128xf32> to vector<16x128xf32>
    %63 = arith.mulf %7, %60 : vector<16x128xf32>
    %64 = arith.subf %62, %63 : vector<16x128xf32>
    %65 = arith.mulf %64, %20 : vector<16x128xf32>
    %c2_29 = arith.constant 2 : index
    %c0_30 = arith.constant 0 : index
    %c0_31 = arith.constant 0 : index
    %66 = vector.load %arg2[%c2_29, %c0_30, %c0_31] : memref<16x16x128xf32, #tpu.memory_space<vmem>>, vector<1x16x128xf32>
    %67 = vector.shape_cast %66 : vector<1x16x128xf32> to vector<16x128xf32>
    %68 = arith.mulf %10, %60 : vector<16x128xf32>
    %69 = arith.subf %67, %68 : vector<16x128xf32>
    %70 = arith.mulf %25, %65 : vector<16x128xf32>
    %71 = arith.subf %69, %70 : vector<16x128xf32>
    %72 = arith.mulf %71, %39 : vector<16x128xf32>
    %c3_32 = arith.constant 3 : index
    %c0_33 = arith.constant 0 : index
    %c0_34 = arith.constant 0 : index
    %73 = vector.load %arg2[%c3_32, %c0_33, %c0_34] : memref<16x16x128xf32, #tpu.memory_space<vmem>>, vector<1x16x128xf32>
    %74 = vector.shape_cast %73 : vector<1x16x128xf32> to vector<16x128xf32>
    %75 = arith.mulf %13, %60 : vector<16x128xf32>
    %76 = arith.subf %74, %75 : vector<16x128xf32>
    %77 = arith.mulf %30, %65 : vector<16x128xf32>
    %78 = arith.subf %76, %77 : vector<16x128xf32>
    %79 = arith.mulf %46, %72 : vector<16x128xf32>
    %80 = arith.subf %78, %79 : vector<16x128xf32>
    %81 = arith.mulf %80, %57 : vector<16x128xf32>
    %82 = arith.mulf %60, %4 : vector<16x128xf32>
    %c1_35 = arith.constant 1 : index
    %c0_36 = arith.constant 0 : index
    %c0_37 = arith.constant 0 : index
    %83 = vector.load %arg2[%c1_35, %c0_36, %c0_37] : memref<16x16x128xf32, #tpu.memory_space<vmem>>, vector<1x16x128xf32>
    %84 = vector.shape_cast %83 : vector<1x16x128xf32> to vector<16x128xf32>
    %85 = arith.mulf %84, %4 : vector<16x128xf32>
    %c5_38 = arith.constant 5 : index
    %c0_39 = arith.constant 0 : index
    %c0_40 = arith.constant 0 : index
    %86 = vector.load %arg2[%c5_38, %c0_39, %c0_40] : memref<16x16x128xf32, #tpu.memory_space<vmem>>, vector<1x16x128xf32>
    %87 = vector.shape_cast %86 : vector<1x16x128xf32> to vector<16x128xf32>
    %88 = arith.mulf %7, %85 : vector<16x128xf32>
    %89 = arith.subf %87, %88 : vector<16x128xf32>
    %90 = arith.mulf %89, %20 : vector<16x128xf32>
    %c6_41 = arith.constant 6 : index
    %c0_42 = arith.constant 0 : index
    %c0_43 = arith.constant 0 : index
    %91 = vector.load %arg2[%c6_41, %c0_42, %c0_43] : memref<16x16x128xf32, #tpu.memory_space<vmem>>, vector<1x16x128xf32>
    %92 = vector.shape_cast %91 : vector<1x16x128xf32> to vector<16x128xf32>
    %93 = arith.mulf %10, %85 : vector<16x128xf32>
    %94 = arith.subf %92, %93 : vector<16x128xf32>
    %95 = arith.mulf %25, %90 : vector<16x128xf32>
    %96 = arith.subf %94, %95 : vector<16x128xf32>
    %97 = arith.mulf %96, %39 : vector<16x128xf32>
    %c7_44 = arith.constant 7 : index
    %c0_45 = arith.constant 0 : index
    %c0_46 = arith.constant 0 : index
    %98 = vector.load %arg2[%c7_44, %c0_45, %c0_46] : memref<16x16x128xf32, #tpu.memory_space<vmem>>, vector<1x16x128xf32>
    %99 = vector.shape_cast %98 : vector<1x16x128xf32> to vector<16x128xf32>
    %100 = arith.mulf %13, %85 : vector<16x128xf32>
    %101 = arith.subf %99, %100 : vector<16x128xf32>
    %102 = arith.mulf %30, %90 : vector<16x128xf32>
    %103 = arith.subf %101, %102 : vector<16x128xf32>
    %104 = arith.mulf %46, %97 : vector<16x128xf32>
    %105 = arith.subf %103, %104 : vector<16x128xf32>
    %106 = arith.mulf %105, %57 : vector<16x128xf32>
    %107 = arith.mulf %65, %4 : vector<16x128xf32>
    %108 = arith.mulf %7, %107 : vector<16x128xf32>
    %109 = arith.subf %90, %108 : vector<16x128xf32>
    %110 = arith.mulf %109, %20 : vector<16x128xf32>
    %c2_47 = arith.constant 2 : index
    %c0_48 = arith.constant 0 : index
    %c0_49 = arith.constant 0 : index
    %111 = vector.load %arg2[%c2_47, %c0_48, %c0_49] : memref<16x16x128xf32, #tpu.memory_space<vmem>>, vector<1x16x128xf32>
    %112 = vector.shape_cast %111 : vector<1x16x128xf32> to vector<16x128xf32>
    %113 = arith.mulf %112, %4 : vector<16x128xf32>
    %c6_50 = arith.constant 6 : index
    %c0_51 = arith.constant 0 : index
    %c0_52 = arith.constant 0 : index
    %114 = vector.load %arg2[%c6_50, %c0_51, %c0_52] : memref<16x16x128xf32, #tpu.memory_space<vmem>>, vector<1x16x128xf32>
    %115 = vector.shape_cast %114 : vector<1x16x128xf32> to vector<16x128xf32>
    %116 = arith.mulf %7, %113 : vector<16x128xf32>
    %117 = arith.subf %115, %116 : vector<16x128xf32>
    %118 = arith.mulf %117, %20 : vector<16x128xf32>
    %c10_53 = arith.constant 10 : index
    %c0_54 = arith.constant 0 : index
    %c0_55 = arith.constant 0 : index
    %119 = vector.load %arg2[%c10_53, %c0_54, %c0_55] : memref<16x16x128xf32, #tpu.memory_space<vmem>>, vector<1x16x128xf32>
    %120 = vector.shape_cast %119 : vector<1x16x128xf32> to vector<16x128xf32>
    %121 = arith.mulf %10, %113 : vector<16x128xf32>
    %122 = arith.subf %120, %121 : vector<16x128xf32>
    %123 = arith.mulf %25, %118 : vector<16x128xf32>
    %124 = arith.subf %122, %123 : vector<16x128xf32>
    %125 = arith.mulf %124, %39 : vector<16x128xf32>
    %c11_56 = arith.constant 11 : index
    %c0_57 = arith.constant 0 : index
    %c0_58 = arith.constant 0 : index
    %126 = vector.load %arg2[%c11_56, %c0_57, %c0_58] : memref<16x16x128xf32, #tpu.memory_space<vmem>>, vector<1x16x128xf32>
    %127 = vector.shape_cast %126 : vector<1x16x128xf32> to vector<16x128xf32>
    %128 = arith.mulf %13, %113 : vector<16x128xf32>
    %129 = arith.subf %127, %128 : vector<16x128xf32>
    %130 = arith.mulf %30, %118 : vector<16x128xf32>
    %131 = arith.subf %129, %130 : vector<16x128xf32>
    %132 = arith.mulf %46, %125 : vector<16x128xf32>
    %133 = arith.subf %131, %132 : vector<16x128xf32>
    %134 = arith.mulf %133, %57 : vector<16x128xf32>
    %135 = arith.mulf %72, %4 : vector<16x128xf32>
    %136 = arith.mulf %7, %135 : vector<16x128xf32>
    %137 = arith.subf %97, %136 : vector<16x128xf32>
    %138 = arith.mulf %137, %20 : vector<16x128xf32>
    %139 = arith.mulf %10, %135 : vector<16x128xf32>
    %140 = arith.subf %125, %139 : vector<16x128xf32>
    %141 = arith.mulf %25, %138 : vector<16x128xf32>
    %142 = arith.subf %140, %141 : vector<16x128xf32>
    %143 = arith.mulf %142, %39 : vector<16x128xf32>
    %c3_59 = arith.constant 3 : index
    %c0_60 = arith.constant 0 : index
    %c0_61 = arith.constant 0 : index
    %144 = vector.load %arg2[%c3_59, %c0_60, %c0_61] : memref<16x16x128xf32, #tpu.memory_space<vmem>>, vector<1x16x128xf32>
    %145 = vector.shape_cast %144 : vector<1x16x128xf32> to vector<16x128xf32>
    %146 = arith.mulf %145, %4 : vector<16x128xf32>
    %c7_62 = arith.constant 7 : index
    %c0_63 = arith.constant 0 : index
    %c0_64 = arith.constant 0 : index
    %147 = vector.load %arg2[%c7_62, %c0_63, %c0_64] : memref<16x16x128xf32, #tpu.memory_space<vmem>>, vector<1x16x128xf32>
    %148 = vector.shape_cast %147 : vector<1x16x128xf32> to vector<16x128xf32>
    %149 = arith.mulf %7, %146 : vector<16x128xf32>
    %150 = arith.subf %148, %149 : vector<16x128xf32>
    %151 = arith.mulf %150, %20 : vector<16x128xf32>
    %c11_65 = arith.constant 11 : index
    %c0_66 = arith.constant 0 : index
    %c0_67 = arith.constant 0 : index
    %152 = vector.load %arg2[%c11_65, %c0_66, %c0_67] : memref<16x16x128xf32, #tpu.memory_space<vmem>>, vector<1x16x128xf32>
    %153 = vector.shape_cast %152 : vector<1x16x128xf32> to vector<16x128xf32>
    %154 = arith.mulf %10, %146 : vector<16x128xf32>
    %155 = arith.subf %153, %154 : vector<16x128xf32>
    %156 = arith.mulf %25, %151 : vector<16x128xf32>
    %157 = arith.subf %155, %156 : vector<16x128xf32>
    %158 = arith.mulf %157, %39 : vector<16x128xf32>
    %c15_68 = arith.constant 15 : index
    %c0_69 = arith.constant 0 : index
    %c0_70 = arith.constant 0 : index
    %159 = vector.load %arg2[%c15_68, %c0_69, %c0_70] : memref<16x16x128xf32, #tpu.memory_space<vmem>>, vector<1x16x128xf32>
    %160 = vector.shape_cast %159 : vector<1x16x128xf32> to vector<16x128xf32>
    %161 = arith.mulf %13, %146 : vector<16x128xf32>
    %162 = arith.subf %160, %161 : vector<16x128xf32>
    %163 = arith.mulf %30, %151 : vector<16x128xf32>
    %164 = arith.subf %162, %163 : vector<16x128xf32>
    %165 = arith.mulf %46, %158 : vector<16x128xf32>
    %166 = arith.subf %164, %165 : vector<16x128xf32>
    %167 = arith.mulf %166, %57 : vector<16x128xf32>
    %168 = arith.mulf %81, %4 : vector<16x128xf32>
    %169 = arith.mulf %7, %168 : vector<16x128xf32>
    %170 = arith.subf %106, %169 : vector<16x128xf32>
    %171 = arith.mulf %170, %20 : vector<16x128xf32>
    %172 = arith.mulf %10, %168 : vector<16x128xf32>
    %173 = arith.subf %134, %172 : vector<16x128xf32>
    %174 = arith.mulf %25, %171 : vector<16x128xf32>
    %175 = arith.subf %173, %174 : vector<16x128xf32>
    %176 = arith.mulf %175, %39 : vector<16x128xf32>
    %177 = arith.mulf %13, %168 : vector<16x128xf32>
    %178 = arith.subf %167, %177 : vector<16x128xf32>
    %179 = arith.mulf %30, %171 : vector<16x128xf32>
    %180 = arith.subf %178, %179 : vector<16x128xf32>
    %181 = arith.mulf %46, %176 : vector<16x128xf32>
    %182 = arith.subf %180, %181 : vector<16x128xf32>
    %183 = arith.mulf %182, %57 : vector<16x128xf32>
    %184 = arith.subf %110, %82 : vector<16x128xf32>
    %cst_71 = arith.constant 2.000000e+00 : f32
    %185 = vector.broadcast %cst_71 : f32 to vector<16x128xf32>
    %186 = arith.mulf %185, %107 : vector<16x128xf32>
    %187 = arith.mulf %184, %184 : vector<16x128xf32>
    %188 = arith.mulf %186, %186 : vector<16x128xf32>
    %189 = arith.addf %187, %188 : vector<16x128xf32>
    %cst_72 = arith.constant 1.000000e-30 : f32
    %190 = vector.broadcast %cst_72 : f32 to vector<16x128xf32>
    %191 = arith.addf %189, %190 : vector<16x128xf32>
    %192 = math.rsqrt %191 : vector<16x128xf32>
    %193 = arith.mulf %189, %192 : vector<16x128xf32>
    %194 = math.absf %184 : vector<16x128xf32>
    %195 = arith.addf %194, %193 : vector<16x128xf32>
    %cst_73 = arith.constant 1.000000e-30 : f32
    %196 = vector.broadcast %cst_73 : f32 to vector<16x128xf32>
    %197 = arith.addf %195, %196 : vector<16x128xf32>
    %cst_74 = arith.constant 0.000000e+00 : f32
    %198 = vector.broadcast %cst_74 : f32 to vector<16x128xf32>
    %199 = arith.cmpf oge, %184, %198 : vector<16x128xf32>
    %cst_75 = arith.constant 1.000000e+00 : f32
    %cst_76 = arith.constant -1.000000e+00 : f32
    %200 = vector.broadcast %cst_75 : f32 to vector<16x128xf32>
    %201 = vector.broadcast %cst_76 : f32 to vector<16x128xf32>
    %202 = arith.select %199, %200, %201 : vector<16x128xi1>, vector<16x128xf32>
    %203 = tpu.reciprocal %197 {approx = true} : vector<16x128xf32> -> vector<16x128xf32>
    %204 = arith.mulf %197, %203 : vector<16x128xf32>
    %cst_77 = arith.constant 2.000000e+00 : f32
    %205 = vector.broadcast %cst_77 : f32 to vector<16x128xf32>
    %206 = arith.subf %205, %204 : vector<16x128xf32>
    %207 = arith.mulf %203, %206 : vector<16x128xf32>
    %208 = arith.mulf %202, %186 : vector<16x128xf32>
    %209 = arith.mulf %208, %207 : vector<16x128xf32>
    %210 = arith.mulf %209, %209 : vector<16x128xf32>
    %cst_78 = arith.constant 1.000000e+00 : f32
    %211 = vector.broadcast %cst_78 : f32 to vector<16x128xf32>
    %212 = arith.addf %211, %210 : vector<16x128xf32>
    %213 = math.rsqrt %212 : vector<16x128xf32>
    %214 = arith.mulf %209, %213 : vector<16x128xf32>
    %215 = arith.mulf %209, %107 : vector<16x128xf32>
    %216 = arith.subf %82, %215 : vector<16x128xf32>
    %217 = arith.addf %110, %215 : vector<16x128xf32>
    %cst_79 = arith.constant 0.000000e+00 : f32
    %218 = vector.broadcast %cst_79 : f32 to vector<16x128xf32>
    %219 = arith.mulf %213, %135 : vector<16x128xf32>
    %220 = arith.mulf %214, %138 : vector<16x128xf32>
    %221 = arith.subf %219, %220 : vector<16x128xf32>
    %222 = arith.mulf %214, %135 : vector<16x128xf32>
    %223 = arith.mulf %213, %138 : vector<16x128xf32>
    %224 = arith.addf %222, %223 : vector<16x128xf32>
    %225 = arith.mulf %213, %168 : vector<16x128xf32>
    %226 = arith.mulf %214, %171 : vector<16x128xf32>
    %227 = arith.subf %225, %226 : vector<16x128xf32>
    %228 = arith.mulf %214, %168 : vector<16x128xf32>
    %229 = arith.mulf %213, %171 : vector<16x128xf32>
    %230 = arith.addf %228, %229 : vector<16x128xf32>
    %231 = arith.subf %143, %216 : vector<16x128xf32>
    %cst_80 = arith.constant 2.000000e+00 : f32
    %232 = vector.broadcast %cst_80 : f32 to vector<16x128xf32>
    %233 = arith.mulf %232, %221 : vector<16x128xf32>
    %234 = arith.mulf %231, %231 : vector<16x128xf32>
    %235 = arith.mulf %233, %233 : vector<16x128xf32>
    %236 = arith.addf %234, %235 : vector<16x128xf32>
    %cst_81 = arith.constant 1.000000e-30 : f32
    %237 = vector.broadcast %cst_81 : f32 to vector<16x128xf32>
    %238 = arith.addf %236, %237 : vector<16x128xf32>
    %239 = math.rsqrt %238 : vector<16x128xf32>
    %240 = arith.mulf %236, %239 : vector<16x128xf32>
    %241 = math.absf %231 : vector<16x128xf32>
    %242 = arith.addf %241, %240 : vector<16x128xf32>
    %cst_82 = arith.constant 1.000000e-30 : f32
    %243 = vector.broadcast %cst_82 : f32 to vector<16x128xf32>
    %244 = arith.addf %242, %243 : vector<16x128xf32>
    %cst_83 = arith.constant 0.000000e+00 : f32
    %245 = vector.broadcast %cst_83 : f32 to vector<16x128xf32>
    %246 = arith.cmpf oge, %231, %245 : vector<16x128xf32>
    %cst_84 = arith.constant 1.000000e+00 : f32
    %cst_85 = arith.constant -1.000000e+00 : f32
    %247 = vector.broadcast %cst_84 : f32 to vector<16x128xf32>
    %248 = vector.broadcast %cst_85 : f32 to vector<16x128xf32>
    %249 = arith.select %246, %247, %248 : vector<16x128xi1>, vector<16x128xf32>
    %250 = tpu.reciprocal %244 {approx = true} : vector<16x128xf32> -> vector<16x128xf32>
    %251 = arith.mulf %244, %250 : vector<16x128xf32>
    %cst_86 = arith.constant 2.000000e+00 : f32
    %252 = vector.broadcast %cst_86 : f32 to vector<16x128xf32>
    %253 = arith.subf %252, %251 : vector<16x128xf32>
    %254 = arith.mulf %250, %253 : vector<16x128xf32>
    %255 = arith.mulf %249, %233 : vector<16x128xf32>
    %256 = arith.mulf %255, %254 : vector<16x128xf32>
    %257 = arith.mulf %256, %256 : vector<16x128xf32>
    %cst_87 = arith.constant 1.000000e+00 : f32
    %258 = vector.broadcast %cst_87 : f32 to vector<16x128xf32>
    %259 = arith.addf %258, %257 : vector<16x128xf32>
    %260 = math.rsqrt %259 : vector<16x128xf32>
    %261 = arith.mulf %256, %260 : vector<16x128xf32>
    %262 = arith.mulf %256, %221 : vector<16x128xf32>
    %263 = arith.subf %216, %262 : vector<16x128xf32>
    %264 = arith.addf %143, %262 : vector<16x128xf32>
    %cst_88 = arith.constant 0.000000e+00 : f32
    %265 = vector.broadcast %cst_88 : f32 to vector<16x128xf32>
    %266 = arith.mulf %260, %218 : vector<16x128xf32>
    %267 = arith.mulf %261, %224 : vector<16x128xf32>
    %268 = arith.subf %266, %267 : vector<16x128xf32>
    %269 = arith.mulf %261, %218 : vector<16x128xf32>
    %270 = arith.mulf %260, %224 : vector<16x128xf32>
    %271 = arith.addf %269, %270 : vector<16x128xf32>
    %272 = arith.mulf %260, %227 : vector<16x128xf32>
    %273 = arith.mulf %261, %176 : vector<16x128xf32>
    %274 = arith.subf %272, %273 : vector<16x128xf32>
    %275 = arith.mulf %261, %227 : vector<16x128xf32>
    %276 = arith.mulf %260, %176 : vector<16x128xf32>
    %277 = arith.addf %275, %276 : vector<16x128xf32>
    %278 = arith.subf %183, %263 : vector<16x128xf32>
    %cst_89 = arith.constant 2.000000e+00 : f32
    %279 = vector.broadcast %cst_89 : f32 to vector<16x128xf32>
    %280 = arith.mulf %279, %274 : vector<16x128xf32>
    %281 = arith.mulf %278, %278 : vector<16x128xf32>
    %282 = arith.mulf %280, %280 : vector<16x128xf32>
    %283 = arith.addf %281, %282 : vector<16x128xf32>
    %cst_90 = arith.constant 1.000000e-30 : f32
    %284 = vector.broadcast %cst_90 : f32 to vector<16x128xf32>
    %285 = arith.addf %283, %284 : vector<16x128xf32>
    %286 = math.rsqrt %285 : vector<16x128xf32>
    %287 = arith.mulf %283, %286 : vector<16x128xf32>
    %288 = math.absf %278 : vector<16x128xf32>
    %289 = arith.addf %288, %287 : vector<16x128xf32>
    %cst_91 = arith.constant 1.000000e-30 : f32
    %290 = vector.broadcast %cst_91 : f32 to vector<16x128xf32>
    %291 = arith.addf %289, %290 : vector<16x128xf32>
    %cst_92 = arith.constant 0.000000e+00 : f32
    %292 = vector.broadcast %cst_92 : f32 to vector<16x128xf32>
    %293 = arith.cmpf oge, %278, %292 : vector<16x128xf32>
    %cst_93 = arith.constant 1.000000e+00 : f32
    %cst_94 = arith.constant -1.000000e+00 : f32
    %294 = vector.broadcast %cst_93 : f32 to vector<16x128xf32>
    %295 = vector.broadcast %cst_94 : f32 to vector<16x128xf32>
    %296 = arith.select %293, %294, %295 : vector<16x128xi1>, vector<16x128xf32>
    %297 = tpu.reciprocal %291 {approx = true} : vector<16x128xf32> -> vector<16x128xf32>
    %298 = arith.mulf %291, %297 : vector<16x128xf32>
    %cst_95 = arith.constant 2.000000e+00 : f32
    %299 = vector.broadcast %cst_95 : f32 to vector<16x128xf32>
    %300 = arith.subf %299, %298 : vector<16x128xf32>
    %301 = arith.mulf %297, %300 : vector<16x128xf32>
    %302 = arith.mulf %296, %280 : vector<16x128xf32>
    %303 = arith.mulf %302, %301 : vector<16x128xf32>
    %304 = arith.mulf %303, %303 : vector<16x128xf32>
    %cst_96 = arith.constant 1.000000e+00 : f32
    %305 = vector.broadcast %cst_96 : f32 to vector<16x128xf32>
    %306 = arith.addf %305, %304 : vector<16x128xf32>
    %307 = math.rsqrt %306 : vector<16x128xf32>
    %308 = arith.mulf %303, %307 : vector<16x128xf32>
    %309 = arith.mulf %303, %274 : vector<16x128xf32>
    %310 = arith.subf %263, %309 : vector<16x128xf32>
    %311 = arith.addf %183, %309 : vector<16x128xf32>
    %cst_97 = arith.constant 0.000000e+00 : f32
    %312 = vector.broadcast %cst_97 : f32 to vector<16x128xf32>
    %313 = arith.mulf %307, %268 : vector<16x128xf32>
    %314 = arith.mulf %308, %230 : vector<16x128xf32>
    %315 = arith.subf %313, %314 : vector<16x128xf32>
    %316 = arith.mulf %308, %268 : vector<16x128xf32>
    %317 = arith.mulf %307, %230 : vector<16x128xf32>
    %318 = arith.addf %316, %317 : vector<16x128xf32>
    %319 = arith.mulf %307, %265 : vector<16x128xf32>
    %320 = arith.mulf %308, %277 : vector<16x128xf32>
    %321 = arith.subf %319, %320 : vector<16x128xf32>
    %322 = arith.mulf %308, %265 : vector<16x128xf32>
    %323 = arith.mulf %307, %277 : vector<16x128xf32>
    %324 = arith.addf %322, %323 : vector<16x128xf32>
    %325 = arith.subf %264, %217 : vector<16x128xf32>
    %cst_98 = arith.constant 2.000000e+00 : f32
    %326 = vector.broadcast %cst_98 : f32 to vector<16x128xf32>
    %327 = arith.mulf %326, %271 : vector<16x128xf32>
    %328 = arith.mulf %325, %325 : vector<16x128xf32>
    %329 = arith.mulf %327, %327 : vector<16x128xf32>
    %330 = arith.addf %328, %329 : vector<16x128xf32>
    %cst_99 = arith.constant 1.000000e-30 : f32
    %331 = vector.broadcast %cst_99 : f32 to vector<16x128xf32>
    %332 = arith.addf %330, %331 : vector<16x128xf32>
    %333 = math.rsqrt %332 : vector<16x128xf32>
    %334 = arith.mulf %330, %333 : vector<16x128xf32>
    %335 = math.absf %325 : vector<16x128xf32>
    %336 = arith.addf %335, %334 : vector<16x128xf32>
    %cst_100 = arith.constant 1.000000e-30 : f32
    %337 = vector.broadcast %cst_100 : f32 to vector<16x128xf32>
    %338 = arith.addf %336, %337 : vector<16x128xf32>
    %cst_101 = arith.constant 0.000000e+00 : f32
    %339 = vector.broadcast %cst_101 : f32 to vector<16x128xf32>
    %340 = arith.cmpf oge, %325, %339 : vector<16x128xf32>
    %cst_102 = arith.constant 1.000000e+00 : f32
    %cst_103 = arith.constant -1.000000e+00 : f32
    %341 = vector.broadcast %cst_102 : f32 to vector<16x128xf32>
    %342 = vector.broadcast %cst_103 : f32 to vector<16x128xf32>
    %343 = arith.select %340, %341, %342 : vector<16x128xi1>, vector<16x128xf32>
    %344 = tpu.reciprocal %338 {approx = true} : vector<16x128xf32> -> vector<16x128xf32>
    %345 = arith.mulf %338, %344 : vector<16x128xf32>
    %cst_104 = arith.constant 2.000000e+00 : f32
    %346 = vector.broadcast %cst_104 : f32 to vector<16x128xf32>
    %347 = arith.subf %346, %345 : vector<16x128xf32>
    %348 = arith.mulf %344, %347 : vector<16x128xf32>
    %349 = arith.mulf %343, %327 : vector<16x128xf32>
    %350 = arith.mulf %349, %348 : vector<16x128xf32>
    %351 = arith.mulf %350, %350 : vector<16x128xf32>
    %cst_105 = arith.constant 1.000000e+00 : f32
    %352 = vector.broadcast %cst_105 : f32 to vector<16x128xf32>
    %353 = arith.addf %352, %351 : vector<16x128xf32>
    %354 = math.rsqrt %353 : vector<16x128xf32>
    %355 = arith.mulf %350, %354 : vector<16x128xf32>
    %356 = arith.mulf %350, %271 : vector<16x128xf32>
    %357 = arith.subf %217, %356 : vector<16x128xf32>
    %358 = arith.addf %264, %356 : vector<16x128xf32>
    %cst_106 = arith.constant 0.000000e+00 : f32
    %359 = vector.broadcast %cst_106 : f32 to vector<16x128xf32>
    %360 = arith.mulf %354, %315 : vector<16x128xf32>
    %361 = arith.mulf %355, %321 : vector<16x128xf32>
    %362 = arith.subf %360, %361 : vector<16x128xf32>
    %363 = arith.mulf %355, %315 : vector<16x128xf32>
    %364 = arith.mulf %354, %321 : vector<16x128xf32>
    %365 = arith.addf %363, %364 : vector<16x128xf32>
    %366 = arith.mulf %354, %318 : vector<16x128xf32>
    %367 = arith.mulf %355, %324 : vector<16x128xf32>
    %368 = arith.subf %366, %367 : vector<16x128xf32>
    %369 = arith.mulf %355, %318 : vector<16x128xf32>
    %370 = arith.mulf %354, %324 : vector<16x128xf32>
    %371 = arith.addf %369, %370 : vector<16x128xf32>
    %372 = arith.subf %311, %357 : vector<16x128xf32>
    %cst_107 = arith.constant 2.000000e+00 : f32
    %373 = vector.broadcast %cst_107 : f32 to vector<16x128xf32>
    %374 = arith.mulf %373, %368 : vector<16x128xf32>
    %375 = arith.mulf %372, %372 : vector<16x128xf32>
    %376 = arith.mulf %374, %374 : vector<16x128xf32>
    %377 = arith.addf %375, %376 : vector<16x128xf32>
    %cst_108 = arith.constant 1.000000e-30 : f32
    %378 = vector.broadcast %cst_108 : f32 to vector<16x128xf32>
    %379 = arith.addf %377, %378 : vector<16x128xf32>
    %380 = math.rsqrt %379 : vector<16x128xf32>
    %381 = arith.mulf %377, %380 : vector<16x128xf32>
    %382 = math.absf %372 : vector<16x128xf32>
    %383 = arith.addf %382, %381 : vector<16x128xf32>
    %cst_109 = arith.constant 1.000000e-30 : f32
    %384 = vector.broadcast %cst_109 : f32 to vector<16x128xf32>
    %385 = arith.addf %383, %384 : vector<16x128xf32>
    %cst_110 = arith.constant 0.000000e+00 : f32
    %386 = vector.broadcast %cst_110 : f32 to vector<16x128xf32>
    %387 = arith.cmpf oge, %372, %386 : vector<16x128xf32>
    %cst_111 = arith.constant 1.000000e+00 : f32
    %cst_112 = arith.constant -1.000000e+00 : f32
    %388 = vector.broadcast %cst_111 : f32 to vector<16x128xf32>
    %389 = vector.broadcast %cst_112 : f32 to vector<16x128xf32>
    %390 = arith.select %387, %388, %389 : vector<16x128xi1>, vector<16x128xf32>
    %391 = tpu.reciprocal %385 {approx = true} : vector<16x128xf32> -> vector<16x128xf32>
    %392 = arith.mulf %385, %391 : vector<16x128xf32>
    %cst_113 = arith.constant 2.000000e+00 : f32
    %393 = vector.broadcast %cst_113 : f32 to vector<16x128xf32>
    %394 = arith.subf %393, %392 : vector<16x128xf32>
    %395 = arith.mulf %391, %394 : vector<16x128xf32>
    %396 = arith.mulf %390, %374 : vector<16x128xf32>
    %397 = arith.mulf %396, %395 : vector<16x128xf32>
    %398 = arith.mulf %397, %397 : vector<16x128xf32>
    %cst_114 = arith.constant 1.000000e+00 : f32
    %399 = vector.broadcast %cst_114 : f32 to vector<16x128xf32>
    %400 = arith.addf %399, %398 : vector<16x128xf32>
    %401 = math.rsqrt %400 : vector<16x128xf32>
    %402 = arith.mulf %397, %401 : vector<16x128xf32>
    %403 = arith.mulf %397, %368 : vector<16x128xf32>
    %404 = arith.subf %357, %403 : vector<16x128xf32>
    %405 = arith.addf %311, %403 : vector<16x128xf32>
    %cst_115 = arith.constant 0.000000e+00 : f32
    %406 = vector.broadcast %cst_115 : f32 to vector<16x128xf32>
    %407 = arith.mulf %401, %362 : vector<16x128xf32>
    %408 = arith.mulf %402, %312 : vector<16x128xf32>
    %409 = arith.subf %407, %408 : vector<16x128xf32>
    %410 = arith.mulf %402, %362 : vector<16x128xf32>
    %411 = arith.mulf %401, %312 : vector<16x128xf32>
    %412 = arith.addf %410, %411 : vector<16x128xf32>
    %413 = arith.mulf %401, %359 : vector<16x128xf32>
    %414 = arith.mulf %402, %371 : vector<16x128xf32>
    %415 = arith.subf %413, %414 : vector<16x128xf32>
    %416 = arith.mulf %402, %359 : vector<16x128xf32>
    %417 = arith.mulf %401, %371 : vector<16x128xf32>
    %418 = arith.addf %416, %417 : vector<16x128xf32>
    %419 = arith.subf %405, %358 : vector<16x128xf32>
    %cst_116 = arith.constant 2.000000e+00 : f32
    %420 = vector.broadcast %cst_116 : f32 to vector<16x128xf32>
    %421 = arith.mulf %420, %418 : vector<16x128xf32>
    %422 = arith.mulf %419, %419 : vector<16x128xf32>
    %423 = arith.mulf %421, %421 : vector<16x128xf32>
    %424 = arith.addf %422, %423 : vector<16x128xf32>
    %cst_117 = arith.constant 1.000000e-30 : f32
    %425 = vector.broadcast %cst_117 : f32 to vector<16x128xf32>
    %426 = arith.addf %424, %425 : vector<16x128xf32>
    %427 = math.rsqrt %426 : vector<16x128xf32>
    %428 = arith.mulf %424, %427 : vector<16x128xf32>
    %429 = math.absf %419 : vector<16x128xf32>
    %430 = arith.addf %429, %428 : vector<16x128xf32>
    %cst_118 = arith.constant 1.000000e-30 : f32
    %431 = vector.broadcast %cst_118 : f32 to vector<16x128xf32>
    %432 = arith.addf %430, %431 : vector<16x128xf32>
    %cst_119 = arith.constant 0.000000e+00 : f32
    %433 = vector.broadcast %cst_119 : f32 to vector<16x128xf32>
    %434 = arith.cmpf oge, %419, %433 : vector<16x128xf32>
    %cst_120 = arith.constant 1.000000e+00 : f32
    %cst_121 = arith.constant -1.000000e+00 : f32
    %435 = vector.broadcast %cst_120 : f32 to vector<16x128xf32>
    %436 = vector.broadcast %cst_121 : f32 to vector<16x128xf32>
    %437 = arith.select %434, %435, %436 : vector<16x128xi1>, vector<16x128xf32>
    %438 = tpu.reciprocal %432 {approx = true} : vector<16x128xf32> -> vector<16x128xf32>
    %439 = arith.mulf %432, %438 : vector<16x128xf32>
    %cst_122 = arith.constant 2.000000e+00 : f32
    %440 = vector.broadcast %cst_122 : f32 to vector<16x128xf32>
    %441 = arith.subf %440, %439 : vector<16x128xf32>
    %442 = arith.mulf %438, %441 : vector<16x128xf32>
    %443 = arith.mulf %437, %421 : vector<16x128xf32>
    %444 = arith.mulf %443, %442 : vector<16x128xf32>
    %445 = arith.mulf %444, %444 : vector<16x128xf32>
    %cst_123 = arith.constant 1.000000e+00 : f32
    %446 = vector.broadcast %cst_123 : f32 to vector<16x128xf32>
    %447 = arith.addf %446, %445 : vector<16x128xf32>
    %448 = math.rsqrt %447 : vector<16x128xf32>
    %449 = arith.mulf %444, %448 : vector<16x128xf32>
    %450 = arith.mulf %444, %418 : vector<16x128xf32>
    %451 = arith.subf %358, %450 : vector<16x128xf32>
    %452 = arith.addf %405, %450 : vector<16x128xf32>
    %cst_124 = arith.constant 0.000000e+00 : f32
    %453 = vector.broadcast %cst_124 : f32 to vector<16x128xf32>
    %454 = arith.mulf %448, %365 : vector<16x128xf32>
    %455 = arith.mulf %449, %412 : vector<16x128xf32>
    %456 = arith.subf %454, %455 : vector<16x128xf32>
    %457 = arith.mulf %449, %365 : vector<16x128xf32>
    %458 = arith.mulf %448, %412 : vector<16x128xf32>
    %459 = arith.addf %457, %458 : vector<16x128xf32>
    %460 = arith.mulf %448, %415 : vector<16x128xf32>
    %461 = arith.mulf %449, %406 : vector<16x128xf32>
    %462 = arith.subf %460, %461 : vector<16x128xf32>
    %463 = arith.mulf %449, %415 : vector<16x128xf32>
    %464 = arith.mulf %448, %406 : vector<16x128xf32>
    %465 = arith.addf %463, %464 : vector<16x128xf32>
    %466 = arith.subf %404, %310 : vector<16x128xf32>
    %cst_125 = arith.constant 2.000000e+00 : f32
    %467 = vector.broadcast %cst_125 : f32 to vector<16x128xf32>
    %468 = arith.mulf %467, %409 : vector<16x128xf32>
    %469 = arith.mulf %466, %466 : vector<16x128xf32>
    %470 = arith.mulf %468, %468 : vector<16x128xf32>
    %471 = arith.addf %469, %470 : vector<16x128xf32>
    %cst_126 = arith.constant 1.000000e-30 : f32
    %472 = vector.broadcast %cst_126 : f32 to vector<16x128xf32>
    %473 = arith.addf %471, %472 : vector<16x128xf32>
    %474 = math.rsqrt %473 : vector<16x128xf32>
    %475 = arith.mulf %471, %474 : vector<16x128xf32>
    %476 = math.absf %466 : vector<16x128xf32>
    %477 = arith.addf %476, %475 : vector<16x128xf32>
    %cst_127 = arith.constant 1.000000e-30 : f32
    %478 = vector.broadcast %cst_127 : f32 to vector<16x128xf32>
    %479 = arith.addf %477, %478 : vector<16x128xf32>
    %cst_128 = arith.constant 0.000000e+00 : f32
    %480 = vector.broadcast %cst_128 : f32 to vector<16x128xf32>
    %481 = arith.cmpf oge, %466, %480 : vector<16x128xf32>
    %cst_129 = arith.constant 1.000000e+00 : f32
    %cst_130 = arith.constant -1.000000e+00 : f32
    %482 = vector.broadcast %cst_129 : f32 to vector<16x128xf32>
    %483 = vector.broadcast %cst_130 : f32 to vector<16x128xf32>
    %484 = arith.select %481, %482, %483 : vector<16x128xi1>, vector<16x128xf32>
    %485 = tpu.reciprocal %479 {approx = true} : vector<16x128xf32> -> vector<16x128xf32>
    %486 = arith.mulf %479, %485 : vector<16x128xf32>
    %cst_131 = arith.constant 2.000000e+00 : f32
    %487 = vector.broadcast %cst_131 : f32 to vector<16x128xf32>
    %488 = arith.subf %487, %486 : vector<16x128xf32>
    %489 = arith.mulf %485, %488 : vector<16x128xf32>
    %490 = arith.mulf %484, %468 : vector<16x128xf32>
    %491 = arith.mulf %490, %489 : vector<16x128xf32>
    %492 = arith.mulf %491, %491 : vector<16x128xf32>
    %cst_132 = arith.constant 1.000000e+00 : f32
    %493 = vector.broadcast %cst_132 : f32 to vector<16x128xf32>
    %494 = arith.addf %493, %492 : vector<16x128xf32>
    %495 = math.rsqrt %494 : vector<16x128xf32>
    %496 = arith.mulf %491, %495 : vector<16x128xf32>
    %497 = arith.mulf %491, %409 : vector<16x128xf32>
    %498 = arith.subf %310, %497 : vector<16x128xf32>
    %499 = arith.addf %404, %497 : vector<16x128xf32>
    %cst_133 = arith.constant 0.000000e+00 : f32
    %500 = vector.broadcast %cst_133 : f32 to vector<16x128xf32>
    %501 = arith.mulf %495, %456 : vector<16x128xf32>
    %502 = arith.mulf %496, %462 : vector<16x128xf32>
    %503 = arith.subf %501, %502 : vector<16x128xf32>
    %504 = arith.mulf %496, %456 : vector<16x128xf32>
    %505 = arith.mulf %495, %462 : vector<16x128xf32>
    %506 = arith.addf %504, %505 : vector<16x128xf32>
    %507 = arith.mulf %495, %459 : vector<16x128xf32>
    %508 = arith.mulf %496, %465 : vector<16x128xf32>
    %509 = arith.subf %507, %508 : vector<16x128xf32>
    %510 = arith.mulf %496, %459 : vector<16x128xf32>
    %511 = arith.mulf %495, %465 : vector<16x128xf32>
    %512 = arith.addf %510, %511 : vector<16x128xf32>
    %513 = arith.subf %451, %498 : vector<16x128xf32>
    %cst_134 = arith.constant 2.000000e+00 : f32
    %514 = vector.broadcast %cst_134 : f32 to vector<16x128xf32>
    %515 = arith.mulf %514, %503 : vector<16x128xf32>
    %516 = arith.mulf %513, %513 : vector<16x128xf32>
    %517 = arith.mulf %515, %515 : vector<16x128xf32>
    %518 = arith.addf %516, %517 : vector<16x128xf32>
    %cst_135 = arith.constant 1.000000e-30 : f32
    %519 = vector.broadcast %cst_135 : f32 to vector<16x128xf32>
    %520 = arith.addf %518, %519 : vector<16x128xf32>
    %521 = math.rsqrt %520 : vector<16x128xf32>
    %522 = arith.mulf %518, %521 : vector<16x128xf32>
    %523 = math.absf %513 : vector<16x128xf32>
    %524 = arith.addf %523, %522 : vector<16x128xf32>
    %cst_136 = arith.constant 1.000000e-30 : f32
    %525 = vector.broadcast %cst_136 : f32 to vector<16x128xf32>
    %526 = arith.addf %524, %525 : vector<16x128xf32>
    %cst_137 = arith.constant 0.000000e+00 : f32
    %527 = vector.broadcast %cst_137 : f32 to vector<16x128xf32>
    %528 = arith.cmpf oge, %513, %527 : vector<16x128xf32>
    %cst_138 = arith.constant 1.000000e+00 : f32
    %cst_139 = arith.constant -1.000000e+00 : f32
    %529 = vector.broadcast %cst_138 : f32 to vector<16x128xf32>
    %530 = vector.broadcast %cst_139 : f32 to vector<16x128xf32>
    %531 = arith.select %528, %529, %530 : vector<16x128xi1>, vector<16x128xf32>
    %532 = tpu.reciprocal %526 {approx = true} : vector<16x128xf32> -> vector<16x128xf32>
    %533 = arith.mulf %526, %532 : vector<16x128xf32>
    %cst_140 = arith.constant 2.000000e+00 : f32
    %534 = vector.broadcast %cst_140 : f32 to vector<16x128xf32>
    %535 = arith.subf %534, %533 : vector<16x128xf32>
    %536 = arith.mulf %532, %535 : vector<16x128xf32>
    %537 = arith.mulf %531, %515 : vector<16x128xf32>
    %538 = arith.mulf %537, %536 : vector<16x128xf32>
    %539 = arith.mulf %538, %538 : vector<16x128xf32>
    %cst_141 = arith.constant 1.000000e+00 : f32
    %540 = vector.broadcast %cst_141 : f32 to vector<16x128xf32>
    %541 = arith.addf %540, %539 : vector<16x128xf32>
    %542 = math.rsqrt %541 : vector<16x128xf32>
    %543 = arith.mulf %538, %542 : vector<16x128xf32>
    %544 = arith.mulf %538, %503 : vector<16x128xf32>
    %545 = arith.subf %498, %544 : vector<16x128xf32>
    %546 = arith.addf %451, %544 : vector<16x128xf32>
    %cst_142 = arith.constant 0.000000e+00 : f32
    %547 = vector.broadcast %cst_142 : f32 to vector<16x128xf32>
    %548 = arith.mulf %542, %500 : vector<16x128xf32>
    %549 = arith.mulf %543, %506 : vector<16x128xf32>
    %550 = arith.subf %548, %549 : vector<16x128xf32>
    %551 = arith.mulf %543, %500 : vector<16x128xf32>
    %552 = arith.mulf %542, %506 : vector<16x128xf32>
    %553 = arith.addf %551, %552 : vector<16x128xf32>
    %554 = arith.mulf %542, %509 : vector<16x128xf32>
    %555 = arith.mulf %543, %453 : vector<16x128xf32>
    %556 = arith.subf %554, %555 : vector<16x128xf32>
    %557 = arith.mulf %543, %509 : vector<16x128xf32>
    %558 = arith.mulf %542, %453 : vector<16x128xf32>
    %559 = arith.addf %557, %558 : vector<16x128xf32>
    %560 = arith.subf %452, %545 : vector<16x128xf32>
    %cst_143 = arith.constant 2.000000e+00 : f32
    %561 = vector.broadcast %cst_143 : f32 to vector<16x128xf32>
    %562 = arith.mulf %561, %556 : vector<16x128xf32>
    %563 = arith.mulf %560, %560 : vector<16x128xf32>
    %564 = arith.mulf %562, %562 : vector<16x128xf32>
    %565 = arith.addf %563, %564 : vector<16x128xf32>
    %cst_144 = arith.constant 1.000000e-30 : f32
    %566 = vector.broadcast %cst_144 : f32 to vector<16x128xf32>
    %567 = arith.addf %565, %566 : vector<16x128xf32>
    %568 = math.rsqrt %567 : vector<16x128xf32>
    %569 = arith.mulf %565, %568 : vector<16x128xf32>
    %570 = math.absf %560 : vector<16x128xf32>
    %571 = arith.addf %570, %569 : vector<16x128xf32>
    %cst_145 = arith.constant 1.000000e-30 : f32
    %572 = vector.broadcast %cst_145 : f32 to vector<16x128xf32>
    %573 = arith.addf %571, %572 : vector<16x128xf32>
    %cst_146 = arith.constant 0.000000e+00 : f32
    %574 = vector.broadcast %cst_146 : f32 to vector<16x128xf32>
    %575 = arith.cmpf oge, %560, %574 : vector<16x128xf32>
    %cst_147 = arith.constant 1.000000e+00 : f32
    %cst_148 = arith.constant -1.000000e+00 : f32
    %576 = vector.broadcast %cst_147 : f32 to vector<16x128xf32>
    %577 = vector.broadcast %cst_148 : f32 to vector<16x128xf32>
    %578 = arith.select %575, %576, %577 : vector<16x128xi1>, vector<16x128xf32>
    %579 = tpu.reciprocal %573 {approx = true} : vector<16x128xf32> -> vector<16x128xf32>
    %580 = arith.mulf %573, %579 : vector<16x128xf32>
    %cst_149 = arith.constant 2.000000e+00 : f32
    %581 = vector.broadcast %cst_149 : f32 to vector<16x128xf32>
    %582 = arith.subf %581, %580 : vector<16x128xf32>
    %583 = arith.mulf %579, %582 : vector<16x128xf32>
    %584 = arith.mulf %578, %562 : vector<16x128xf32>
    %585 = arith.mulf %584, %583 : vector<16x128xf32>
    %586 = arith.mulf %585, %585 : vector<16x128xf32>
    %cst_150 = arith.constant 1.000000e+00 : f32
    %587 = vector.broadcast %cst_150 : f32 to vector<16x128xf32>
    %588 = arith.addf %587, %586 : vector<16x128xf32>
    %589 = math.rsqrt %588 : vector<16x128xf32>
    %590 = arith.mulf %585, %589 : vector<16x128xf32>
    %591 = arith.mulf %585, %556 : vector<16x128xf32>
    %592 = arith.subf %545, %591 : vector<16x128xf32>
    %593 = arith.addf %452, %591 : vector<16x128xf32>
    %cst_151 = arith.constant 0.000000e+00 : f32
    %594 = vector.broadcast %cst_151 : f32 to vector<16x128xf32>
    %595 = arith.mulf %589, %550 : vector<16x128xf32>
    %596 = arith.mulf %590, %512 : vector<16x128xf32>
    %597 = arith.subf %595, %596 : vector<16x128xf32>
    %598 = arith.mulf %590, %550 : vector<16x128xf32>
    %599 = arith.mulf %589, %512 : vector<16x128xf32>
    %600 = arith.addf %598, %599 : vector<16x128xf32>
    %601 = arith.mulf %589, %547 : vector<16x128xf32>
    %602 = arith.mulf %590, %559 : vector<16x128xf32>
    %603 = arith.subf %601, %602 : vector<16x128xf32>
    %604 = arith.mulf %590, %547 : vector<16x128xf32>
    %605 = arith.mulf %589, %559 : vector<16x128xf32>
    %606 = arith.addf %604, %605 : vector<16x128xf32>
    %607 = arith.subf %546, %499 : vector<16x128xf32>
    %cst_152 = arith.constant 2.000000e+00 : f32
    %608 = vector.broadcast %cst_152 : f32 to vector<16x128xf32>
    %609 = arith.mulf %608, %553 : vector<16x128xf32>
    %610 = arith.mulf %607, %607 : vector<16x128xf32>
    %611 = arith.mulf %609, %609 : vector<16x128xf32>
    %612 = arith.addf %610, %611 : vector<16x128xf32>
    %cst_153 = arith.constant 1.000000e-30 : f32
    %613 = vector.broadcast %cst_153 : f32 to vector<16x128xf32>
    %614 = arith.addf %612, %613 : vector<16x128xf32>
    %615 = math.rsqrt %614 : vector<16x128xf32>
    %616 = arith.mulf %612, %615 : vector<16x128xf32>
    %617 = math.absf %607 : vector<16x128xf32>
    %618 = arith.addf %617, %616 : vector<16x128xf32>
    %cst_154 = arith.constant 1.000000e-30 : f32
    %619 = vector.broadcast %cst_154 : f32 to vector<16x128xf32>
    %620 = arith.addf %618, %619 : vector<16x128xf32>
    %cst_155 = arith.constant 0.000000e+00 : f32
    %621 = vector.broadcast %cst_155 : f32 to vector<16x128xf32>
    %622 = arith.cmpf oge, %607, %621 : vector<16x128xf32>
    %cst_156 = arith.constant 1.000000e+00 : f32
    %cst_157 = arith.constant -1.000000e+00 : f32
    %623 = vector.broadcast %cst_156 : f32 to vector<16x128xf32>
    %624 = vector.broadcast %cst_157 : f32 to vector<16x128xf32>
    %625 = arith.select %622, %623, %624 : vector<16x128xi1>, vector<16x128xf32>
    %626 = tpu.reciprocal %620 {approx = true} : vector<16x128xf32> -> vector<16x128xf32>
    %627 = arith.mulf %620, %626 : vector<16x128xf32>
    %cst_158 = arith.constant 2.000000e+00 : f32
    %628 = vector.broadcast %cst_158 : f32 to vector<16x128xf32>
    %629 = arith.subf %628, %627 : vector<16x128xf32>
    %630 = arith.mulf %626, %629 : vector<16x128xf32>
    %631 = arith.mulf %625, %609 : vector<16x128xf32>
    %632 = arith.mulf %631, %630 : vector<16x128xf32>
    %633 = arith.mulf %632, %632 : vector<16x128xf32>
    %cst_159 = arith.constant 1.000000e+00 : f32
    %634 = vector.broadcast %cst_159 : f32 to vector<16x128xf32>
    %635 = arith.addf %634, %633 : vector<16x128xf32>
    %636 = math.rsqrt %635 : vector<16x128xf32>
    %637 = arith.mulf %632, %636 : vector<16x128xf32>
    %638 = arith.mulf %632, %553 : vector<16x128xf32>
    %639 = arith.subf %499, %638 : vector<16x128xf32>
    %640 = arith.addf %546, %638 : vector<16x128xf32>
    %cst_160 = arith.constant 0.000000e+00 : f32
    %641 = vector.broadcast %cst_160 : f32 to vector<16x128xf32>
    %642 = arith.mulf %636, %597 : vector<16x128xf32>
    %643 = arith.mulf %637, %603 : vector<16x128xf32>
    %644 = arith.subf %642, %643 : vector<16x128xf32>
    %645 = arith.mulf %637, %597 : vector<16x128xf32>
    %646 = arith.mulf %636, %603 : vector<16x128xf32>
    %647 = arith.addf %645, %646 : vector<16x128xf32>
    %648 = arith.mulf %636, %600 : vector<16x128xf32>
    %649 = arith.mulf %637, %606 : vector<16x128xf32>
    %650 = arith.subf %648, %649 : vector<16x128xf32>
    %651 = arith.mulf %637, %600 : vector<16x128xf32>
    %652 = arith.mulf %636, %606 : vector<16x128xf32>
    %653 = arith.addf %651, %652 : vector<16x128xf32>
    %654 = arith.subf %593, %639 : vector<16x128xf32>
    %cst_161 = arith.constant 2.000000e+00 : f32
    %655 = vector.broadcast %cst_161 : f32 to vector<16x128xf32>
    %656 = arith.mulf %655, %650 : vector<16x128xf32>
    %657 = arith.mulf %654, %654 : vector<16x128xf32>
    %658 = arith.mulf %656, %656 : vector<16x128xf32>
    %659 = arith.addf %657, %658 : vector<16x128xf32>
    %cst_162 = arith.constant 1.000000e-30 : f32
    %660 = vector.broadcast %cst_162 : f32 to vector<16x128xf32>
    %661 = arith.addf %659, %660 : vector<16x128xf32>
    %662 = math.rsqrt %661 : vector<16x128xf32>
    %663 = arith.mulf %659, %662 : vector<16x128xf32>
    %664 = math.absf %654 : vector<16x128xf32>
    %665 = arith.addf %664, %663 : vector<16x128xf32>
    %cst_163 = arith.constant 1.000000e-30 : f32
    %666 = vector.broadcast %cst_163 : f32 to vector<16x128xf32>
    %667 = arith.addf %665, %666 : vector<16x128xf32>
    %cst_164 = arith.constant 0.000000e+00 : f32
    %668 = vector.broadcast %cst_164 : f32 to vector<16x128xf32>
    %669 = arith.cmpf oge, %654, %668 : vector<16x128xf32>
    %cst_165 = arith.constant 1.000000e+00 : f32
    %cst_166 = arith.constant -1.000000e+00 : f32
    %670 = vector.broadcast %cst_165 : f32 to vector<16x128xf32>
    %671 = vector.broadcast %cst_166 : f32 to vector<16x128xf32>
    %672 = arith.select %669, %670, %671 : vector<16x128xi1>, vector<16x128xf32>
    %673 = tpu.reciprocal %667 {approx = true} : vector<16x128xf32> -> vector<16x128xf32>
    %674 = arith.mulf %667, %673 : vector<16x128xf32>
    %cst_167 = arith.constant 2.000000e+00 : f32
    %675 = vector.broadcast %cst_167 : f32 to vector<16x128xf32>
    %676 = arith.subf %675, %674 : vector<16x128xf32>
    %677 = arith.mulf %673, %676 : vector<16x128xf32>
    %678 = arith.mulf %672, %656 : vector<16x128xf32>
    %679 = arith.mulf %678, %677 : vector<16x128xf32>
    %680 = arith.mulf %679, %679 : vector<16x128xf32>
    %cst_168 = arith.constant 1.000000e+00 : f32
    %681 = vector.broadcast %cst_168 : f32 to vector<16x128xf32>
    %682 = arith.addf %681, %680 : vector<16x128xf32>
    %683 = math.rsqrt %682 : vector<16x128xf32>
    %684 = arith.mulf %679, %683 : vector<16x128xf32>
    %685 = arith.mulf %679, %650 : vector<16x128xf32>
    %686 = arith.subf %639, %685 : vector<16x128xf32>
    %687 = arith.addf %593, %685 : vector<16x128xf32>
    %cst_169 = arith.constant 0.000000e+00 : f32
    %688 = vector.broadcast %cst_169 : f32 to vector<16x128xf32>
    %689 = arith.mulf %683, %644 : vector<16x128xf32>
    %690 = arith.mulf %684, %594 : vector<16x128xf32>
    %691 = arith.subf %689, %690 : vector<16x128xf32>
    %692 = arith.mulf %684, %644 : vector<16x128xf32>
    %693 = arith.mulf %683, %594 : vector<16x128xf32>
    %694 = arith.addf %692, %693 : vector<16x128xf32>
    %695 = arith.mulf %683, %641 : vector<16x128xf32>
    %696 = arith.mulf %684, %653 : vector<16x128xf32>
    %697 = arith.subf %695, %696 : vector<16x128xf32>
    %698 = arith.mulf %684, %641 : vector<16x128xf32>
    %699 = arith.mulf %683, %653 : vector<16x128xf32>
    %700 = arith.addf %698, %699 : vector<16x128xf32>
    %701 = arith.subf %687, %640 : vector<16x128xf32>
    %cst_170 = arith.constant 2.000000e+00 : f32
    %702 = vector.broadcast %cst_170 : f32 to vector<16x128xf32>
    %703 = arith.mulf %702, %700 : vector<16x128xf32>
    %704 = arith.mulf %701, %701 : vector<16x128xf32>
    %705 = arith.mulf %703, %703 : vector<16x128xf32>
    %706 = arith.addf %704, %705 : vector<16x128xf32>
    %cst_171 = arith.constant 1.000000e-30 : f32
    %707 = vector.broadcast %cst_171 : f32 to vector<16x128xf32>
    %708 = arith.addf %706, %707 : vector<16x128xf32>
    %709 = math.rsqrt %708 : vector<16x128xf32>
    %710 = arith.mulf %706, %709 : vector<16x128xf32>
    %711 = math.absf %701 : vector<16x128xf32>
    %712 = arith.addf %711, %710 : vector<16x128xf32>
    %cst_172 = arith.constant 1.000000e-30 : f32
    %713 = vector.broadcast %cst_172 : f32 to vector<16x128xf32>
    %714 = arith.addf %712, %713 : vector<16x128xf32>
    %cst_173 = arith.constant 0.000000e+00 : f32
    %715 = vector.broadcast %cst_173 : f32 to vector<16x128xf32>
    %716 = arith.cmpf oge, %701, %715 : vector<16x128xf32>
    %cst_174 = arith.constant 1.000000e+00 : f32
    %cst_175 = arith.constant -1.000000e+00 : f32
    %717 = vector.broadcast %cst_174 : f32 to vector<16x128xf32>
    %718 = vector.broadcast %cst_175 : f32 to vector<16x128xf32>
    %719 = arith.select %716, %717, %718 : vector<16x128xi1>, vector<16x128xf32>
    %720 = tpu.reciprocal %714 {approx = true} : vector<16x128xf32> -> vector<16x128xf32>
    %721 = arith.mulf %714, %720 : vector<16x128xf32>
    %cst_176 = arith.constant 2.000000e+00 : f32
    %722 = vector.broadcast %cst_176 : f32 to vector<16x128xf32>
    %723 = arith.subf %722, %721 : vector<16x128xf32>
    %724 = arith.mulf %720, %723 : vector<16x128xf32>
    %725 = arith.mulf %719, %703 : vector<16x128xf32>
    %726 = arith.mulf %725, %724 : vector<16x128xf32>
    %727 = arith.mulf %726, %726 : vector<16x128xf32>
    %cst_177 = arith.constant 1.000000e+00 : f32
    %728 = vector.broadcast %cst_177 : f32 to vector<16x128xf32>
    %729 = arith.addf %728, %727 : vector<16x128xf32>
    %730 = math.rsqrt %729 : vector<16x128xf32>
    %731 = arith.mulf %726, %730 : vector<16x128xf32>
    %732 = arith.mulf %726, %700 : vector<16x128xf32>
    %733 = arith.subf %640, %732 : vector<16x128xf32>
    %734 = arith.addf %687, %732 : vector<16x128xf32>
    %cst_178 = arith.constant 0.000000e+00 : f32
    %735 = vector.broadcast %cst_178 : f32 to vector<16x128xf32>
    %736 = arith.mulf %730, %647 : vector<16x128xf32>
    %737 = arith.mulf %731, %694 : vector<16x128xf32>
    %738 = arith.subf %736, %737 : vector<16x128xf32>
    %739 = arith.mulf %731, %647 : vector<16x128xf32>
    %740 = arith.mulf %730, %694 : vector<16x128xf32>
    %741 = arith.addf %739, %740 : vector<16x128xf32>
    %742 = arith.mulf %730, %697 : vector<16x128xf32>
    %743 = arith.mulf %731, %688 : vector<16x128xf32>
    %744 = arith.subf %742, %743 : vector<16x128xf32>
    %745 = arith.mulf %731, %697 : vector<16x128xf32>
    %746 = arith.mulf %730, %688 : vector<16x128xf32>
    %747 = arith.addf %745, %746 : vector<16x128xf32>
    %748 = arith.subf %686, %592 : vector<16x128xf32>
    %cst_179 = arith.constant 2.000000e+00 : f32
    %749 = vector.broadcast %cst_179 : f32 to vector<16x128xf32>
    %750 = arith.mulf %749, %691 : vector<16x128xf32>
    %751 = arith.mulf %748, %748 : vector<16x128xf32>
    %752 = arith.mulf %750, %750 : vector<16x128xf32>
    %753 = arith.addf %751, %752 : vector<16x128xf32>
    %cst_180 = arith.constant 1.000000e-30 : f32
    %754 = vector.broadcast %cst_180 : f32 to vector<16x128xf32>
    %755 = arith.addf %753, %754 : vector<16x128xf32>
    %756 = math.rsqrt %755 : vector<16x128xf32>
    %757 = arith.mulf %753, %756 : vector<16x128xf32>
    %758 = math.absf %748 : vector<16x128xf32>
    %759 = arith.addf %758, %757 : vector<16x128xf32>
    %cst_181 = arith.constant 1.000000e-30 : f32
    %760 = vector.broadcast %cst_181 : f32 to vector<16x128xf32>
    %761 = arith.addf %759, %760 : vector<16x128xf32>
    %cst_182 = arith.constant 0.000000e+00 : f32
    %762 = vector.broadcast %cst_182 : f32 to vector<16x128xf32>
    %763 = arith.cmpf oge, %748, %762 : vector<16x128xf32>
    %cst_183 = arith.constant 1.000000e+00 : f32
    %cst_184 = arith.constant -1.000000e+00 : f32
    %764 = vector.broadcast %cst_183 : f32 to vector<16x128xf32>
    %765 = vector.broadcast %cst_184 : f32 to vector<16x128xf32>
    %766 = arith.select %763, %764, %765 : vector<16x128xi1>, vector<16x128xf32>
    %767 = tpu.reciprocal %761 {approx = true} : vector<16x128xf32> -> vector<16x128xf32>
    %768 = arith.mulf %761, %767 : vector<16x128xf32>
    %cst_185 = arith.constant 2.000000e+00 : f32
    %769 = vector.broadcast %cst_185 : f32 to vector<16x128xf32>
    %770 = arith.subf %769, %768 : vector<16x128xf32>
    %771 = arith.mulf %767, %770 : vector<16x128xf32>
    %772 = arith.mulf %766, %750 : vector<16x128xf32>
    %773 = arith.mulf %772, %771 : vector<16x128xf32>
    %774 = arith.mulf %773, %773 : vector<16x128xf32>
    %cst_186 = arith.constant 1.000000e+00 : f32
    %775 = vector.broadcast %cst_186 : f32 to vector<16x128xf32>
    %776 = arith.addf %775, %774 : vector<16x128xf32>
    %777 = math.rsqrt %776 : vector<16x128xf32>
    %778 = arith.mulf %773, %777 : vector<16x128xf32>
    %779 = arith.mulf %773, %691 : vector<16x128xf32>
    %780 = arith.subf %592, %779 : vector<16x128xf32>
    %781 = arith.addf %686, %779 : vector<16x128xf32>
    %cst_187 = arith.constant 0.000000e+00 : f32
    %782 = vector.broadcast %cst_187 : f32 to vector<16x128xf32>
    %783 = arith.mulf %777, %738 : vector<16x128xf32>
    %784 = arith.mulf %778, %744 : vector<16x128xf32>
    %785 = arith.subf %783, %784 : vector<16x128xf32>
    %786 = arith.mulf %778, %738 : vector<16x128xf32>
    %787 = arith.mulf %777, %744 : vector<16x128xf32>
    %788 = arith.addf %786, %787 : vector<16x128xf32>
    %789 = arith.mulf %777, %741 : vector<16x128xf32>
    %790 = arith.mulf %778, %747 : vector<16x128xf32>
    %791 = arith.subf %789, %790 : vector<16x128xf32>
    %792 = arith.mulf %778, %741 : vector<16x128xf32>
    %793 = arith.mulf %777, %747 : vector<16x128xf32>
    %794 = arith.addf %792, %793 : vector<16x128xf32>
    %795 = arith.subf %733, %780 : vector<16x128xf32>
    %cst_188 = arith.constant 2.000000e+00 : f32
    %796 = vector.broadcast %cst_188 : f32 to vector<16x128xf32>
    %797 = arith.mulf %796, %785 : vector<16x128xf32>
    %798 = arith.mulf %795, %795 : vector<16x128xf32>
    %799 = arith.mulf %797, %797 : vector<16x128xf32>
    %800 = arith.addf %798, %799 : vector<16x128xf32>
    %cst_189 = arith.constant 1.000000e-30 : f32
    %801 = vector.broadcast %cst_189 : f32 to vector<16x128xf32>
    %802 = arith.addf %800, %801 : vector<16x128xf32>
    %803 = math.rsqrt %802 : vector<16x128xf32>
    %804 = arith.mulf %800, %803 : vector<16x128xf32>
    %805 = math.absf %795 : vector<16x128xf32>
    %806 = arith.addf %805, %804 : vector<16x128xf32>
    %cst_190 = arith.constant 1.000000e-30 : f32
    %807 = vector.broadcast %cst_190 : f32 to vector<16x128xf32>
    %808 = arith.addf %806, %807 : vector<16x128xf32>
    %cst_191 = arith.constant 0.000000e+00 : f32
    %809 = vector.broadcast %cst_191 : f32 to vector<16x128xf32>
    %810 = arith.cmpf oge, %795, %809 : vector<16x128xf32>
    %cst_192 = arith.constant 1.000000e+00 : f32
    %cst_193 = arith.constant -1.000000e+00 : f32
    %811 = vector.broadcast %cst_192 : f32 to vector<16x128xf32>
    %812 = vector.broadcast %cst_193 : f32 to vector<16x128xf32>
    %813 = arith.select %810, %811, %812 : vector<16x128xi1>, vector<16x128xf32>
    %814 = tpu.reciprocal %808 {approx = true} : vector<16x128xf32> -> vector<16x128xf32>
    %815 = arith.mulf %808, %814 : vector<16x128xf32>
    %cst_194 = arith.constant 2.000000e+00 : f32
    %816 = vector.broadcast %cst_194 : f32 to vector<16x128xf32>
    %817 = arith.subf %816, %815 : vector<16x128xf32>
    %818 = arith.mulf %814, %817 : vector<16x128xf32>
    %819 = arith.mulf %813, %797 : vector<16x128xf32>
    %820 = arith.mulf %819, %818 : vector<16x128xf32>
    %821 = arith.mulf %820, %820 : vector<16x128xf32>
    %cst_195 = arith.constant 1.000000e+00 : f32
    %822 = vector.broadcast %cst_195 : f32 to vector<16x128xf32>
    %823 = arith.addf %822, %821 : vector<16x128xf32>
    %824 = math.rsqrt %823 : vector<16x128xf32>
    %825 = arith.mulf %820, %824 : vector<16x128xf32>
    %826 = arith.mulf %820, %785 : vector<16x128xf32>
    %827 = arith.subf %780, %826 : vector<16x128xf32>
    %828 = arith.addf %733, %826 : vector<16x128xf32>
    %cst_196 = arith.constant 0.000000e+00 : f32
    %829 = vector.broadcast %cst_196 : f32 to vector<16x128xf32>
    %830 = arith.mulf %824, %782 : vector<16x128xf32>
    %831 = arith.mulf %825, %788 : vector<16x128xf32>
    %832 = arith.subf %830, %831 : vector<16x128xf32>
    %833 = arith.mulf %825, %782 : vector<16x128xf32>
    %834 = arith.mulf %824, %788 : vector<16x128xf32>
    %835 = arith.addf %833, %834 : vector<16x128xf32>
    %836 = arith.mulf %824, %791 : vector<16x128xf32>
    %837 = arith.mulf %825, %735 : vector<16x128xf32>
    %838 = arith.subf %836, %837 : vector<16x128xf32>
    %839 = arith.mulf %825, %791 : vector<16x128xf32>
    %840 = arith.mulf %824, %735 : vector<16x128xf32>
    %841 = arith.addf %839, %840 : vector<16x128xf32>
    %842 = arith.subf %734, %827 : vector<16x128xf32>
    %cst_197 = arith.constant 2.000000e+00 : f32
    %843 = vector.broadcast %cst_197 : f32 to vector<16x128xf32>
    %844 = arith.mulf %843, %838 : vector<16x128xf32>
    %845 = arith.mulf %842, %842 : vector<16x128xf32>
    %846 = arith.mulf %844, %844 : vector<16x128xf32>
    %847 = arith.addf %845, %846 : vector<16x128xf32>
    %cst_198 = arith.constant 1.000000e-30 : f32
    %848 = vector.broadcast %cst_198 : f32 to vector<16x128xf32>
    %849 = arith.addf %847, %848 : vector<16x128xf32>
    %850 = math.rsqrt %849 : vector<16x128xf32>
    %851 = arith.mulf %847, %850 : vector<16x128xf32>
    %852 = math.absf %842 : vector<16x128xf32>
    %853 = arith.addf %852, %851 : vector<16x128xf32>
    %cst_199 = arith.constant 1.000000e-30 : f32
    %854 = vector.broadcast %cst_199 : f32 to vector<16x128xf32>
    %855 = arith.addf %853, %854 : vector<16x128xf32>
    %cst_200 = arith.constant 0.000000e+00 : f32
    %856 = vector.broadcast %cst_200 : f32 to vector<16x128xf32>
    %857 = arith.cmpf oge, %842, %856 : vector<16x128xf32>
    %cst_201 = arith.constant 1.000000e+00 : f32
    %cst_202 = arith.constant -1.000000e+00 : f32
    %858 = vector.broadcast %cst_201 : f32 to vector<16x128xf32>
    %859 = vector.broadcast %cst_202 : f32 to vector<16x128xf32>
    %860 = arith.select %857, %858, %859 : vector<16x128xi1>, vector<16x128xf32>
    %861 = tpu.reciprocal %855 {approx = true} : vector<16x128xf32> -> vector<16x128xf32>
    %862 = arith.mulf %855, %861 : vector<16x128xf32>
    %cst_203 = arith.constant 2.000000e+00 : f32
    %863 = vector.broadcast %cst_203 : f32 to vector<16x128xf32>
    %864 = arith.subf %863, %862 : vector<16x128xf32>
    %865 = arith.mulf %861, %864 : vector<16x128xf32>
    %866 = arith.mulf %860, %844 : vector<16x128xf32>
    %867 = arith.mulf %866, %865 : vector<16x128xf32>
    %868 = arith.mulf %867, %867 : vector<16x128xf32>
    %cst_204 = arith.constant 1.000000e+00 : f32
    %869 = vector.broadcast %cst_204 : f32 to vector<16x128xf32>
    %870 = arith.addf %869, %868 : vector<16x128xf32>
    %871 = math.rsqrt %870 : vector<16x128xf32>
    %872 = arith.mulf %867, %871 : vector<16x128xf32>
    %873 = arith.mulf %867, %838 : vector<16x128xf32>
    %874 = arith.subf %827, %873 : vector<16x128xf32>
    %875 = arith.addf %734, %873 : vector<16x128xf32>
    %cst_205 = arith.constant 0.000000e+00 : f32
    %876 = vector.broadcast %cst_205 : f32 to vector<16x128xf32>
    %877 = arith.mulf %871, %832 : vector<16x128xf32>
    %878 = arith.mulf %872, %794 : vector<16x128xf32>
    %879 = arith.subf %877, %878 : vector<16x128xf32>
    %880 = arith.mulf %872, %832 : vector<16x128xf32>
    %881 = arith.mulf %871, %794 : vector<16x128xf32>
    %882 = arith.addf %880, %881 : vector<16x128xf32>
    %883 = arith.mulf %871, %829 : vector<16x128xf32>
    %884 = arith.mulf %872, %841 : vector<16x128xf32>
    %885 = arith.subf %883, %884 : vector<16x128xf32>
    %886 = arith.mulf %872, %829 : vector<16x128xf32>
    %887 = arith.mulf %871, %841 : vector<16x128xf32>
    %888 = arith.addf %886, %887 : vector<16x128xf32>
    %889 = arith.subf %828, %781 : vector<16x128xf32>
    %cst_206 = arith.constant 2.000000e+00 : f32
    %890 = vector.broadcast %cst_206 : f32 to vector<16x128xf32>
    %891 = arith.mulf %890, %835 : vector<16x128xf32>
    %892 = arith.mulf %889, %889 : vector<16x128xf32>
    %893 = arith.mulf %891, %891 : vector<16x128xf32>
    %894 = arith.addf %892, %893 : vector<16x128xf32>
    %cst_207 = arith.constant 1.000000e-30 : f32
    %895 = vector.broadcast %cst_207 : f32 to vector<16x128xf32>
    %896 = arith.addf %894, %895 : vector<16x128xf32>
    %897 = math.rsqrt %896 : vector<16x128xf32>
    %898 = arith.mulf %894, %897 : vector<16x128xf32>
    %899 = math.absf %889 : vector<16x128xf32>
    %900 = arith.addf %899, %898 : vector<16x128xf32>
    %cst_208 = arith.constant 1.000000e-30 : f32
    %901 = vector.broadcast %cst_208 : f32 to vector<16x128xf32>
    %902 = arith.addf %900, %901 : vector<16x128xf32>
    %cst_209 = arith.constant 0.000000e+00 : f32
    %903 = vector.broadcast %cst_209 : f32 to vector<16x128xf32>
    %904 = arith.cmpf oge, %889, %903 : vector<16x128xf32>
    %cst_210 = arith.constant 1.000000e+00 : f32
    %cst_211 = arith.constant -1.000000e+00 : f32
    %905 = vector.broadcast %cst_210 : f32 to vector<16x128xf32>
    %906 = vector.broadcast %cst_211 : f32 to vector<16x128xf32>
    %907 = arith.select %904, %905, %906 : vector<16x128xi1>, vector<16x128xf32>
    %908 = tpu.reciprocal %902 {approx = true} : vector<16x128xf32> -> vector<16x128xf32>
    %909 = arith.mulf %902, %908 : vector<16x128xf32>
    %cst_212 = arith.constant 2.000000e+00 : f32
    %910 = vector.broadcast %cst_212 : f32 to vector<16x128xf32>
    %911 = arith.subf %910, %909 : vector<16x128xf32>
    %912 = arith.mulf %908, %911 : vector<16x128xf32>
    %913 = arith.mulf %907, %891 : vector<16x128xf32>
    %914 = arith.mulf %913, %912 : vector<16x128xf32>
    %915 = arith.mulf %914, %914 : vector<16x128xf32>
    %cst_213 = arith.constant 1.000000e+00 : f32
    %916 = vector.broadcast %cst_213 : f32 to vector<16x128xf32>
    %917 = arith.addf %916, %915 : vector<16x128xf32>
    %918 = math.rsqrt %917 : vector<16x128xf32>
    %919 = arith.mulf %914, %918 : vector<16x128xf32>
    %920 = arith.mulf %914, %835 : vector<16x128xf32>
    %921 = arith.subf %781, %920 : vector<16x128xf32>
    %922 = arith.addf %828, %920 : vector<16x128xf32>
    %cst_214 = arith.constant 0.000000e+00 : f32
    %923 = vector.broadcast %cst_214 : f32 to vector<16x128xf32>
    %924 = arith.mulf %918, %879 : vector<16x128xf32>
    %925 = arith.mulf %919, %885 : vector<16x128xf32>
    %926 = arith.subf %924, %925 : vector<16x128xf32>
    %927 = arith.mulf %919, %879 : vector<16x128xf32>
    %928 = arith.mulf %918, %885 : vector<16x128xf32>
    %929 = arith.addf %927, %928 : vector<16x128xf32>
    %930 = arith.mulf %918, %882 : vector<16x128xf32>
    %931 = arith.mulf %919, %888 : vector<16x128xf32>
    %932 = arith.subf %930, %931 : vector<16x128xf32>
    %933 = arith.mulf %919, %882 : vector<16x128xf32>
    %934 = arith.mulf %918, %888 : vector<16x128xf32>
    %935 = arith.addf %933, %934 : vector<16x128xf32>
    %936 = arith.subf %875, %921 : vector<16x128xf32>
    %cst_215 = arith.constant 2.000000e+00 : f32
    %937 = vector.broadcast %cst_215 : f32 to vector<16x128xf32>
    %938 = arith.mulf %937, %932 : vector<16x128xf32>
    %939 = arith.mulf %936, %936 : vector<16x128xf32>
    %940 = arith.mulf %938, %938 : vector<16x128xf32>
    %941 = arith.addf %939, %940 : vector<16x128xf32>
    %cst_216 = arith.constant 1.000000e-30 : f32
    %942 = vector.broadcast %cst_216 : f32 to vector<16x128xf32>
    %943 = arith.addf %941, %942 : vector<16x128xf32>
    %944 = math.rsqrt %943 : vector<16x128xf32>
    %945 = arith.mulf %941, %944 : vector<16x128xf32>
    %946 = math.absf %936 : vector<16x128xf32>
    %947 = arith.addf %946, %945 : vector<16x128xf32>
    %cst_217 = arith.constant 1.000000e-30 : f32
    %948 = vector.broadcast %cst_217 : f32 to vector<16x128xf32>
    %949 = arith.addf %947, %948 : vector<16x128xf32>
    %cst_218 = arith.constant 0.000000e+00 : f32
    %950 = vector.broadcast %cst_218 : f32 to vector<16x128xf32>
    %951 = arith.cmpf oge, %936, %950 : vector<16x128xf32>
    %cst_219 = arith.constant 1.000000e+00 : f32
    %cst_220 = arith.constant -1.000000e+00 : f32
    %952 = vector.broadcast %cst_219 : f32 to vector<16x128xf32>
    %953 = vector.broadcast %cst_220 : f32 to vector<16x128xf32>
    %954 = arith.select %951, %952, %953 : vector<16x128xi1>, vector<16x128xf32>
    %955 = tpu.reciprocal %949 {approx = true} : vector<16x128xf32> -> vector<16x128xf32>
    %956 = arith.mulf %949, %955 : vector<16x128xf32>
    %cst_221 = arith.constant 2.000000e+00 : f32
    %957 = vector.broadcast %cst_221 : f32 to vector<16x128xf32>
    %958 = arith.subf %957, %956 : vector<16x128xf32>
    %959 = arith.mulf %955, %958 : vector<16x128xf32>
    %960 = arith.mulf %954, %938 : vector<16x128xf32>
    %961 = arith.mulf %960, %959 : vector<16x128xf32>
    %962 = arith.mulf %961, %961 : vector<16x128xf32>
    %cst_222 = arith.constant 1.000000e+00 : f32
    %963 = vector.broadcast %cst_222 : f32 to vector<16x128xf32>
    %964 = arith.addf %963, %962 : vector<16x128xf32>
    %965 = math.rsqrt %964 : vector<16x128xf32>
    %966 = arith.mulf %961, %965 : vector<16x128xf32>
    %967 = arith.mulf %961, %932 : vector<16x128xf32>
    %968 = arith.subf %921, %967 : vector<16x128xf32>
    %969 = arith.addf %875, %967 : vector<16x128xf32>
    %cst_223 = arith.constant 0.000000e+00 : f32
    %970 = vector.broadcast %cst_223 : f32 to vector<16x128xf32>
    %971 = arith.mulf %965, %926 : vector<16x128xf32>
    %972 = arith.mulf %966, %876 : vector<16x128xf32>
    %973 = arith.subf %971, %972 : vector<16x128xf32>
    %974 = arith.mulf %966, %926 : vector<16x128xf32>
    %975 = arith.mulf %965, %876 : vector<16x128xf32>
    %976 = arith.addf %974, %975 : vector<16x128xf32>
    %977 = arith.mulf %965, %923 : vector<16x128xf32>
    %978 = arith.mulf %966, %935 : vector<16x128xf32>
    %979 = arith.subf %977, %978 : vector<16x128xf32>
    %980 = arith.mulf %966, %923 : vector<16x128xf32>
    %981 = arith.mulf %965, %935 : vector<16x128xf32>
    %982 = arith.addf %980, %981 : vector<16x128xf32>
    %983 = arith.subf %969, %922 : vector<16x128xf32>
    %cst_224 = arith.constant 2.000000e+00 : f32
    %984 = vector.broadcast %cst_224 : f32 to vector<16x128xf32>
    %985 = arith.mulf %984, %982 : vector<16x128xf32>
    %986 = arith.mulf %983, %983 : vector<16x128xf32>
    %987 = arith.mulf %985, %985 : vector<16x128xf32>
    %988 = arith.addf %986, %987 : vector<16x128xf32>
    %cst_225 = arith.constant 1.000000e-30 : f32
    %989 = vector.broadcast %cst_225 : f32 to vector<16x128xf32>
    %990 = arith.addf %988, %989 : vector<16x128xf32>
    %991 = math.rsqrt %990 : vector<16x128xf32>
    %992 = arith.mulf %988, %991 : vector<16x128xf32>
    %993 = math.absf %983 : vector<16x128xf32>
    %994 = arith.addf %993, %992 : vector<16x128xf32>
    %cst_226 = arith.constant 1.000000e-30 : f32
    %995 = vector.broadcast %cst_226 : f32 to vector<16x128xf32>
    %996 = arith.addf %994, %995 : vector<16x128xf32>
    %cst_227 = arith.constant 0.000000e+00 : f32
    %997 = vector.broadcast %cst_227 : f32 to vector<16x128xf32>
    %998 = arith.cmpf oge, %983, %997 : vector<16x128xf32>
    %cst_228 = arith.constant 1.000000e+00 : f32
    %cst_229 = arith.constant -1.000000e+00 : f32
    %999 = vector.broadcast %cst_228 : f32 to vector<16x128xf32>
    %1000 = vector.broadcast %cst_229 : f32 to vector<16x128xf32>
    %1001 = arith.select %998, %999, %1000 : vector<16x128xi1>, vector<16x128xf32>
    %1002 = tpu.reciprocal %996 {approx = true} : vector<16x128xf32> -> vector<16x128xf32>
    %1003 = arith.mulf %996, %1002 : vector<16x128xf32>
    %cst_230 = arith.constant 2.000000e+00 : f32
    %1004 = vector.broadcast %cst_230 : f32 to vector<16x128xf32>
    %1005 = arith.subf %1004, %1003 : vector<16x128xf32>
    %1006 = arith.mulf %1002, %1005 : vector<16x128xf32>
    %1007 = arith.mulf %1001, %985 : vector<16x128xf32>
    %1008 = arith.mulf %1007, %1006 : vector<16x128xf32>
    %1009 = arith.mulf %1008, %1008 : vector<16x128xf32>
    %cst_231 = arith.constant 1.000000e+00 : f32
    %1010 = vector.broadcast %cst_231 : f32 to vector<16x128xf32>
    %1011 = arith.addf %1010, %1009 : vector<16x128xf32>
    %1012 = math.rsqrt %1011 : vector<16x128xf32>
    %1013 = arith.mulf %1008, %1012 : vector<16x128xf32>
    %1014 = arith.mulf %1008, %982 : vector<16x128xf32>
    %1015 = arith.subf %922, %1014 : vector<16x128xf32>
    %1016 = arith.addf %969, %1014 : vector<16x128xf32>
    %cst_232 = arith.constant 0.000000e+00 : f32
    %1017 = vector.broadcast %cst_232 : f32 to vector<16x128xf32>
    %1018 = arith.mulf %1012, %929 : vector<16x128xf32>
    %1019 = arith.mulf %1013, %976 : vector<16x128xf32>
    %1020 = arith.subf %1018, %1019 : vector<16x128xf32>
    %1021 = arith.mulf %1013, %929 : vector<16x128xf32>
    %1022 = arith.mulf %1012, %976 : vector<16x128xf32>
    %1023 = arith.addf %1021, %1022 : vector<16x128xf32>
    %1024 = arith.mulf %1012, %979 : vector<16x128xf32>
    %1025 = arith.mulf %1013, %970 : vector<16x128xf32>
    %1026 = arith.subf %1024, %1025 : vector<16x128xf32>
    %1027 = arith.mulf %1013, %979 : vector<16x128xf32>
    %1028 = arith.mulf %1012, %970 : vector<16x128xf32>
    %1029 = arith.addf %1027, %1028 : vector<16x128xf32>
    %1030 = arith.subf %968, %874 : vector<16x128xf32>
    %cst_233 = arith.constant 2.000000e+00 : f32
    %1031 = vector.broadcast %cst_233 : f32 to vector<16x128xf32>
    %1032 = arith.mulf %1031, %973 : vector<16x128xf32>
    %1033 = arith.mulf %1030, %1030 : vector<16x128xf32>
    %1034 = arith.mulf %1032, %1032 : vector<16x128xf32>
    %1035 = arith.addf %1033, %1034 : vector<16x128xf32>
    %cst_234 = arith.constant 1.000000e-30 : f32
    %1036 = vector.broadcast %cst_234 : f32 to vector<16x128xf32>
    %1037 = arith.addf %1035, %1036 : vector<16x128xf32>
    %1038 = math.rsqrt %1037 : vector<16x128xf32>
    %1039 = arith.mulf %1035, %1038 : vector<16x128xf32>
    %1040 = math.absf %1030 : vector<16x128xf32>
    %1041 = arith.addf %1040, %1039 : vector<16x128xf32>
    %cst_235 = arith.constant 1.000000e-30 : f32
    %1042 = vector.broadcast %cst_235 : f32 to vector<16x128xf32>
    %1043 = arith.addf %1041, %1042 : vector<16x128xf32>
    %cst_236 = arith.constant 0.000000e+00 : f32
    %1044 = vector.broadcast %cst_236 : f32 to vector<16x128xf32>
    %1045 = arith.cmpf oge, %1030, %1044 : vector<16x128xf32>
    %cst_237 = arith.constant 1.000000e+00 : f32
    %cst_238 = arith.constant -1.000000e+00 : f32
    %1046 = vector.broadcast %cst_237 : f32 to vector<16x128xf32>
    %1047 = vector.broadcast %cst_238 : f32 to vector<16x128xf32>
    %1048 = arith.select %1045, %1046, %1047 : vector<16x128xi1>, vector<16x128xf32>
    %1049 = tpu.reciprocal %1043 {approx = true} : vector<16x128xf32> -> vector<16x128xf32>
    %1050 = arith.mulf %1043, %1049 : vector<16x128xf32>
    %cst_239 = arith.constant 2.000000e+00 : f32
    %1051 = vector.broadcast %cst_239 : f32 to vector<16x128xf32>
    %1052 = arith.subf %1051, %1050 : vector<16x128xf32>
    %1053 = arith.mulf %1049, %1052 : vector<16x128xf32>
    %1054 = arith.mulf %1048, %1032 : vector<16x128xf32>
    %1055 = arith.mulf %1054, %1053 : vector<16x128xf32>
    %1056 = arith.mulf %1055, %1055 : vector<16x128xf32>
    %cst_240 = arith.constant 1.000000e+00 : f32
    %1057 = vector.broadcast %cst_240 : f32 to vector<16x128xf32>
    %1058 = arith.addf %1057, %1056 : vector<16x128xf32>
    %1059 = math.rsqrt %1058 : vector<16x128xf32>
    %1060 = arith.mulf %1055, %1059 : vector<16x128xf32>
    %1061 = arith.mulf %1055, %973 : vector<16x128xf32>
    %1062 = arith.subf %874, %1061 : vector<16x128xf32>
    %1063 = arith.addf %968, %1061 : vector<16x128xf32>
    %cst_241 = arith.constant 0.000000e+00 : f32
    %1064 = vector.broadcast %cst_241 : f32 to vector<16x128xf32>
    %1065 = arith.mulf %1059, %1020 : vector<16x128xf32>
    %1066 = arith.mulf %1060, %1026 : vector<16x128xf32>
    %1067 = arith.subf %1065, %1066 : vector<16x128xf32>
    %1068 = arith.mulf %1060, %1020 : vector<16x128xf32>
    %1069 = arith.mulf %1059, %1026 : vector<16x128xf32>
    %1070 = arith.addf %1068, %1069 : vector<16x128xf32>
    %1071 = arith.mulf %1059, %1023 : vector<16x128xf32>
    %1072 = arith.mulf %1060, %1029 : vector<16x128xf32>
    %1073 = arith.subf %1071, %1072 : vector<16x128xf32>
    %1074 = arith.mulf %1060, %1023 : vector<16x128xf32>
    %1075 = arith.mulf %1059, %1029 : vector<16x128xf32>
    %1076 = arith.addf %1074, %1075 : vector<16x128xf32>
    %1077 = arith.subf %1015, %1062 : vector<16x128xf32>
    %cst_242 = arith.constant 2.000000e+00 : f32
    %1078 = vector.broadcast %cst_242 : f32 to vector<16x128xf32>
    %1079 = arith.mulf %1078, %1067 : vector<16x128xf32>
    %1080 = arith.mulf %1077, %1077 : vector<16x128xf32>
    %1081 = arith.mulf %1079, %1079 : vector<16x128xf32>
    %1082 = arith.addf %1080, %1081 : vector<16x128xf32>
    %cst_243 = arith.constant 1.000000e-30 : f32
    %1083 = vector.broadcast %cst_243 : f32 to vector<16x128xf32>
    %1084 = arith.addf %1082, %1083 : vector<16x128xf32>
    %1085 = math.rsqrt %1084 : vector<16x128xf32>
    %1086 = arith.mulf %1082, %1085 : vector<16x128xf32>
    %1087 = math.absf %1077 : vector<16x128xf32>
    %1088 = arith.addf %1087, %1086 : vector<16x128xf32>
    %cst_244 = arith.constant 1.000000e-30 : f32
    %1089 = vector.broadcast %cst_244 : f32 to vector<16x128xf32>
    %1090 = arith.addf %1088, %1089 : vector<16x128xf32>
    %cst_245 = arith.constant 0.000000e+00 : f32
    %1091 = vector.broadcast %cst_245 : f32 to vector<16x128xf32>
    %1092 = arith.cmpf oge, %1077, %1091 : vector<16x128xf32>
    %cst_246 = arith.constant 1.000000e+00 : f32
    %cst_247 = arith.constant -1.000000e+00 : f32
    %1093 = vector.broadcast %cst_246 : f32 to vector<16x128xf32>
    %1094 = vector.broadcast %cst_247 : f32 to vector<16x128xf32>
    %1095 = arith.select %1092, %1093, %1094 : vector<16x128xi1>, vector<16x128xf32>
    %1096 = tpu.reciprocal %1090 {approx = true} : vector<16x128xf32> -> vector<16x128xf32>
    %1097 = arith.mulf %1090, %1096 : vector<16x128xf32>
    %cst_248 = arith.constant 2.000000e+00 : f32
    %1098 = vector.broadcast %cst_248 : f32 to vector<16x128xf32>
    %1099 = arith.subf %1098, %1097 : vector<16x128xf32>
    %1100 = arith.mulf %1096, %1099 : vector<16x128xf32>
    %1101 = arith.mulf %1095, %1079 : vector<16x128xf32>
    %1102 = arith.mulf %1101, %1100 : vector<16x128xf32>
    %1103 = arith.mulf %1102, %1102 : vector<16x128xf32>
    %cst_249 = arith.constant 1.000000e+00 : f32
    %1104 = vector.broadcast %cst_249 : f32 to vector<16x128xf32>
    %1105 = arith.addf %1104, %1103 : vector<16x128xf32>
    %1106 = math.rsqrt %1105 : vector<16x128xf32>
    %1107 = arith.mulf %1102, %1106 : vector<16x128xf32>
    %1108 = arith.mulf %1102, %1067 : vector<16x128xf32>
    %1109 = arith.subf %1062, %1108 : vector<16x128xf32>
    %1110 = arith.addf %1015, %1108 : vector<16x128xf32>
    %cst_250 = arith.constant 0.000000e+00 : f32
    %1111 = vector.broadcast %cst_250 : f32 to vector<16x128xf32>
    %1112 = arith.mulf %1106, %1064 : vector<16x128xf32>
    %1113 = arith.mulf %1107, %1070 : vector<16x128xf32>
    %1114 = arith.subf %1112, %1113 : vector<16x128xf32>
    %1115 = arith.mulf %1107, %1064 : vector<16x128xf32>
    %1116 = arith.mulf %1106, %1070 : vector<16x128xf32>
    %1117 = arith.addf %1115, %1116 : vector<16x128xf32>
    %1118 = arith.mulf %1106, %1073 : vector<16x128xf32>
    %1119 = arith.mulf %1107, %1017 : vector<16x128xf32>
    %1120 = arith.subf %1118, %1119 : vector<16x128xf32>
    %1121 = arith.mulf %1107, %1073 : vector<16x128xf32>
    %1122 = arith.mulf %1106, %1017 : vector<16x128xf32>
    %1123 = arith.addf %1121, %1122 : vector<16x128xf32>
    %1124 = arith.subf %1016, %1109 : vector<16x128xf32>
    %cst_251 = arith.constant 2.000000e+00 : f32
    %1125 = vector.broadcast %cst_251 : f32 to vector<16x128xf32>
    %1126 = arith.mulf %1125, %1120 : vector<16x128xf32>
    %1127 = arith.mulf %1124, %1124 : vector<16x128xf32>
    %1128 = arith.mulf %1126, %1126 : vector<16x128xf32>
    %1129 = arith.addf %1127, %1128 : vector<16x128xf32>
    %cst_252 = arith.constant 1.000000e-30 : f32
    %1130 = vector.broadcast %cst_252 : f32 to vector<16x128xf32>
    %1131 = arith.addf %1129, %1130 : vector<16x128xf32>
    %1132 = math.rsqrt %1131 : vector<16x128xf32>
    %1133 = arith.mulf %1129, %1132 : vector<16x128xf32>
    %1134 = math.absf %1124 : vector<16x128xf32>
    %1135 = arith.addf %1134, %1133 : vector<16x128xf32>
    %cst_253 = arith.constant 1.000000e-30 : f32
    %1136 = vector.broadcast %cst_253 : f32 to vector<16x128xf32>
    %1137 = arith.addf %1135, %1136 : vector<16x128xf32>
    %cst_254 = arith.constant 0.000000e+00 : f32
    %1138 = vector.broadcast %cst_254 : f32 to vector<16x128xf32>
    %1139 = arith.cmpf oge, %1124, %1138 : vector<16x128xf32>
    %cst_255 = arith.constant 1.000000e+00 : f32
    %cst_256 = arith.constant -1.000000e+00 : f32
    %1140 = vector.broadcast %cst_255 : f32 to vector<16x128xf32>
    %1141 = vector.broadcast %cst_256 : f32 to vector<16x128xf32>
    %1142 = arith.select %1139, %1140, %1141 : vector<16x128xi1>, vector<16x128xf32>
    %1143 = tpu.reciprocal %1137 {approx = true} : vector<16x128xf32> -> vector<16x128xf32>
    %1144 = arith.mulf %1137, %1143 : vector<16x128xf32>
    %cst_257 = arith.constant 2.000000e+00 : f32
    %1145 = vector.broadcast %cst_257 : f32 to vector<16x128xf32>
    %1146 = arith.subf %1145, %1144 : vector<16x128xf32>
    %1147 = arith.mulf %1143, %1146 : vector<16x128xf32>
    %1148 = arith.mulf %1142, %1126 : vector<16x128xf32>
    %1149 = arith.mulf %1148, %1147 : vector<16x128xf32>
    %1150 = arith.mulf %1149, %1149 : vector<16x128xf32>
    %cst_258 = arith.constant 1.000000e+00 : f32
    %1151 = vector.broadcast %cst_258 : f32 to vector<16x128xf32>
    %1152 = arith.addf %1151, %1150 : vector<16x128xf32>
    %1153 = math.rsqrt %1152 : vector<16x128xf32>
    %1154 = arith.mulf %1149, %1153 : vector<16x128xf32>
    %1155 = arith.mulf %1149, %1120 : vector<16x128xf32>
    %1156 = arith.subf %1109, %1155 : vector<16x128xf32>
    %1157 = arith.addf %1016, %1155 : vector<16x128xf32>
    %cst_259 = arith.constant 0.000000e+00 : f32
    %1158 = vector.broadcast %cst_259 : f32 to vector<16x128xf32>
    %1159 = arith.mulf %1153, %1114 : vector<16x128xf32>
    %1160 = arith.mulf %1154, %1076 : vector<16x128xf32>
    %1161 = arith.subf %1159, %1160 : vector<16x128xf32>
    %1162 = arith.mulf %1154, %1114 : vector<16x128xf32>
    %1163 = arith.mulf %1153, %1076 : vector<16x128xf32>
    %1164 = arith.addf %1162, %1163 : vector<16x128xf32>
    %1165 = arith.mulf %1153, %1111 : vector<16x128xf32>
    %1166 = arith.mulf %1154, %1123 : vector<16x128xf32>
    %1167 = arith.subf %1165, %1166 : vector<16x128xf32>
    %1168 = arith.mulf %1154, %1111 : vector<16x128xf32>
    %1169 = arith.mulf %1153, %1123 : vector<16x128xf32>
    %1170 = arith.addf %1168, %1169 : vector<16x128xf32>
    %1171 = arith.subf %1110, %1063 : vector<16x128xf32>
    %cst_260 = arith.constant 2.000000e+00 : f32
    %1172 = vector.broadcast %cst_260 : f32 to vector<16x128xf32>
    %1173 = arith.mulf %1172, %1117 : vector<16x128xf32>
    %1174 = arith.mulf %1171, %1171 : vector<16x128xf32>
    %1175 = arith.mulf %1173, %1173 : vector<16x128xf32>
    %1176 = arith.addf %1174, %1175 : vector<16x128xf32>
    %cst_261 = arith.constant 1.000000e-30 : f32
    %1177 = vector.broadcast %cst_261 : f32 to vector<16x128xf32>
    %1178 = arith.addf %1176, %1177 : vector<16x128xf32>
    %1179 = math.rsqrt %1178 : vector<16x128xf32>
    %1180 = arith.mulf %1176, %1179 : vector<16x128xf32>
    %1181 = math.absf %1171 : vector<16x128xf32>
    %1182 = arith.addf %1181, %1180 : vector<16x128xf32>
    %cst_262 = arith.constant 1.000000e-30 : f32
    %1183 = vector.broadcast %cst_262 : f32 to vector<16x128xf32>
    %1184 = arith.addf %1182, %1183 : vector<16x128xf32>
    %cst_263 = arith.constant 0.000000e+00 : f32
    %1185 = vector.broadcast %cst_263 : f32 to vector<16x128xf32>
    %1186 = arith.cmpf oge, %1171, %1185 : vector<16x128xf32>
    %cst_264 = arith.constant 1.000000e+00 : f32
    %cst_265 = arith.constant -1.000000e+00 : f32
    %1187 = vector.broadcast %cst_264 : f32 to vector<16x128xf32>
    %1188 = vector.broadcast %cst_265 : f32 to vector<16x128xf32>
    %1189 = arith.select %1186, %1187, %1188 : vector<16x128xi1>, vector<16x128xf32>
    %1190 = tpu.reciprocal %1184 {approx = true} : vector<16x128xf32> -> vector<16x128xf32>
    %1191 = arith.mulf %1184, %1190 : vector<16x128xf32>
    %cst_266 = arith.constant 2.000000e+00 : f32
    %1192 = vector.broadcast %cst_266 : f32 to vector<16x128xf32>
    %1193 = arith.subf %1192, %1191 : vector<16x128xf32>
    %1194 = arith.mulf %1190, %1193 : vector<16x128xf32>
    %1195 = arith.mulf %1189, %1173 : vector<16x128xf32>
    %1196 = arith.mulf %1195, %1194 : vector<16x128xf32>
    %1197 = arith.mulf %1196, %1196 : vector<16x128xf32>
    %cst_267 = arith.constant 1.000000e+00 : f32
    %1198 = vector.broadcast %cst_267 : f32 to vector<16x128xf32>
    %1199 = arith.addf %1198, %1197 : vector<16x128xf32>
    %1200 = math.rsqrt %1199 : vector<16x128xf32>
    %1201 = arith.mulf %1196, %1200 : vector<16x128xf32>
    %1202 = arith.mulf %1196, %1117 : vector<16x128xf32>
    %1203 = arith.subf %1063, %1202 : vector<16x128xf32>
    %1204 = arith.addf %1110, %1202 : vector<16x128xf32>
    %cst_268 = arith.constant 0.000000e+00 : f32
    %1205 = vector.broadcast %cst_268 : f32 to vector<16x128xf32>
    %1206 = arith.mulf %1200, %1161 : vector<16x128xf32>
    %1207 = arith.mulf %1201, %1167 : vector<16x128xf32>
    %1208 = arith.subf %1206, %1207 : vector<16x128xf32>
    %1209 = arith.mulf %1201, %1161 : vector<16x128xf32>
    %1210 = arith.mulf %1200, %1167 : vector<16x128xf32>
    %1211 = arith.addf %1209, %1210 : vector<16x128xf32>
    %1212 = arith.mulf %1200, %1164 : vector<16x128xf32>
    %1213 = arith.mulf %1201, %1170 : vector<16x128xf32>
    %1214 = arith.subf %1212, %1213 : vector<16x128xf32>
    %1215 = arith.mulf %1201, %1164 : vector<16x128xf32>
    %1216 = arith.mulf %1200, %1170 : vector<16x128xf32>
    %1217 = arith.addf %1215, %1216 : vector<16x128xf32>
    %1218 = arith.subf %1157, %1203 : vector<16x128xf32>
    %cst_269 = arith.constant 2.000000e+00 : f32
    %1219 = vector.broadcast %cst_269 : f32 to vector<16x128xf32>
    %1220 = arith.mulf %1219, %1214 : vector<16x128xf32>
    %1221 = arith.mulf %1218, %1218 : vector<16x128xf32>
    %1222 = arith.mulf %1220, %1220 : vector<16x128xf32>
    %1223 = arith.addf %1221, %1222 : vector<16x128xf32>
    %cst_270 = arith.constant 1.000000e-30 : f32
    %1224 = vector.broadcast %cst_270 : f32 to vector<16x128xf32>
    %1225 = arith.addf %1223, %1224 : vector<16x128xf32>
    %1226 = math.rsqrt %1225 : vector<16x128xf32>
    %1227 = arith.mulf %1223, %1226 : vector<16x128xf32>
    %1228 = math.absf %1218 : vector<16x128xf32>
    %1229 = arith.addf %1228, %1227 : vector<16x128xf32>
    %cst_271 = arith.constant 1.000000e-30 : f32
    %1230 = vector.broadcast %cst_271 : f32 to vector<16x128xf32>
    %1231 = arith.addf %1229, %1230 : vector<16x128xf32>
    %cst_272 = arith.constant 0.000000e+00 : f32
    %1232 = vector.broadcast %cst_272 : f32 to vector<16x128xf32>
    %1233 = arith.cmpf oge, %1218, %1232 : vector<16x128xf32>
    %cst_273 = arith.constant 1.000000e+00 : f32
    %cst_274 = arith.constant -1.000000e+00 : f32
    %1234 = vector.broadcast %cst_273 : f32 to vector<16x128xf32>
    %1235 = vector.broadcast %cst_274 : f32 to vector<16x128xf32>
    %1236 = arith.select %1233, %1234, %1235 : vector<16x128xi1>, vector<16x128xf32>
    %1237 = tpu.reciprocal %1231 {approx = true} : vector<16x128xf32> -> vector<16x128xf32>
    %1238 = arith.mulf %1231, %1237 : vector<16x128xf32>
    %cst_275 = arith.constant 2.000000e+00 : f32
    %1239 = vector.broadcast %cst_275 : f32 to vector<16x128xf32>
    %1240 = arith.subf %1239, %1238 : vector<16x128xf32>
    %1241 = arith.mulf %1237, %1240 : vector<16x128xf32>
    %1242 = arith.mulf %1236, %1220 : vector<16x128xf32>
    %1243 = arith.mulf %1242, %1241 : vector<16x128xf32>
    %1244 = arith.mulf %1243, %1243 : vector<16x128xf32>
    %cst_276 = arith.constant 1.000000e+00 : f32
    %1245 = vector.broadcast %cst_276 : f32 to vector<16x128xf32>
    %1246 = arith.addf %1245, %1244 : vector<16x128xf32>
    %1247 = math.rsqrt %1246 : vector<16x128xf32>
    %1248 = arith.mulf %1243, %1247 : vector<16x128xf32>
    %1249 = arith.mulf %1243, %1214 : vector<16x128xf32>
    %1250 = arith.subf %1203, %1249 : vector<16x128xf32>
    %1251 = arith.addf %1157, %1249 : vector<16x128xf32>
    %cst_277 = arith.constant 0.000000e+00 : f32
    %1252 = vector.broadcast %cst_277 : f32 to vector<16x128xf32>
    %1253 = arith.mulf %1247, %1208 : vector<16x128xf32>
    %1254 = arith.mulf %1248, %1158 : vector<16x128xf32>
    %1255 = arith.subf %1253, %1254 : vector<16x128xf32>
    %1256 = arith.mulf %1248, %1208 : vector<16x128xf32>
    %1257 = arith.mulf %1247, %1158 : vector<16x128xf32>
    %1258 = arith.addf %1256, %1257 : vector<16x128xf32>
    %1259 = arith.mulf %1247, %1205 : vector<16x128xf32>
    %1260 = arith.mulf %1248, %1217 : vector<16x128xf32>
    %1261 = arith.subf %1259, %1260 : vector<16x128xf32>
    %1262 = arith.mulf %1248, %1205 : vector<16x128xf32>
    %1263 = arith.mulf %1247, %1217 : vector<16x128xf32>
    %1264 = arith.addf %1262, %1263 : vector<16x128xf32>
    %1265 = arith.subf %1251, %1204 : vector<16x128xf32>
    %cst_278 = arith.constant 2.000000e+00 : f32
    %1266 = vector.broadcast %cst_278 : f32 to vector<16x128xf32>
    %1267 = arith.mulf %1266, %1264 : vector<16x128xf32>
    %1268 = arith.mulf %1265, %1265 : vector<16x128xf32>
    %1269 = arith.mulf %1267, %1267 : vector<16x128xf32>
    %1270 = arith.addf %1268, %1269 : vector<16x128xf32>
    %cst_279 = arith.constant 1.000000e-30 : f32
    %1271 = vector.broadcast %cst_279 : f32 to vector<16x128xf32>
    %1272 = arith.addf %1270, %1271 : vector<16x128xf32>
    %1273 = math.rsqrt %1272 : vector<16x128xf32>
    %1274 = arith.mulf %1270, %1273 : vector<16x128xf32>
    %1275 = math.absf %1265 : vector<16x128xf32>
    %1276 = arith.addf %1275, %1274 : vector<16x128xf32>
    %cst_280 = arith.constant 1.000000e-30 : f32
    %1277 = vector.broadcast %cst_280 : f32 to vector<16x128xf32>
    %1278 = arith.addf %1276, %1277 : vector<16x128xf32>
    %cst_281 = arith.constant 0.000000e+00 : f32
    %1279 = vector.broadcast %cst_281 : f32 to vector<16x128xf32>
    %1280 = arith.cmpf oge, %1265, %1279 : vector<16x128xf32>
    %cst_282 = arith.constant 1.000000e+00 : f32
    %cst_283 = arith.constant -1.000000e+00 : f32
    %1281 = vector.broadcast %cst_282 : f32 to vector<16x128xf32>
    %1282 = vector.broadcast %cst_283 : f32 to vector<16x128xf32>
    %1283 = arith.select %1280, %1281, %1282 : vector<16x128xi1>, vector<16x128xf32>
    %1284 = tpu.reciprocal %1278 {approx = true} : vector<16x128xf32> -> vector<16x128xf32>
    %1285 = arith.mulf %1278, %1284 : vector<16x128xf32>
    %cst_284 = arith.constant 2.000000e+00 : f32
    %1286 = vector.broadcast %cst_284 : f32 to vector<16x128xf32>
    %1287 = arith.subf %1286, %1285 : vector<16x128xf32>
    %1288 = arith.mulf %1284, %1287 : vector<16x128xf32>
    %1289 = arith.mulf %1283, %1267 : vector<16x128xf32>
    %1290 = arith.mulf %1289, %1288 : vector<16x128xf32>
    %1291 = arith.mulf %1290, %1290 : vector<16x128xf32>
    %cst_285 = arith.constant 1.000000e+00 : f32
    %1292 = vector.broadcast %cst_285 : f32 to vector<16x128xf32>
    %1293 = arith.addf %1292, %1291 : vector<16x128xf32>
    %1294 = math.rsqrt %1293 : vector<16x128xf32>
    %1295 = arith.mulf %1290, %1294 : vector<16x128xf32>
    %1296 = arith.mulf %1290, %1264 : vector<16x128xf32>
    %1297 = arith.subf %1204, %1296 : vector<16x128xf32>
    %1298 = arith.addf %1251, %1296 : vector<16x128xf32>
    %cst_286 = arith.constant 0.000000e+00 : f32
    %1299 = vector.broadcast %cst_286 : f32 to vector<16x128xf32>
    %1300 = arith.mulf %1294, %1211 : vector<16x128xf32>
    %1301 = arith.mulf %1295, %1258 : vector<16x128xf32>
    %1302 = arith.subf %1300, %1301 : vector<16x128xf32>
    %1303 = arith.mulf %1295, %1211 : vector<16x128xf32>
    %1304 = arith.mulf %1294, %1258 : vector<16x128xf32>
    %1305 = arith.addf %1303, %1304 : vector<16x128xf32>
    %1306 = arith.mulf %1294, %1261 : vector<16x128xf32>
    %1307 = arith.mulf %1295, %1252 : vector<16x128xf32>
    %1308 = arith.subf %1306, %1307 : vector<16x128xf32>
    %1309 = arith.mulf %1295, %1261 : vector<16x128xf32>
    %1310 = arith.mulf %1294, %1252 : vector<16x128xf32>
    %1311 = arith.addf %1309, %1310 : vector<16x128xf32>
    %1312 = arith.subf %1250, %1156 : vector<16x128xf32>
    %cst_287 = arith.constant 2.000000e+00 : f32
    %1313 = vector.broadcast %cst_287 : f32 to vector<16x128xf32>
    %1314 = arith.mulf %1313, %1255 : vector<16x128xf32>
    %1315 = arith.mulf %1312, %1312 : vector<16x128xf32>
    %1316 = arith.mulf %1314, %1314 : vector<16x128xf32>
    %1317 = arith.addf %1315, %1316 : vector<16x128xf32>
    %cst_288 = arith.constant 1.000000e-30 : f32
    %1318 = vector.broadcast %cst_288 : f32 to vector<16x128xf32>
    %1319 = arith.addf %1317, %1318 : vector<16x128xf32>
    %1320 = math.rsqrt %1319 : vector<16x128xf32>
    %1321 = arith.mulf %1317, %1320 : vector<16x128xf32>
    %1322 = math.absf %1312 : vector<16x128xf32>
    %1323 = arith.addf %1322, %1321 : vector<16x128xf32>
    %cst_289 = arith.constant 1.000000e-30 : f32
    %1324 = vector.broadcast %cst_289 : f32 to vector<16x128xf32>
    %1325 = arith.addf %1323, %1324 : vector<16x128xf32>
    %cst_290 = arith.constant 0.000000e+00 : f32
    %1326 = vector.broadcast %cst_290 : f32 to vector<16x128xf32>
    %1327 = arith.cmpf oge, %1312, %1326 : vector<16x128xf32>
    %cst_291 = arith.constant 1.000000e+00 : f32
    %cst_292 = arith.constant -1.000000e+00 : f32
    %1328 = vector.broadcast %cst_291 : f32 to vector<16x128xf32>
    %1329 = vector.broadcast %cst_292 : f32 to vector<16x128xf32>
    %1330 = arith.select %1327, %1328, %1329 : vector<16x128xi1>, vector<16x128xf32>
    %1331 = tpu.reciprocal %1325 {approx = true} : vector<16x128xf32> -> vector<16x128xf32>
    %1332 = arith.mulf %1325, %1331 : vector<16x128xf32>
    %cst_293 = arith.constant 2.000000e+00 : f32
    %1333 = vector.broadcast %cst_293 : f32 to vector<16x128xf32>
    %1334 = arith.subf %1333, %1332 : vector<16x128xf32>
    %1335 = arith.mulf %1331, %1334 : vector<16x128xf32>
    %1336 = arith.mulf %1330, %1314 : vector<16x128xf32>
    %1337 = arith.mulf %1336, %1335 : vector<16x128xf32>
    %1338 = arith.mulf %1337, %1337 : vector<16x128xf32>
    %cst_294 = arith.constant 1.000000e+00 : f32
    %1339 = vector.broadcast %cst_294 : f32 to vector<16x128xf32>
    %1340 = arith.addf %1339, %1338 : vector<16x128xf32>
    %1341 = math.rsqrt %1340 : vector<16x128xf32>
    %1342 = arith.mulf %1337, %1341 : vector<16x128xf32>
    %1343 = arith.mulf %1337, %1255 : vector<16x128xf32>
    %1344 = arith.subf %1156, %1343 : vector<16x128xf32>
    %1345 = arith.addf %1250, %1343 : vector<16x128xf32>
    %cst_295 = arith.constant 0.000000e+00 : f32
    %1346 = vector.broadcast %cst_295 : f32 to vector<16x128xf32>
    %1347 = arith.mulf %1341, %1302 : vector<16x128xf32>
    %1348 = arith.mulf %1342, %1308 : vector<16x128xf32>
    %1349 = arith.subf %1347, %1348 : vector<16x128xf32>
    %1350 = arith.mulf %1342, %1302 : vector<16x128xf32>
    %1351 = arith.mulf %1341, %1308 : vector<16x128xf32>
    %1352 = arith.addf %1350, %1351 : vector<16x128xf32>
    %1353 = arith.mulf %1341, %1305 : vector<16x128xf32>
    %1354 = arith.mulf %1342, %1311 : vector<16x128xf32>
    %1355 = arith.subf %1353, %1354 : vector<16x128xf32>
    %1356 = arith.mulf %1342, %1305 : vector<16x128xf32>
    %1357 = arith.mulf %1341, %1311 : vector<16x128xf32>
    %1358 = arith.addf %1356, %1357 : vector<16x128xf32>
    %1359 = arith.subf %1297, %1344 : vector<16x128xf32>
    %cst_296 = arith.constant 2.000000e+00 : f32
    %1360 = vector.broadcast %cst_296 : f32 to vector<16x128xf32>
    %1361 = arith.mulf %1360, %1349 : vector<16x128xf32>
    %1362 = arith.mulf %1359, %1359 : vector<16x128xf32>
    %1363 = arith.mulf %1361, %1361 : vector<16x128xf32>
    %1364 = arith.addf %1362, %1363 : vector<16x128xf32>
    %cst_297 = arith.constant 1.000000e-30 : f32
    %1365 = vector.broadcast %cst_297 : f32 to vector<16x128xf32>
    %1366 = arith.addf %1364, %1365 : vector<16x128xf32>
    %1367 = math.rsqrt %1366 : vector<16x128xf32>
    %1368 = arith.mulf %1364, %1367 : vector<16x128xf32>
    %1369 = math.absf %1359 : vector<16x128xf32>
    %1370 = arith.addf %1369, %1368 : vector<16x128xf32>
    %cst_298 = arith.constant 1.000000e-30 : f32
    %1371 = vector.broadcast %cst_298 : f32 to vector<16x128xf32>
    %1372 = arith.addf %1370, %1371 : vector<16x128xf32>
    %cst_299 = arith.constant 0.000000e+00 : f32
    %1373 = vector.broadcast %cst_299 : f32 to vector<16x128xf32>
    %1374 = arith.cmpf oge, %1359, %1373 : vector<16x128xf32>
    %cst_300 = arith.constant 1.000000e+00 : f32
    %cst_301 = arith.constant -1.000000e+00 : f32
    %1375 = vector.broadcast %cst_300 : f32 to vector<16x128xf32>
    %1376 = vector.broadcast %cst_301 : f32 to vector<16x128xf32>
    %1377 = arith.select %1374, %1375, %1376 : vector<16x128xi1>, vector<16x128xf32>
    %1378 = tpu.reciprocal %1372 {approx = true} : vector<16x128xf32> -> vector<16x128xf32>
    %1379 = arith.mulf %1372, %1378 : vector<16x128xf32>
    %cst_302 = arith.constant 2.000000e+00 : f32
    %1380 = vector.broadcast %cst_302 : f32 to vector<16x128xf32>
    %1381 = arith.subf %1380, %1379 : vector<16x128xf32>
    %1382 = arith.mulf %1378, %1381 : vector<16x128xf32>
    %1383 = arith.mulf %1377, %1361 : vector<16x128xf32>
    %1384 = arith.mulf %1383, %1382 : vector<16x128xf32>
    %1385 = arith.mulf %1384, %1384 : vector<16x128xf32>
    %cst_303 = arith.constant 1.000000e+00 : f32
    %1386 = vector.broadcast %cst_303 : f32 to vector<16x128xf32>
    %1387 = arith.addf %1386, %1385 : vector<16x128xf32>
    %1388 = math.rsqrt %1387 : vector<16x128xf32>
    %1389 = arith.mulf %1384, %1388 : vector<16x128xf32>
    %1390 = arith.mulf %1384, %1349 : vector<16x128xf32>
    %1391 = arith.subf %1344, %1390 : vector<16x128xf32>
    %1392 = arith.addf %1297, %1390 : vector<16x128xf32>
    %cst_304 = arith.constant 0.000000e+00 : f32
    %1393 = vector.broadcast %cst_304 : f32 to vector<16x128xf32>
    %1394 = arith.mulf %1388, %1346 : vector<16x128xf32>
    %1395 = arith.mulf %1389, %1352 : vector<16x128xf32>
    %1396 = arith.subf %1394, %1395 : vector<16x128xf32>
    %1397 = arith.mulf %1389, %1346 : vector<16x128xf32>
    %1398 = arith.mulf %1388, %1352 : vector<16x128xf32>
    %1399 = arith.addf %1397, %1398 : vector<16x128xf32>
    %1400 = arith.mulf %1388, %1355 : vector<16x128xf32>
    %1401 = arith.mulf %1389, %1299 : vector<16x128xf32>
    %1402 = arith.subf %1400, %1401 : vector<16x128xf32>
    %1403 = arith.mulf %1389, %1355 : vector<16x128xf32>
    %1404 = arith.mulf %1388, %1299 : vector<16x128xf32>
    %1405 = arith.addf %1403, %1404 : vector<16x128xf32>
    %1406 = arith.subf %1298, %1391 : vector<16x128xf32>
    %cst_305 = arith.constant 2.000000e+00 : f32
    %1407 = vector.broadcast %cst_305 : f32 to vector<16x128xf32>
    %1408 = arith.mulf %1407, %1402 : vector<16x128xf32>
    %1409 = arith.mulf %1406, %1406 : vector<16x128xf32>
    %1410 = arith.mulf %1408, %1408 : vector<16x128xf32>
    %1411 = arith.addf %1409, %1410 : vector<16x128xf32>
    %cst_306 = arith.constant 1.000000e-30 : f32
    %1412 = vector.broadcast %cst_306 : f32 to vector<16x128xf32>
    %1413 = arith.addf %1411, %1412 : vector<16x128xf32>
    %1414 = math.rsqrt %1413 : vector<16x128xf32>
    %1415 = arith.mulf %1411, %1414 : vector<16x128xf32>
    %1416 = math.absf %1406 : vector<16x128xf32>
    %1417 = arith.addf %1416, %1415 : vector<16x128xf32>
    %cst_307 = arith.constant 1.000000e-30 : f32
    %1418 = vector.broadcast %cst_307 : f32 to vector<16x128xf32>
    %1419 = arith.addf %1417, %1418 : vector<16x128xf32>
    %cst_308 = arith.constant 0.000000e+00 : f32
    %1420 = vector.broadcast %cst_308 : f32 to vector<16x128xf32>
    %1421 = arith.cmpf oge, %1406, %1420 : vector<16x128xf32>
    %cst_309 = arith.constant 1.000000e+00 : f32
    %cst_310 = arith.constant -1.000000e+00 : f32
    %1422 = vector.broadcast %cst_309 : f32 to vector<16x128xf32>
    %1423 = vector.broadcast %cst_310 : f32 to vector<16x128xf32>
    %1424 = arith.select %1421, %1422, %1423 : vector<16x128xi1>, vector<16x128xf32>
    %1425 = tpu.reciprocal %1419 {approx = true} : vector<16x128xf32> -> vector<16x128xf32>
    %1426 = arith.mulf %1419, %1425 : vector<16x128xf32>
    %cst_311 = arith.constant 2.000000e+00 : f32
    %1427 = vector.broadcast %cst_311 : f32 to vector<16x128xf32>
    %1428 = arith.subf %1427, %1426 : vector<16x128xf32>
    %1429 = arith.mulf %1425, %1428 : vector<16x128xf32>
    %1430 = arith.mulf %1424, %1408 : vector<16x128xf32>
    %1431 = arith.mulf %1430, %1429 : vector<16x128xf32>
    %1432 = arith.mulf %1431, %1431 : vector<16x128xf32>
    %cst_312 = arith.constant 1.000000e+00 : f32
    %1433 = vector.broadcast %cst_312 : f32 to vector<16x128xf32>
    %1434 = arith.addf %1433, %1432 : vector<16x128xf32>
    %1435 = math.rsqrt %1434 : vector<16x128xf32>
    %1436 = arith.mulf %1431, %1435 : vector<16x128xf32>
    %1437 = arith.mulf %1431, %1402 : vector<16x128xf32>
    %1438 = arith.subf %1391, %1437 : vector<16x128xf32>
    %1439 = arith.addf %1298, %1437 : vector<16x128xf32>
    %1440 = arith.mulf %1436, %1396 : vector<16x128xf32>
    %1441 = arith.mulf %1435, %1358 : vector<16x128xf32>
    %1442 = arith.addf %1440, %1441 : vector<16x128xf32>
    %1443 = arith.mulf %1436, %1393 : vector<16x128xf32>
    %1444 = arith.mulf %1435, %1405 : vector<16x128xf32>
    %1445 = arith.addf %1443, %1444 : vector<16x128xf32>
    %1446 = arith.subf %1392, %1345 : vector<16x128xf32>
    %cst_313 = arith.constant 2.000000e+00 : f32
    %1447 = vector.broadcast %cst_313 : f32 to vector<16x128xf32>
    %1448 = arith.mulf %1447, %1399 : vector<16x128xf32>
    %1449 = arith.mulf %1446, %1446 : vector<16x128xf32>
    %1450 = arith.mulf %1448, %1448 : vector<16x128xf32>
    %1451 = arith.addf %1449, %1450 : vector<16x128xf32>
    %cst_314 = arith.constant 1.000000e-30 : f32
    %1452 = vector.broadcast %cst_314 : f32 to vector<16x128xf32>
    %1453 = arith.addf %1451, %1452 : vector<16x128xf32>
    %1454 = math.rsqrt %1453 : vector<16x128xf32>
    %1455 = arith.mulf %1451, %1454 : vector<16x128xf32>
    %1456 = math.absf %1446 : vector<16x128xf32>
    %1457 = arith.addf %1456, %1455 : vector<16x128xf32>
    %cst_315 = arith.constant 1.000000e-30 : f32
    %1458 = vector.broadcast %cst_315 : f32 to vector<16x128xf32>
    %1459 = arith.addf %1457, %1458 : vector<16x128xf32>
    %cst_316 = arith.constant 0.000000e+00 : f32
    %1460 = vector.broadcast %cst_316 : f32 to vector<16x128xf32>
    %1461 = arith.cmpf oge, %1446, %1460 : vector<16x128xf32>
    %cst_317 = arith.constant 1.000000e+00 : f32
    %cst_318 = arith.constant -1.000000e+00 : f32
    %1462 = vector.broadcast %cst_317 : f32 to vector<16x128xf32>
    %1463 = vector.broadcast %cst_318 : f32 to vector<16x128xf32>
    %1464 = arith.select %1461, %1462, %1463 : vector<16x128xi1>, vector<16x128xf32>
    %1465 = tpu.reciprocal %1459 {approx = true} : vector<16x128xf32> -> vector<16x128xf32>
    %1466 = arith.mulf %1459, %1465 : vector<16x128xf32>
    %cst_319 = arith.constant 2.000000e+00 : f32
    %1467 = vector.broadcast %cst_319 : f32 to vector<16x128xf32>
    %1468 = arith.subf %1467, %1466 : vector<16x128xf32>
    %1469 = arith.mulf %1465, %1468 : vector<16x128xf32>
    %1470 = arith.mulf %1464, %1448 : vector<16x128xf32>
    %1471 = arith.mulf %1470, %1469 : vector<16x128xf32>
    %1472 = arith.mulf %1471, %1471 : vector<16x128xf32>
    %cst_320 = arith.constant 1.000000e+00 : f32
    %1473 = vector.broadcast %cst_320 : f32 to vector<16x128xf32>
    %1474 = arith.addf %1473, %1472 : vector<16x128xf32>
    %1475 = math.rsqrt %1474 : vector<16x128xf32>
    %1476 = arith.mulf %1471, %1475 : vector<16x128xf32>
    %1477 = arith.mulf %1471, %1399 : vector<16x128xf32>
    %1478 = arith.subf %1345, %1477 : vector<16x128xf32>
    %1479 = arith.addf %1392, %1477 : vector<16x128xf32>
    %cst_321 = arith.constant 0.000000e+00 : f32
    %1480 = vector.broadcast %cst_321 : f32 to vector<16x128xf32>
    %1481 = arith.mulf %1475, %1442 : vector<16x128xf32>
    %1482 = arith.mulf %1476, %1445 : vector<16x128xf32>
    %1483 = arith.subf %1481, %1482 : vector<16x128xf32>
    %1484 = arith.mulf %1476, %1442 : vector<16x128xf32>
    %1485 = arith.mulf %1475, %1445 : vector<16x128xf32>
    %1486 = arith.addf %1484, %1485 : vector<16x128xf32>
    %1487 = arith.subf %1439, %1478 : vector<16x128xf32>
    %cst_322 = arith.constant 2.000000e+00 : f32
    %1488 = vector.broadcast %cst_322 : f32 to vector<16x128xf32>
    %1489 = arith.mulf %1488, %1483 : vector<16x128xf32>
    %1490 = arith.mulf %1487, %1487 : vector<16x128xf32>
    %1491 = arith.mulf %1489, %1489 : vector<16x128xf32>
    %1492 = arith.addf %1490, %1491 : vector<16x128xf32>
    %cst_323 = arith.constant 1.000000e-30 : f32
    %1493 = vector.broadcast %cst_323 : f32 to vector<16x128xf32>
    %1494 = arith.addf %1492, %1493 : vector<16x128xf32>
    %1495 = math.rsqrt %1494 : vector<16x128xf32>
    %1496 = arith.mulf %1492, %1495 : vector<16x128xf32>
    %1497 = math.absf %1487 : vector<16x128xf32>
    %1498 = arith.addf %1497, %1496 : vector<16x128xf32>
    %cst_324 = arith.constant 1.000000e-30 : f32
    %1499 = vector.broadcast %cst_324 : f32 to vector<16x128xf32>
    %1500 = arith.addf %1498, %1499 : vector<16x128xf32>
    %cst_325 = arith.constant 0.000000e+00 : f32
    %1501 = vector.broadcast %cst_325 : f32 to vector<16x128xf32>
    %1502 = arith.cmpf oge, %1487, %1501 : vector<16x128xf32>
    %cst_326 = arith.constant 1.000000e+00 : f32
    %cst_327 = arith.constant -1.000000e+00 : f32
    %1503 = vector.broadcast %cst_326 : f32 to vector<16x128xf32>
    %1504 = vector.broadcast %cst_327 : f32 to vector<16x128xf32>
    %1505 = arith.select %1502, %1503, %1504 : vector<16x128xi1>, vector<16x128xf32>
    %1506 = tpu.reciprocal %1500 {approx = true} : vector<16x128xf32> -> vector<16x128xf32>
    %1507 = arith.mulf %1500, %1506 : vector<16x128xf32>
    %cst_328 = arith.constant 2.000000e+00 : f32
    %1508 = vector.broadcast %cst_328 : f32 to vector<16x128xf32>
    %1509 = arith.subf %1508, %1507 : vector<16x128xf32>
    %1510 = arith.mulf %1506, %1509 : vector<16x128xf32>
    %1511 = arith.mulf %1505, %1489 : vector<16x128xf32>
    %1512 = arith.mulf %1511, %1510 : vector<16x128xf32>
    %1513 = arith.mulf %1512, %1512 : vector<16x128xf32>
    %cst_329 = arith.constant 1.000000e+00 : f32
    %1514 = vector.broadcast %cst_329 : f32 to vector<16x128xf32>
    %1515 = arith.addf %1514, %1513 : vector<16x128xf32>
    %1516 = math.rsqrt %1515 : vector<16x128xf32>
    %1517 = arith.mulf %1512, %1516 : vector<16x128xf32>
    %1518 = arith.mulf %1512, %1483 : vector<16x128xf32>
    %1519 = arith.subf %1478, %1518 : vector<16x128xf32>
    %1520 = arith.addf %1439, %1518 : vector<16x128xf32>
    %1521 = arith.mulf %1517, %1480 : vector<16x128xf32>
    %1522 = arith.mulf %1516, %1486 : vector<16x128xf32>
    %1523 = arith.addf %1521, %1522 : vector<16x128xf32>
    %1524 = arith.subf %1520, %1479 : vector<16x128xf32>
    %cst_330 = arith.constant 2.000000e+00 : f32
    %1525 = vector.broadcast %cst_330 : f32 to vector<16x128xf32>
    %1526 = arith.mulf %1525, %1523 : vector<16x128xf32>
    %1527 = arith.mulf %1524, %1524 : vector<16x128xf32>
    %1528 = arith.mulf %1526, %1526 : vector<16x128xf32>
    %1529 = arith.addf %1527, %1528 : vector<16x128xf32>
    %cst_331 = arith.constant 1.000000e-30 : f32
    %1530 = vector.broadcast %cst_331 : f32 to vector<16x128xf32>
    %1531 = arith.addf %1529, %1530 : vector<16x128xf32>
    %1532 = math.rsqrt %1531 : vector<16x128xf32>
    %1533 = arith.mulf %1529, %1532 : vector<16x128xf32>
    %1534 = math.absf %1524 : vector<16x128xf32>
    %1535 = arith.addf %1534, %1533 : vector<16x128xf32>
    %cst_332 = arith.constant 1.000000e-30 : f32
    %1536 = vector.broadcast %cst_332 : f32 to vector<16x128xf32>
    %1537 = arith.addf %1535, %1536 : vector<16x128xf32>
    %cst_333 = arith.constant 0.000000e+00 : f32
    %1538 = vector.broadcast %cst_333 : f32 to vector<16x128xf32>
    %1539 = arith.cmpf oge, %1524, %1538 : vector<16x128xf32>
    %cst_334 = arith.constant 1.000000e+00 : f32
    %cst_335 = arith.constant -1.000000e+00 : f32
    %1540 = vector.broadcast %cst_334 : f32 to vector<16x128xf32>
    %1541 = vector.broadcast %cst_335 : f32 to vector<16x128xf32>
    %1542 = arith.select %1539, %1540, %1541 : vector<16x128xi1>, vector<16x128xf32>
    %1543 = tpu.reciprocal %1537 {approx = true} : vector<16x128xf32> -> vector<16x128xf32>
    %1544 = arith.mulf %1537, %1543 : vector<16x128xf32>
    %cst_336 = arith.constant 2.000000e+00 : f32
    %1545 = vector.broadcast %cst_336 : f32 to vector<16x128xf32>
    %1546 = arith.subf %1545, %1544 : vector<16x128xf32>
    %1547 = arith.mulf %1543, %1546 : vector<16x128xf32>
    %1548 = arith.mulf %1542, %1526 : vector<16x128xf32>
    %1549 = arith.mulf %1548, %1547 : vector<16x128xf32>
    %1550 = arith.mulf %1549, %1523 : vector<16x128xf32>
    %1551 = arith.subf %1479, %1550 : vector<16x128xf32>
    %1552 = arith.addf %1520, %1550 : vector<16x128xf32>
    %1553 = arith.minimumf %1438, %1519 : vector<16x128xf32>
    %1554 = arith.maximumf %1438, %1519 : vector<16x128xf32>
    %1555 = arith.minimumf %1551, %1552 : vector<16x128xf32>
    %1556 = arith.maximumf %1551, %1552 : vector<16x128xf32>
    %1557 = arith.minimumf %1554, %1555 : vector<16x128xf32>
    %1558 = arith.maximumf %1554, %1555 : vector<16x128xf32>
    %1559 = arith.minimumf %1553, %1557 : vector<16x128xf32>
    %1560 = arith.maximumf %1553, %1557 : vector<16x128xf32>
    %1561 = arith.minimumf %1558, %1556 : vector<16x128xf32>
    %1562 = arith.maximumf %1558, %1556 : vector<16x128xf32>
    %1563 = arith.minimumf %1560, %1561 : vector<16x128xf32>
    %1564 = arith.maximumf %1560, %1561 : vector<16x128xf32>
    %cst_337 = arith.constant 1.000000e-30 : f32
    %1565 = vector.broadcast %cst_337 : f32 to vector<16x128xf32>
    %1566 = arith.maximumf %1559, %1565 : vector<16x128xf32>
    %1567 = math.log %1566 : vector<16x128xf32>
    %c0_338 = arith.constant 0 : index
    %c0_339 = arith.constant 0 : index
    %c0_340 = arith.constant 0 : index
    %1568 = vector.load %arg3[%c0_338, %c0_339, %c0_340] : memref<4x16x128xf32, #tpu.memory_space<vmem>>, vector<1x16x128xf32>
    %1569 = vector.shape_cast %1568 : vector<1x16x128xf32> to vector<16x128xf32>
    %1570 = vector.shape_cast %1567 : vector<16x128xf32> to vector<1x16x128xf32>
    tpu.vector_store %arg3[%c0_338, %c0_339, %c0_340], %1570 {strides = array<i32>} : memref<4x16x128xf32, #tpu.memory_space<vmem>>, vector<1x16x128xf32>,
    %cst_341 = arith.constant 1.000000e-30 : f32
    %1571 = vector.broadcast %cst_341 : f32 to vector<16x128xf32>
    %1572 = arith.maximumf %1563, %1571 : vector<16x128xf32>
    %1573 = math.log %1572 : vector<16x128xf32>
    %c1_342 = arith.constant 1 : index
    %c0_343 = arith.constant 0 : index
    %c0_344 = arith.constant 0 : index
    %1574 = vector.load %arg3[%c1_342, %c0_343, %c0_344] : memref<4x16x128xf32, #tpu.memory_space<vmem>>, vector<1x16x128xf32>
    %1575 = vector.shape_cast %1574 : vector<1x16x128xf32> to vector<16x128xf32>
    %1576 = vector.shape_cast %1573 : vector<16x128xf32> to vector<1x16x128xf32>
    tpu.vector_store %arg3[%c1_342, %c0_343, %c0_344], %1576 {strides = array<i32>} : memref<4x16x128xf32, #tpu.memory_space<vmem>>, vector<1x16x128xf32>,
    %cst_345 = arith.constant 1.000000e-30 : f32
    %1577 = vector.broadcast %cst_345 : f32 to vector<16x128xf32>
    %1578 = arith.maximumf %1564, %1577 : vector<16x128xf32>
    %1579 = math.log %1578 : vector<16x128xf32>
    %c2_346 = arith.constant 2 : index
    %c0_347 = arith.constant 0 : index
    %c0_348 = arith.constant 0 : index
    %1580 = vector.load %arg3[%c2_346, %c0_347, %c0_348] : memref<4x16x128xf32, #tpu.memory_space<vmem>>, vector<1x16x128xf32>
    %1581 = vector.shape_cast %1580 : vector<1x16x128xf32> to vector<16x128xf32>
    %1582 = vector.shape_cast %1579 : vector<16x128xf32> to vector<1x16x128xf32>
    tpu.vector_store %arg3[%c2_346, %c0_347, %c0_348], %1582 {strides = array<i32>} : memref<4x16x128xf32, #tpu.memory_space<vmem>>, vector<1x16x128xf32>,
    %cst_349 = arith.constant 1.000000e-30 : f32
    %1583 = vector.broadcast %cst_349 : f32 to vector<16x128xf32>
    %1584 = arith.maximumf %1562, %1583 : vector<16x128xf32>
    %1585 = math.log %1584 : vector<16x128xf32>
    %c3_350 = arith.constant 3 : index
    %c0_351 = arith.constant 0 : index
    %c0_352 = arith.constant 0 : index
    %1586 = vector.load %arg3[%c3_350, %c0_351, %c0_352] : memref<4x16x128xf32, #tpu.memory_space<vmem>>, vector<1x16x128xf32>
    %1587 = vector.shape_cast %1586 : vector<1x16x128xf32> to vector<16x128xf32>
    %1588 = vector.shape_cast %1585 : vector<16x128xf32> to vector<1x16x128xf32>
    tpu.vector_store %arg3[%c3_350, %c0_351, %c0_352], %1588 {strides = array<i32>} : memref<4x16x128xf32, #tpu.memory_space<vmem>>, vector<1x16x128xf32>,
    return
  }
  func.func @transform_0(%arg0: i32) -> (i32, i32, i32) {
    %c0_i32 = arith.constant 0 : i32
    %c0_i32_0 = arith.constant 0 : i32
    %c0_i32_1 = arith.constant 0 : i32
    return %c0_i32, %arg0, %c0_i32_0 : i32, i32, i32
  }
  func.func @transform_1(%arg0: i32) -> (i32, i32, i32) {
    %c0_i32 = arith.constant 0 : i32
    %c0_i32_0 = arith.constant 0 : i32
    %c0_i32_1 = arith.constant 0 : i32
    return %c0_i32, %arg0, %c0_i32_0 : i32, i32, i32
  }
  func.func @transform_2(%arg0: i32) -> (i32, i32, i32) {
    %c0_i32 = arith.constant 0 : i32
    %c0_i32_0 = arith.constant 0 : i32
    %c0_i32_1 = arith.constant 0 : i32
    return %c0_i32, %arg0, %c0_i32_0 : i32, i32, i32
  }
}

</mosaic_0001>

<bundles_post_ra>
// kernel: spd_vvd.1
= control target key start
LH: loop header
LB: loop body
LE: loop exit
PB: predicated region body
PF: predicated region fallthrough
CT: control target
= control target key end

     0   :  { %s5260_s0 = inlined_call_operand.vmem [shape: f32[16,16,128], index: 0, kind: input, shape index: {}]   ;;  %s5261_s1 = inlined_call_operand.vmem [shape: f32[16,16,128], index: 1, kind: input, shape index: {}]   ;;  %s5262_s2 = inlined_call_operand.vmem [shape: f32[4,16,128], index: 2, kind: output, shape index: {}]  }
   0x1   :  { %v11_v0 = vld [vmem:[%s5260_s0] sm:$0xff]  ;;  %v12_v1 = vld [vmem:[%s5260_s0 + $0x8] sm:$0xff]  ;;  %v2562_v4 = vld [vmem:[%s5260_s0 + $0x10] sm:$0xff] }
   0x2   :  { %v13_v2 = vmax.f32 %v11_v0, 1e-30  ;;  %v14_v3 = vmax.f32 %v12_v1, 1e-30  ;;  %v2563_v5 = vld [vmem:[%s5260_s0 + $0x18] sm:$0xff]  ;;  %v2564_v6 = vld [vmem:[%s5260_s0 + $0x20] sm:$0xff] }
   0x3   :  { %v2566_v7 = vld [vmem:[%s5260_s0 + $0x30] sm:$0xff]  ;;  %v108_v8 = vld [vmem:[%s5261_s1] sm:$0xff]  ;;  %v2565_v9 = vld [vmem:[%s5260_s0 + $0x28] sm:$0xff] }
   0x4   :  { %2605 = vrsqrt.f32 %v13_v2  ;;  %v2567_v10 = vld [vmem:[%s5260_s0 + $0x38] sm:$0xff]  ;;  %v109_v11 = vld [vmem:[%s5261_s1 + $0x8] sm:$0xff]  ;;  %v2568_v17 = vld [vmem:[%s5260_s0 + $0x50] sm:$0xff] }
   0x5   :  { %2607 = vrsqrt.f32 %v14_v3  ;;  %v2569_v18 = vld [vmem:[%s5260_s0 + $0x58] sm:$0xff]  ;;  %v3071_v23 = vld [vmem:[%s5260_s0 + $0x60] sm:$0xff]  ;;  %v3076_v24 = vld [vmem:[%s5260_s0 + $0x70] sm:$0xff] }
   0x6   :  { %v3081_v25 = vld [vmem:[%s5260_s0 + $0xa0] sm:$0xff]  ;;  %v3089_v28 = vld [vmem:[%s5260_s0 + $0x68] sm:$0xff]  ;;  %v3098_v30 = vld [vmem:[%s5260_s0 + $0x78] sm:$0xff] }
   0x7   :  { %v3107_v32 = vld [vmem:[%s5260_s0 + $0xa8] sm:$0xff]  ;;  %v3142_v46 = vld [vmem:[%s5260_s0 + $0xb0] sm:$0xff]  ;;  %v3147_v47 = vld [vmem:[%s5260_s0 + $0xb8] sm:$0xff] }
   0x8   :  { %v3152_v48 = vld [vmem:[%s5260_s0 + $0xf0] sm:$0xff]  ;;  %v3165_v52 = vld [vmem:[%s5260_s0 + $0xf8] sm:$0xff]  ;;  %v3198_v63 = vld [vmem:[%s5261_s1 + $0x20] sm:$0xff] }
   0x9   :  { %v3174_v54 = vld [vmem:[%s5261_s1 + $0x10] sm:$0xff]  ;;  %v3179_v55 = vld [vmem:[%s5261_s1 + $0x18] sm:$0xff]  ;;  %v3208_v3 = vld [vmem:[%s5261_s1 + $0x28] sm:$0xff] }
   0xe   :  { %v3039_v12 = vpop.eup %2605 }
   0xf   :  { %v3041_v13 = vpop.eup %2607  ;;  %v3044_v14 = vmul.f32 %v3039_v12, %v2562_v4  ;;  %v3047_v15 = vmul.f32 %v3039_v12, %v2564_v6  ;;  %v3050_v16 = vmul.f32 %v3039_v12, %v2566_v7  ;;  %v110_v19 = vmul.f32 %v3039_v12, %v108_v8  ;;  %v3213_v4 = vld [vmem:[%s5261_s1 + $0x30] sm:$0xff] }
  0x10   :  { %v3060_v20 = vmul.f32 %v3041_v13, %v2563_v5  ;;  %v3063_v21 = vmul.f32 %v3041_v13, %v2565_v9  ;;  %v3066_v22 = vmul.f32 %v3041_v13, %v2567_v10  ;;  %v111_v26 = vmul.f32 %v3041_v13, %v109_v11  ;;  %v3218_v5 = vld [vmem:[%s5261_s1 + $0x38] sm:$0xff] }
  0x11   :  { %5271 = vst [vmem:[#allocation2_spill] sm:$0xff] %v3050_v16  ;;  %v35_v27 = vmul.f32 %v3044_v14, %v3044_v14  ;;  %v3093_v29 = vmul.f32 %v3047_v15, %v3044_v14  ;;  %v3102_v31 = vmul.f32 %v3050_v16, %v3044_v14  ;;  %v3111_v33 = vmul.f32 %v3047_v15, %v3047_v15 }
  0x12   :  { %5272 = vst [vmem:[#allocation3_spill] sm:$0xff] %v3063_v21  ;;  %5273 = vst [vmem:[#allocation4_spill] sm:$0xff] %v3066_v22  ;;  %v36_v34 = vmul.f32 %v3060_v20, %v3060_v20  ;;  %v3117_v35 = vmul.f32 %v3063_v21, %v3060_v20  ;;  %v3121_v36 = vmul.f32 %v3066_v22, %v3060_v20 }
  0x13   :  { %v3125_v37 = vmul.f32 %v3063_v21, %v3063_v21  ;;  %v37_v38 = vsub.f32 %v2568_v17, %v35_v27  ;;  %v48_v39 = vsub.f32 %v3071_v23, %v3093_v29  ;;  %v57_v40 = vsub.f32 %v3076_v24, %v3102_v31  ;;  %v2586_v27 = vld [vmem:[%s5261_s1 + $0x50] sm:$0xff] }
  0x14   :  { %v38_v42 = vsub.f32 %v2569_v18, %v36_v34  ;;  %v3156_v50 = vmul.f32 %v3050_v16, %v3047_v15  ;;  %v3160_v51 = vmul.f32 %v3066_v22, %v3063_v21  ;;  %v3169_v53 = vmul.f32 %v3050_v16, %v3050_v16 }
  0x15   :  { %v39_v49 = vmax.f32 %v37_v38, 1e-30  ;;  %v3183_v57 = vmul.f32 %v3066_v22, %v3066_v22  ;;  %v115_v58 = vmul.f32 %v110_v19, %v3044_v14  ;;  %v3187_v59 = vmul.f32 %v111_v26, %v3060_v20 }
  0x16   :  { %v40_v56 = vmax.f32 %v38_v42, 1e-30  ;;  %v3221_v6 = vmul.f32 %v110_v19, %v3047_v15  ;;  %v3224_v7 = vmul.f32 %v111_v26, %v3063_v21  ;;  %v3227_v8 = vmul.f32 %v110_v19, %v3050_v16  ;;  %v2587_v42 = vld [vmem:[%s5261_s1 + $0x58] sm:$0xff] }
  0x17   :  { %2609 = vrsqrt.f32 %v39_v49  ;;  %v117_v1 = vsub.f32 %v3174_v54, %v115_v58  ;;  %v118_v2 = vsub.f32 %v3179_v55, %v3187_v59  ;;  %v3230_v9 = vmul.f32 %v111_v26, %v3066_v22  ;;  %v3259_v49 = vld [vmem:[%s5261_s1 + $0x60] sm:$0xff] }
  0x18   :  { %2611 = vrsqrt.f32 %v40_v56  ;;  %v3233_v10 = vmul.f32 %v3039_v12, %v110_v19  ;;  %v3236_v11 = vmul.f32 %v3041_v13, %v111_v26  ;;  %v153_v17 = vmul.f32 %v3039_v12, %v3174_v54  ;;  %v3264_v54 = vld [vmem:[%s5261_s1 + $0x68] sm:$0xff] }
  0x19   :  { %v154_v18 = vmul.f32 %v3041_v13, %v3179_v55  ;;  %v126_v34 = vsub.f32 %v3198_v63, %v3221_v6  ;;  %v127_v19 = vsub.f32 %v3208_v3, %v3224_v7  ;;  %v3277_v6 = vld [vmem:[%s5261_s1 + $0x70] sm:$0xff]  ;;  %v3282_v7 = vld [vmem:[%s5261_s1 + $0x78] sm:$0xff]  ;;  %v202_v0 = vmul.f32 %v3039_v12, %v3198_v63 }
  0x1a   :  { %5274 = vst [vmem:[#allocation5_spill] sm:$0xff] %v3233_v10  ;;  %5275 = vst [vmem:[#allocation6_spill] sm:$0xff] %v3236_v11  ;;  %v158_v55 = vmul.f32 %v153_v17, %v3044_v14  ;;  %v3269_v58 = vmul.f32 %v153_v17, %v3047_v15  ;;  %v3285_v38 = vmul.f32 %v153_v17, %v3050_v16 }
  0x1b   :  { %v159_v56 = vmul.f32 %v154_v18, %v3060_v20  ;;  %v3272_v59 = vmul.f32 %v154_v18, %v3063_v21  ;;  %v3288_v26 = vmul.f32 %v154_v18, %v3066_v22  ;;  %v203_v61 = vmul.f32 %v3041_v13, %v3208_v3 }
  0x1c   :  { %v160_v45 = vsub.f32 %v2586_v27, %v158_v55  ;;  %v169_v60 = vsub.f32 %v3259_v49, %v3269_v58  ;;  %v182_v17 = vsub.f32 %v3277_v6, %v3285_v38  ;;  %v204_v44 = vmul.f32 %v202_v0, %v3044_v14 }
  0x1d   :  { %v161_v62 = vsub.f32 %v2587_v42, %v159_v56  ;;  %v170_v41 = vsub.f32 %v3264_v54, %v3272_v59  ;;  %v183_v18 = vsub.f32 %v3282_v7, %v3288_v26  ;;  %v205_v63 = vmul.f32 %v203_v61, %v3060_v20 }
  0x1e   :  { %v3305_v3 = vmul.f32 %v202_v0, %v3047_v15  ;;  %v3308_v27 = vmul.f32 %v203_v61, %v3063_v21  ;;  %v3311_v42 = vmul.f32 %v202_v0, %v3050_v16  ;;  %v3314_v55 = vmul.f32 %v203_v61, %v3066_v22 }
  0x1f   :  { %v206_v26 = vsub.f32 %v3259_v49, %v204_v44  ;;  %v207_v56 = vsub.f32 %v3264_v54, %v205_v63  ;;  %v3322_v58 = vmul.f32 %v3039_v12, %v3213_v4  ;;  %v3326_v59 = vmul.f32 %v3041_v13, %v3218_v5 }
  0x20   :  { %v5276_v54 = vsub.f32 %v3089_v28, %v3117_v35  ;;  %v5277_v23 = vsub.f32 %v3098_v30, %v3121_v36  ;;  %v5280_v11 = vsub.f32 %v3152_v48, %v3169_v53  ;;  %v5281_v16 = vsub.f32 %v3107_v32, %v3125_v37 }
  0x21   :  { %v3316_v38 = vpop.eup %2609 }
  0x22   :  { %v3328_v43 = vpop.eup %2611  ;;  %v3334_v61 = vmul.f32 %v3316_v38, %v48_v39  ;;  %v3340_v44 = vmul.f32 %v3316_v38, %v57_v40  ;;  %v119_v0 = vmul.f32 %v3316_v38, %v117_v1  ;;  %v3344_v49 = vmul.f32 %v3316_v38, %v160_v45 }
  0x23   :  { %v3350_v63 = vmul.f32 %v3328_v43, %v5276_v54  ;;  %v3356_v29 = vmul.f32 %v3328_v43, %v5277_v23  ;;  %v120_v24 = vmul.f32 %v3328_v43, %v118_v2  ;;  %v3360_v31 = vmul.f32 %v3328_v43, %v161_v62 }
  0x24   :  { %v68_v39 = vmul.f32 %v3334_v61, %v3334_v61  ;;  %v83_v28 = vmul.f32 %v3340_v44, %v3334_v61  ;;  %v96_v35 = vmul.f32 %v3340_v44, %v3340_v44  ;;  %v128_v40 = vmul.f32 %v119_v0, %v3334_v61 }
  0x25   :  { %v69_v30 = vmul.f32 %v3350_v63, %v3350_v63  ;;  %v84_v36 = vmul.f32 %v3356_v29, %v3350_v63  ;;  %v97_v45 = vmul.f32 %v3356_v29, %v3356_v29  ;;  %v129_v62 = vmul.f32 %v120_v24, %v3350_v63 }
  0x26   :  { %v5278_v1 = vsub.f32 %v3081_v25, %v3111_v33  ;;  %v5279_v54 = vsub.f32 %v3142_v46, %v3156_v50  ;;  %v3387_v10 = vsub.f32 %v5280_v11, %v96_v35  ;;  %v3389_v22 = vsub.f32 %v126_v34, %v128_v40  ;;  %v2593_v35 = vld [vmem:[%s5261_s1 + $0xa8] sm:$0xff]  ;;  %v3435_v40 = vld [vmem:[%s5261_s1 + $0xb0] sm:$0xff] }
  0x27   :  { %v71_v21 = vsub.f32 %v5281_v16, %v69_v30  ;;  %v5282_v25 = vsub.f32 %v3147_v47, %v3160_v51  ;;  %v5283_v46 = vsub.f32 %v3165_v52, %v3183_v57  ;;  %v141_v53 = vmul.f32 %v119_v0, %v3340_v44  ;;  %v2592_v52 = vld [vmem:[%s5261_s1 + $0xa0] sm:$0xff] }
  0x28   :  { %v70_v2 = vsub.f32 %v5278_v1, %v68_v39  ;;  %v3382_v23 = vsub.f32 %v5279_v54, %v83_v28  ;;  %v3404_v39 = vsub.f32 %v127_v19, %v129_v62  ;;  %v142_v11 = vmul.f32 %v120_v24, %v3356_v29 }
  0x29   :  { %v3397_v33 = vsub.f32 %v5282_v25, %v84_v36  ;;  %v3402_v50 = vsub.f32 %v5283_v46, %v97_v45  ;;  %v171_v16 = vmul.f32 %v3344_v49, %v3334_v61  ;;  %v73_v32 = vmax.f32 %v71_v21, 1e-30 }
  0x2a   :  { %v72_v48 = vmax.f32 %v70_v2, 1e-30  ;;  %v172_v37 = vmul.f32 %v3360_v31, %v3350_v63  ;;  %v184_v47 = vmul.f32 %v3344_v49, %v3340_v44  ;;  %v185_v51 = vmul.f32 %v3360_v31, %v3356_v29 }
  0x2b   :  { %v5284_v57 = vsub.f32 %v3213_v4, %v3227_v8  ;;  %v5285_v21 = vsub.f32 %v3218_v5, %v3230_v9  ;;  %v173_v28 = vsub.f32 %v169_v60, %v171_v16  ;;  %v3440_v4 = vld [vmem:[%s5261_s1 + $0xb8] sm:$0xff]  ;;  %v3447_v60 = vmul.f32 %v3039_v12, %v119_v0 }
  0x2c   :  { %2613 = vrsqrt.f32 %v72_v48  ;;  %v174_v8 = vsub.f32 %v170_v41, %v172_v37  ;;  %v3442_v5 = vsub.f32 %v182_v17, %v184_v47  ;;  %v3444_v9 = vsub.f32 %v183_v18, %v185_v51 }
  0x2d   :  { %v3422_v34 = vsub.f32 %v5284_v57, %v141_v53  ;;  %v3427_v19 = vsub.f32 %v5285_v21, %v142_v11  ;;  %2615 = vrsqrt.f32 %v73_v32  ;;  %v3450_v30 = vmul.f32 %v3041_v13, %v120_v24 }
  0x2e   :  { %v208_v36 = vmul.f32 %v3316_v38, %v206_v26  ;;  %v209_v45 = vmul.f32 %v3328_v43, %v207_v56  ;;  %v215_v62 = vsub.f32 %v2592_v52, %v3305_v3  ;;  %v216_v1 = vsub.f32 %v2593_v35, %v3308_v27  ;;  %v5287_v52 = vld [vmem:[#allocation2_spill] sm:$0xff] }
  0x2f   :  { %v228_v41 = vsub.f32 %v3435_v40, %v3311_v42  ;;  %v229_v17 = vsub.f32 %v3440_v4, %v3314_v55  ;;  %v196_v18 = vmul.f32 %v3447_v60, %v3044_v14  ;;  %v197_v0 = vmul.f32 %v3450_v30, %v3060_v20 }
  0x30   :  { %v217_v26 = vmul.f32 %v208_v36, %v3334_v61  ;;  %v218_v56 = vmul.f32 %v209_v45, %v3350_v63  ;;  %v230_v3 = vmul.f32 %v208_v36, %v3340_v44  ;;  %v231_v27 = vmul.f32 %v209_v45, %v3356_v29  ;;  %v5289_v45 = vld [vmem:[#allocation5_spill] sm:$0xff] }
  0x31   :  { %v260_v42 = vmul.f32 %v3322_v58, %v3044_v14  ;;  %v261_v55 = vmul.f32 %v3326_v59, %v3060_v20  ;;  %v198_v24 = vsub.f32 %v3344_v49, %v196_v18  ;;  %v199_v2 = vsub.f32 %v3360_v31, %v197_v0  ;;  %v5286_v31 = vld [vmem:[#allocation3_spill] sm:$0xff] }
  0x32   :  { %v219_v54 = vsub.f32 %v215_v62, %v217_v26  ;;  %v220_v25 = vsub.f32 %v216_v1, %v218_v56  ;;  %v3474_v46 = vsub.f32 %v228_v41, %v230_v3  ;;  %v3476_v48 = vsub.f32 %v229_v17, %v231_v27  ;;  %v5290_v1 = vld [vmem:[#allocation6_spill] sm:$0xff] }
  0x33   :  { %v262_v53 = vsub.f32 %v3277_v6, %v260_v42  ;;  %v263_v11 = vsub.f32 %v3282_v7, %v261_v55  ;;  %v3481_v16 = vmul.f32 %v3316_v38, %v198_v24  ;;  %v3484_v32 = vmul.f32 %v3328_v43, %v199_v2  ;;  %v5288_v7 = vld [vmem:[#allocation4_spill] sm:$0xff] }
  0x34   :  { %v266_v49 = vmul.f32 %v3322_v58, %v3047_v15  ;;  %v267_v37 = vmul.f32 %v3326_v59, %v5286_v31  ;;  %v279_v6 = vmul.f32 %v3322_v58, %v5287_v52  ;;  %v280_v57 = vmul.f32 %v3326_v59, %v5288_v7 }
  0x35   :  { %v264_v47 = vmul.f32 %v3316_v38, %v262_v53  ;;  %v265_v51 = vmul.f32 %v3328_v43, %v263_v11  ;;  %v3502_v62 = vsub.f32 %v3481_v16, %v5289_v45  ;;  %v3506_v41 = vsub.f32 %v3484_v32, %v5290_v1 }
  0x36   :  { %v3496_v21 = vpop.eup %2613  ;;  %v268_v35 = vsub.f32 %v3435_v40, %v266_v49  ;;  %v269_v36 = vsub.f32 %v3440_v4, %v267_v37 }
  0x37   :  { %v3508_v17 = vpop.eup %2615  ;;  %v3512_v58 = vmul.f32 %v3496_v21, %v3382_v23  ;;  %v132_v59 = vmul.f32 %v3496_v21, %v3389_v22  ;;  %v175_v40 = vmul.f32 %v3496_v21, %v173_v28  ;;  %v3518_v4 = vmul.f32 %v3496_v21, %v219_v54  ;;  %v2596_v54 = vld [vmem:[%s5261_s1 + $0xf0] sm:$0xff] }
  0x38   :  { %v3522_v18 = vmul.f32 %v3508_v17, %v3397_v33  ;;  %v133_v0 = vmul.f32 %v3508_v17, %v3404_v39  ;;  %v176_v26 = vmul.f32 %v3508_v17, %v174_v8  ;;  %v222_v23 = vmul.f32 %v3508_v17, %v220_v25  ;;  %v2597_v25 = vld [vmem:[%s5261_s1 + $0xf8] sm:$0xff] }
  0x39   :  { %v100_v56 = vmul.f32 %v3512_v58, %v3512_v58  ;;  %v3531_v22 = vmul.f32 %v132_v59, %v3512_v58  ;;  %v3534_v28 = vmul.f32 %v175_v40, %v3512_v58  ;;  %v3538_v33 = vmul.f32 %v3518_v4, %v3512_v58 }
  0x3a   :  { %v101_v39 = vmul.f32 %v3522_v18, %v3522_v18  ;;  %v3543_v8 = vmul.f32 %v133_v0, %v3522_v18  ;;  %v3546_v3 = vmul.f32 %v176_v26, %v3522_v18  ;;  %v3549_v27 = vmul.f32 %v222_v23, %v3522_v18 }
  0x3b   :  { %v102_v42 = vsub.f32 %v3387_v10, %v100_v56  ;;  %v147_v55 = vsub.f32 %v3422_v34, %v3531_v22  ;;  %v190_v24 = vsub.f32 %v3442_v5, %v3534_v28  ;;  %v236_v2 = vsub.f32 %v3474_v46, %v3538_v33 }
  0x3c   :  { %v103_v53 = vsub.f32 %v3402_v50, %v101_v39  ;;  %v148_v10 = vsub.f32 %v3427_v19, %v3543_v8  ;;  %v191_v34 = vsub.f32 %v3444_v9, %v3546_v3  ;;  %v237_v5 = vsub.f32 %v3476_v48, %v3549_v27 }
  0x3d   :  { %v104_v46 = vmax.f32 %v102_v42, 1e-30  ;;  %v3572_v11 = vmul.f32 %v3039_v12, %v132_v59  ;;  %v3575_v49 = vmul.f32 %v3041_v13, %v133_v0  ;;  %v270_v37 = vmul.f32 %v264_v47, %v3334_v61 }
  0x3e   :  { %v105_v56 = vmax.f32 %v103_v53, 1e-30  ;;  %v271_v50 = vmul.f32 %v265_v51, %v3350_v63  ;;  %v281_v22 = vsub.f32 %v2596_v54, %v279_v6  ;;  %v282_v19 = vsub.f32 %v2597_v25, %v280_v57 }
  0x3f   :  { %2617 = vrsqrt.f32 %v104_v46  ;;  %v242_v9 = vmul.f32 %v3572_v11, %v3044_v14  ;;  %v243_v48 = vmul.f32 %v3575_v49, %v3060_v20  ;;  %v248_v59 = vmul.f32 %v3572_v11, %v3047_v15 }
  0x40   :  { %2619 = vrsqrt.f32 %v105_v56  ;;  %v249_v0 = vmul.f32 %v3575_v49, %v5286_v31  ;;  %v272_v28 = vsub.f32 %v268_v35, %v270_v37  ;;  %v273_v33 = vsub.f32 %v269_v36, %v271_v50 }
  0x41   :  { %v244_v39 = vsub.f32 %v175_v40, %v242_v9  ;;  %v245_v8 = vsub.f32 %v176_v26, %v243_v48  ;;  %v250_v6 = vsub.f32 %v3518_v4, %v248_v59  ;;  %v283_v57 = vmul.f32 %v264_v47, %v3340_v44 }
  0x42   :  { %v251_v3 = vsub.f32 %v222_v23, %v249_v0  ;;  %v274_v27 = vmul.f32 %v3496_v21, %v272_v28  ;;  %v275_v42 = vmul.f32 %v3508_v17, %v273_v33  ;;  %v284_v54 = vmul.f32 %v265_v51, %v3356_v29 }
  0x43   :  { %v3593_v25 = vmul.f32 %v3316_v38, %v244_v39  ;;  %v3596_v53 = vmul.f32 %v3328_v43, %v245_v8  ;;  %v285_v35 = vsub.f32 %v281_v22, %v283_v57  ;;  %v3599_v36 = vmul.f32 2.0, %v3447_v60 }
  0x44   :  { %v286_v40 = vsub.f32 %v282_v19, %v284_v54  ;;  %v287_v47 = vmul.f32 %v274_v27, %v3512_v58  ;;  %v288_v4 = vmul.f32 %v275_v42, %v3522_v18  ;;  %v3604_v26 = vmul.f32 2.0, %v3450_v30 }
  0x45   :  { %v252_v51 = vmul.f32 %v3593_v25, %v3334_v61  ;;  %v253_v23 = vmul.f32 %v3596_v53, %v3350_v63  ;;  %v329_v46 = vmul.f32 %v3502_v62, %v3502_v62  ;;  %v330_v37 = vmul.f32 %v3506_v41, %v3506_v41 }
  0x46   :  { %v289_v56 = vsub.f32 %v285_v35, %v287_v47  ;;  %v290_v50 = vsub.f32 %v286_v40, %v288_v4  ;;  %v331_v22 = vmul.f32 %v3599_v36, %v3599_v36  ;;  %v332_v19 = vmul.f32 %v3604_v26, %v3604_v26 }
  0x47   :  { %v254_v9 = vsub.f32 %v250_v6, %v252_v51  ;;  %v255_v48 = vsub.f32 %v251_v3, %v253_v23  ;;  %vm347_vm0 = vcmp.ge.f32.partialorder %v3502_v62, 0.0  ;;  %vm348_vm1 = vcmp.ge.f32.partialorder %v3506_v41, 0.0 }
  0x48   :  { %v333_v59 = vadd.f32 %v331_v22, %v329_v46  ;;  %v334_v0 = vadd.f32 %v332_v19, %v330_v37 }
  0x49   :  { %v2618_v28 = vpop.eup %2617  ;;  %v3619_v33 = vmul.f32 %v3496_v21, %v254_v9  ;;  %v3622_v39 = vmul.f32 %v3508_v17, %v255_v48  ;;  %v341_v48 = vand.u32 2147483647, %v3502_v62 }
  0x4a   :  { %v2620_v8 = vpop.eup %2619  ;;  %v149_v57 = vmul.f32 %v2618_v28, %v147_v55  ;;  %v192_v27 = vmul.f32 %v2618_v28, %v190_v24  ;;  %v238_v42 = vmul.f32 %v2618_v28, %v236_v2  ;;  %v291_v54 = vmul.f32 %v2618_v28, %v289_v56 }
  0x4b   :  { %v150_v35 = vmul.f32 %v2620_v8, %v148_v10  ;;  %v193_v40 = vmul.f32 %v2620_v8, %v191_v34  ;;  %v239_v47 = vmul.f32 %v2620_v8, %v237_v5  ;;  %v292_v4 = vmul.f32 %v2620_v8, %v290_v50 }
  0x4c   :  { %v3625_v6 = vmul.f32 %v3039_v12, %v149_v57  ;;  %v335_v3 = vadd.f32 1e-30, %v333_v59  ;;  %v336_v51 = vadd.f32 1e-30, %v334_v0 }
  0x4d   :  { %v3628_v23 = vmul.f32 %v3041_v13, %v150_v35 }
  0x4e   :  { %v295_v46 = vmul.f32 %v3625_v6, %v3044_v14  ;;  %v301_v55 = vmul.f32 %v3625_v6, %v3047_v15  ;;  %v311_v24 = vmul.f32 %v3625_v6, %v5287_v52  ;;  %2621 = vrsqrt.f32 %v335_v3 }
  0x4f   :  { %v296_v2 = vmul.f32 %v3628_v23, %v3060_v20  ;;  %v302_v12 = vmul.f32 %v3628_v23, %v5286_v31  ;;  %v312_v13 = vmul.f32 %v3628_v23, %v5288_v7  ;;  %2623 = vrsqrt.f32 %v336_v51 }
  0x50   :  { %v297_v10 = vsub.f32 %v192_v27, %v295_v46  ;;  %v303_v34 = vsub.f32 %v238_v42, %v301_v55  ;;  %v313_v14 = vsub.f32 %v291_v54, %v311_v24 }
  0x51   :  { %v298_v5 = vsub.f32 %v193_v40, %v296_v2  ;;  %v304_v37 = vsub.f32 %v239_v47, %v302_v12  ;;  %v314_v15 = vsub.f32 %v292_v4, %v312_v13 }
  0x52   :  { %v3643_v56 = vmul.f32 %v3316_v38, %v297_v10 }
  0x53   :  { %v3646_v52 = vmul.f32 %v3328_v43, %v298_v5 }
  0x54   :  { %v305_v20 = vmul.f32 %v3643_v56, %v3334_v61  ;;  %v315_v31 = vmul.f32 %v3643_v56, %v3340_v44  ;;  %v342_v61 = vand.u32 2147483647, %v3506_v41 }
  0x55   :  { %v306_v7 = vmul.f32 %v3646_v52, %v3350_v63  ;;  %v316_v50 = vmul.f32 %v3646_v52, %v3356_v29 }
  0x56   :  { %v307_v22 = vsub.f32 %v303_v34, %v305_v20  ;;  %v317_v19 = vsub.f32 %v313_v14, %v315_v31 }
  0x57   :  { %v308_v9 = vsub.f32 %v304_v37, %v306_v7  ;;  %v318_v38 = vsub.f32 %v314_v15, %v316_v50 }
  0x58   :  { %v2622_v43 = vpop.eup %2621  ;;  %v3658_v57 = vmul.f32 %v3496_v21, %v307_v22 }
  0x59   :  { %v2624_v27 = vpop.eup %2623  ;;  %v3662_v44 = vmul.f32 %v3508_v17, %v308_v9  ;;  %v339_v63 = vmul.f32 %v2622_v43, %v333_v59 }
  0x5a   :  { %v319_v29 = vmul.f32 %v3658_v57, %v3512_v58  ;;  %v340_v42 = vmul.f32 %v2624_v27, %v334_v0  ;;  %v2993_v58 = vmov -1.0  }
  0x5b   :  { %v320_v54 = vmul.f32 %v3662_v44, %v3522_v18  ;;  %v343_v35 = vadd.f32 %v341_v48, %v339_v63  ;;  %v349_v18 = vsel %vm347_vm0, 1.0, %v2993_v58  ;;  %v350_v0 = vsel %vm348_vm1, 1.0, %v2993_v58 }
  0x5c   :  { %v321_v40 = vsub.f32 %v317_v19, %v319_v29  ;;  %v344_v47 = vadd.f32 %v342_v61, %v340_v42  ;;  %v359_v2 = vmul.f32 %v349_v18, %v3599_v36  ;;  %v360_v12 = vmul.f32 %v350_v0, %v3604_v26 }
  0x5d   :  { %v322_v4 = vsub.f32 %v318_v38, %v320_v54  ;;  %v345_v21 = vadd.f32 1e-30, %v343_v35 }
  0x5e   :  { %v3668_v3 = vmul.f32 %v2618_v28, %v321_v40  ;;  %v346_v51 = vadd.f32 1e-30, %v344_v47 }
  0x5f   :  { %v3670_v46 = vmul.f32 %v2620_v8, %v322_v4  ;;  %2625 = vrcp.f32 %v345_v21 }
  0x60   :  { %2627 = vrcp.f32 %v346_v51 }
  0x69   :  { %v2626_v17 = vpop.eup %2625 }
  0x6a   :  { %v2628_v59 = vpop.eup %2627  ;;  %v353_v55 = vmul.f32 %v2626_v17, %v345_v21 }
  0x6b   :  { %v354_v24 = vmul.f32 %v2628_v59, %v346_v51 }
  0x6c   :  { %v355_v28 = vsub.f32 2.0, %v353_v55 }
  0x6d   :  { %v356_v8 = vsub.f32 2.0, %v354_v24 }
  0x6e   :  { %v357_v13 = vmul.f32 %v2626_v17, %v355_v28 }
  0x6f   :  { %v358_v10 = vmul.f32 %v2628_v59, %v356_v8 }
  0x70   :  { %v361_v62 = vmul.f32 %v359_v2, %v357_v13 }
  0x71   :  { %v362_v34 = vmul.f32 %v360_v12, %v358_v10 }
  0x72   :  { %v363_v41 = vmul.f32 %v361_v62, %v361_v62  ;;  %v371_v14 = vmul.f32 %v361_v62, %v3447_v60 }
  0x73   :  { %v364_v5 = vmul.f32 %v362_v34, %v362_v34  ;;  %v372_v37 = vmul.f32 %v362_v34, %v3450_v30 }
  0x74   :  { %v365_v15 = vadd.f32 1.0, %v363_v41  ;;  %v3681_v20 = vsub.f32 %v5289_v45, %v371_v14  ;;  %v3684_v31 = vadd.f32 %v371_v14, %v3481_v16 }
  0x75   :  { %v366_v36 = vadd.f32 1.0, %v364_v5  ;;  %v3687_v26 = vsub.f32 %v5290_v1, %v372_v37  ;;  %v3690_v7 = vadd.f32 %v372_v37, %v3484_v32 }
  0x76   :  { %2629 = vrsqrt.f32 %v365_v15  ;;  %v401_v60 = vsub.f32 %v3619_v33, %v3681_v20 }
  0x77   :  { %2631 = vrsqrt.f32 %v366_v36  ;;  %v402_v30 = vsub.f32 %v3622_v39, %v3687_v26 }
  0x78   :  { %vm423_vm2 = vcmp.ge.f32.partialorder %v401_v60, 0.0  ;;  %v405_v18 = vmul.f32 %v401_v60, %v401_v60 }
  0x79   :  { %vm424_vm3 = vcmp.ge.f32.partialorder %v402_v30, 0.0  ;;  %v425_v16 = vsel %vm423_vm2, 1.0, %v2993_v58  ;;  %v406_v55 = vmul.f32 %v402_v30, %v402_v30 }
  0x80   :  { %v2630_v45 = vpop.eup %2629 }
  0x81   :  { %v2632_v50 = vpop.eup %2631  ;;  %v369_v22 = vmul.f32 %v2630_v45, %v361_v62  ;;  %v377_v1 = vmul.f32 %v2630_v45, %v3572_v11  ;;  %v385_v32 = vmul.f32 %v2630_v45, %v3593_v25  ;;  %v389_v19 = vmul.f32 %v2630_v45, %v3625_v6 }
  0x82   :  { %v370_v9 = vmul.f32 %v2632_v50, %v362_v34  ;;  %v378_v38 = vmul.f32 %v2632_v50, %v3575_v49  ;;  %v386_v48 = vmul.f32 %v2632_v50, %v3596_v53  ;;  %v390_v43 = vmul.f32 %v2632_v50, %v3628_v23 }
  0x83   :  { %v379_v61 = vmul.f32 %v369_v22, %v3593_v25  ;;  %v383_v27 = vmul.f32 %v369_v22, %v3572_v11  ;;  %v391_v63 = vmul.f32 %v369_v22, %v3643_v56  ;;  %v395_v29 = vmul.f32 %v369_v22, %v3625_v6 }
  0x84   :  { %v380_v42 = vmul.f32 %v370_v9, %v3596_v53  ;;  %v384_v54 = vmul.f32 %v370_v9, %v3575_v49  ;;  %v392_v35 = vmul.f32 %v370_v9, %v3646_v52  ;;  %v396_v40 = vmul.f32 %v370_v9, %v3628_v23 }
  0x85   :  { %v381_v47 = vsub.f32 %v377_v1, %v379_v61  ;;  %v3711_v4 = vadd.f32 %v385_v32, %v383_v27  ;;  %v3713_v21 = vsub.f32 %v389_v19, %v391_v63  ;;  %v397_v25 = vmul.f32 %v2630_v45, %v3643_v56 }
  0x86   :  { %v382_v11 = vsub.f32 %v378_v38, %v380_v42  ;;  %v3716_v51 = vadd.f32 %v386_v48, %v384_v54  ;;  %v3718_v17 = vsub.f32 %v390_v43, %v392_v35  ;;  %v398_v53 = vmul.f32 %v2632_v50, %v3646_v52 }
  0x87   :  { %v3721_v6 = vadd.f32 %v397_v25, %v395_v29  ;;  %v403_v49 = vmul.f32 2.0, %v381_v47  ;;  %v426_v23 = vsel %vm424_vm3, 1.0, %v2993_v58  ;;  %v417_v52 = vand.u32 2147483647, %v401_v60 }
  0x88   :  { %v3725_v59 = vadd.f32 %v398_v53, %v396_v40  ;;  %v404_v0 = vmul.f32 2.0, %v382_v11  ;;  %v418_v34 = vand.u32 2147483647, %v402_v30 }
  0x89   :  { %v407_v24 = vmul.f32 %v403_v49, %v403_v49  ;;  %v435_v56 = vmul.f32 %v425_v16, %v403_v49 }
  0x8a   :  { %v408_v28 = vmul.f32 %v404_v0, %v404_v0  ;;  %v436_v2 = vmul.f32 %v426_v23, %v404_v0 }
  0x8b   :  { %v409_v8 = vadd.f32 %v407_v24, %v405_v18 }
  0x8c   :  { %v410_v12 = vadd.f32 %v408_v28, %v406_v55 }
  0x8d   :  { %v411_v13 = vadd.f32 1e-30, %v409_v8 }
  0x8e   :  { %v412_v10 = vadd.f32 1e-30, %v410_v12 }
  0x8f   :  { %2633 = vrsqrt.f32 %v411_v13 }
  0x90   :  { %2635 = vrsqrt.f32 %v412_v10 }
  0x99   :  { %v2634_v62 = vpop.eup %2633 }
  0x9a   :  { %v2636_v41 = vpop.eup %2635  ;;  %v415_v14 = vmul.f32 %v2634_v62, %v409_v8 }
  0x9b   :  { %v416_v5 = vmul.f32 %v2636_v41, %v410_v12 }
  0x9c   :  { %v419_v37 = vadd.f32 %v417_v52, %v415_v14 }
  0x9d   :  { %v420_v15 = vadd.f32 %v418_v34, %v416_v5 }
  0x9e   :  { %v421_v36 = vadd.f32 1e-30, %v419_v37 }
  0x9f   :  { %v422_v45 = vadd.f32 1e-30, %v420_v15 }
  0xa0   :  { %2637 = vrcp.f32 %v421_v36 }
  0xa1   :  { %2639 = vrcp.f32 %v422_v45 }
  0xaa   :  { %v2638_v16 = vpop.eup %2637 }
  0xab   :  { %v2640_v50 = vpop.eup %2639  ;;  %v429_v22 = vmul.f32 %v2638_v16, %v421_v36 }
  0xac   :  { %v430_v1 = vmul.f32 %v2640_v50, %v422_v45 }
  0xad   :  { %v431_v32 = vsub.f32 2.0, %v429_v22 }
  0xae   :  { %v432_v19 = vsub.f32 2.0, %v430_v1 }
  0xaf   :  { %v433_v9 = vmul.f32 %v2638_v16, %v431_v32 }
  0xb0   :  { %v434_v38 = vmul.f32 %v2640_v50, %v432_v19 }
  0xb1   :  { %v437_v60 = vmul.f32 %v435_v56, %v433_v9 }
  0xb2   :  { %v438_v48 = vmul.f32 %v436_v2, %v434_v38 }
  0xb3   :  { %v439_v30 = vmul.f32 %v437_v60, %v437_v60  ;;  %v447_v43 = vmul.f32 %v437_v60, %v381_v47 }
  0xb4   :  { %v440_v61 = vmul.f32 %v438_v48, %v438_v48  ;;  %v448_v27 = vmul.f32 %v438_v48, %v382_v11 }
  0xb5   :  { %v441_v63 = vadd.f32 1.0, %v439_v30  ;;  %v3728_v29 = vsub.f32 %v3681_v20, %v447_v43  ;;  %v3731_v42 = vadd.f32 %v447_v43, %v3619_v33 }
  0xb6   :  { %v442_v54 = vadd.f32 1.0, %v440_v61  ;;  %v3734_v35 = vsub.f32 %v3687_v26, %v448_v27  ;;  %v3737_v40 = vadd.f32 %v448_v27, %v3622_v39 }
  0xb7   :  { %2641 = vrsqrt.f32 %v441_v63  ;;  %v3741_v47 = vsub.f32 %v3668_v3, %v3728_v29  ;;  %v3749_v33 = vsub.f32 %v3731_v42, %v3684_v31 }
  0xb8   :  { %2643 = vrsqrt.f32 %v442_v54  ;;  %v3745_v20 = vsub.f32 %v3670_v46, %v3734_v35  ;;  %v3756_v39 = vsub.f32 %v3737_v40, %v3690_v7 }
  0xb9   :  { %vm499_vm4 = vcmp.ge.f32.partialorder %v3741_v47, 0.0  ;;  %vm575_vm6 = vcmp.ge.f32.partialorder %v3749_v33, 0.0  ;;  %v481_v26 = vmul.f32 %v3741_v47, %v3741_v47  ;;  %v557_v11 = vmul.f32 %v3749_v33, %v3749_v33 }
  0xba   :  { %vm500_vm5 = vcmp.ge.f32.partialorder %v3745_v20, 0.0  ;;  %v482_v25 = vmul.f32 %v3745_v20, %v3745_v20  ;;  %v501_v49 = vsel %vm499_vm4, 1.0, %v2993_v58  ;;  %vm576_vm7 = vcmp.ge.f32.partialorder %v3756_v39, 0.0 }
  0xbb   :  { %v502_v18 = vsel %vm500_vm5, 1.0, %v2993_v58  ;;  %v577_v23 = vsel %vm575_vm6, 1.0, %v2993_v58  ;;  %v578_v32 = vsel %vm576_vm7, 1.0, %v2993_v58  ;;  %v558_v38 = vmul.f32 %v3756_v39, %v3756_v39 }
  0xc1   :  { %v2642_v53 = vpop.eup %2641 }
  0xc2   :  { %v2644_v0 = vpop.eup %2643  ;;  %v445_v55 = vmul.f32 %v2642_v53, %v437_v60  ;;  %v453_v24 = vmul.f32 0.0, %v2642_v53  ;;  %v461_v56 = vmul.f32 %v2642_v53, %v3711_v4  ;;  %v465_v28 = vmul.f32 %v2642_v53, %v3713_v21 }
  0xc3   :  { %v446_v2 = vmul.f32 %v2644_v0, %v438_v48  ;;  %v454_v8 = vmul.f32 0.0, %v2644_v0  ;;  %v462_v12 = vmul.f32 %v2644_v0, %v3716_v51  ;;  %v466_v13 = vmul.f32 %v2644_v0, %v3718_v17 }
  0xc4   :  { %v455_v10 = vmul.f32 %v445_v55, %v3711_v4  ;;  %v459_v52 = vmul.f32 0.0, %v445_v55  ;;  %v467_v62 = vmul.f32 %v445_v55, %v3658_v57  ;;  %v471_v34 = vmul.f32 %v445_v55, %v3713_v21 }
  0xc5   :  { %v456_v41 = vmul.f32 %v446_v2, %v3716_v51  ;;  %v460_v14 = vmul.f32 0.0, %v446_v2  ;;  %v468_v5 = vmul.f32 %v446_v2, %v3662_v44  ;;  %v472_v37 = vmul.f32 %v446_v2, %v3718_v17 }
  0xc6   :  { %v3778_v15 = vsub.f32 %v453_v24, %v455_v10  ;;  %v3780_v36 = vadd.f32 %v461_v56, %v459_v52  ;;  %v3782_v45 = vsub.f32 %v465_v28, %v467_v62  ;;  %v473_v4 = vmul.f32 %v2642_v53, %v3658_v57 }
  0xc7   :  { %v3785_v16 = vsub.f32 %v454_v8, %v456_v41  ;;  %v3787_v50 = vadd.f32 %v462_v12, %v460_v14  ;;  %v3789_v21 = vsub.f32 %v466_v13, %v468_v5  ;;  %v474_v51 = vmul.f32 %v2644_v0, %v3662_v44 }
  0xc8   :  { %v3792_v22 = vadd.f32 %v473_v4, %v471_v34  ;;  %v479_v17 = vmul.f32 2.0, %v3782_v45  ;;  %v555_v1 = vmul.f32 2.0, %v3780_v36  ;;  %v570_v13 = vand.u32 2147483647, %v3756_v39 }
  0xc9   :  { %v3799_v19 = vadd.f32 %v474_v51, %v472_v37  ;;  %v480_v57 = vmul.f32 2.0, %v3789_v21  ;;  %v556_v9 = vmul.f32 2.0, %v3787_v50 }
  0xca   :  { %v483_v44 = vmul.f32 %v479_v17, %v479_v17  ;;  %v511_v60 = vmul.f32 %v501_v49, %v479_v17  ;;  %v559_v48 = vmul.f32 %v555_v1, %v555_v1  ;;  %v587_v30 = vmul.f32 %v577_v23, %v555_v1 }
  0xcb   :  { %v484_v43 = vmul.f32 %v480_v57, %v480_v57  ;;  %v512_v61 = vmul.f32 %v502_v18, %v480_v57  ;;  %v560_v27 = vmul.f32 %v556_v9, %v556_v9  ;;  %v588_v63 = vmul.f32 %v578_v32, %v556_v9 }
  0xcc   :  { %v485_v54 = vadd.f32 %v483_v44, %v481_v26  ;;  %v561_v53 = vadd.f32 %v559_v48, %v557_v11  ;;  %v493_v49 = vand.u32 2147483647, %v3741_v47  ;;  %v494_v23 = vand.u32 2147483647, %v3745_v20 }
  0xcd   :  { %v486_v0 = vadd.f32 %v484_v43, %v482_v25  ;;  %v562_v55 = vadd.f32 %v560_v27, %v558_v38  ;;  %v569_v26 = vand.u32 2147483647, %v3749_v33 }
  0xce   :  { %v487_v24 = vadd.f32 1e-30, %v485_v54  ;;  %v563_v56 = vadd.f32 1e-30, %v561_v53 }
  0xcf   :  { %v488_v28 = vadd.f32 1e-30, %v486_v0  ;;  %v564_v2 = vadd.f32 1e-30, %v562_v55 }
  0xd0   :  { %2645 = vrsqrt.f32 %v487_v24 }
  0xd1   :  { %2647 = vrsqrt.f32 %v488_v28 }
  0xd2   :  { %2649 = vrsqrt.f32 %v563_v56 }
  0xd3   :  { %2651 = vrsqrt.f32 %v564_v2 }
  0xda   :  { %v2646_v8 = vpop.eup %2645 }
  0xdb   :  { %v2648_v18 = vpop.eup %2647  ;;  %v491_v12 = vmul.f32 %v2646_v8, %v485_v54 }
  0xdc   :  { %v2650_v11 = vpop.eup %2649  ;;  %v492_v25 = vmul.f32 %v2648_v18, %v486_v0 }
  0xdd   :  { %v2652_v10 = vpop.eup %2651  ;;  %v495_v52 = vadd.f32 %v493_v49, %v491_v12  ;;  %v567_v62 = vmul.f32 %v2650_v11, %v561_v53 }
  0xde   :  { %v496_v34 = vadd.f32 %v494_v23, %v492_v25  ;;  %v568_v41 = vmul.f32 %v2652_v10, %v562_v55 }
  0xdf   :  { %v497_v14 = vadd.f32 1e-30, %v495_v52  ;;  %v571_v5 = vadd.f32 %v569_v26, %v567_v62 }
  0xe0   :  { %v498_v37 = vadd.f32 1e-30, %v496_v34  ;;  %v572_v47 = vadd.f32 %v570_v13, %v568_v41 }
  0xe1   :  { %2653 = vrcp.f32 %v497_v14  ;;  %v573_v4 = vadd.f32 1e-30, %v571_v5 }
  0xe2   :  { %2655 = vrcp.f32 %v498_v37  ;;  %v574_v20 = vadd.f32 1e-30, %v572_v47 }
  0xe3   :  { %2657 = vrcp.f32 %v573_v4 }
  0xe4   :  { %2659 = vrcp.f32 %v574_v20 }
  0xeb   :  { %v2654_v33 = vpop.eup %2653 }
  0xec   :  { %v2656_v51 = vpop.eup %2655  ;;  %v505_v17 = vmul.f32 %v2654_v33, %v497_v14 }
  0xed   :  { %v2658_v1 = vpop.eup %2657  ;;  %v506_v39 = vmul.f32 %v2656_v51, %v498_v37 }
  0xee   :  { %v2660_v32 = vpop.eup %2659  ;;  %v507_v57 = vsub.f32 2.0, %v505_v17  ;;  %v581_v9 = vmul.f32 %v2658_v1, %v573_v4 }
  0xef   :  { %v508_v38 = vsub.f32 2.0, %v506_v39  ;;  %v582_v44 = vmul.f32 %v2660_v32, %v574_v20 }
  0xf0   :  { %v509_v48 = vmul.f32 %v2654_v33, %v507_v57  ;;  %v583_v43 = vsub.f32 2.0, %v581_v9 }
  0xf1   :  { %v510_v27 = vmul.f32 %v2656_v51, %v508_v38  ;;  %v584_v54 = vsub.f32 2.0, %v582_v44 }
  0xf2   :  { %v513_v53 = vmul.f32 %v511_v60, %v509_v48  ;;  %v585_v0 = vmul.f32 %v2658_v1, %v583_v43 }
  0xf3   :  { %v514_v55 = vmul.f32 %v512_v61, %v510_v27  ;;  %v586_v24 = vmul.f32 %v2660_v32, %v584_v54 }
  0xf4   :  { %v515_v56 = vmul.f32 %v513_v53, %v513_v53  ;;  %v523_v28 = vmul.f32 %v513_v53, %v3782_v45  ;;  %v589_v2 = vmul.f32 %v587_v30, %v585_v0 }
  0xf5   :  { %v516_v49 = vmul.f32 %v514_v55, %v514_v55  ;;  %v524_v8 = vmul.f32 %v514_v55, %v3789_v21  ;;  %v590_v23 = vmul.f32 %v588_v63, %v586_v24 }
  0xf6   :  { %v517_v18 = vadd.f32 1.0, %v515_v56  ;;  %v3812_v12 = vsub.f32 %v3728_v29, %v523_v28  ;;  %v3815_v26 = vadd.f32 %v523_v28, %v3668_v3  ;;  %v591_v11 = vmul.f32 %v589_v2, %v589_v2 }
  0xf7   :  { %v518_v60 = vadd.f32 1.0, %v516_v49  ;;  %v3818_v61 = vsub.f32 %v3734_v35, %v524_v8  ;;  %v3821_v25 = vadd.f32 %v524_v8, %v3670_v46  ;;  %v592_v45 = vmul.f32 %v590_v23, %v590_v23 }
  0xf8   :  { %2661 = vrsqrt.f32 %v517_v18  ;;  %v593_v30 = vadd.f32 1.0, %v591_v11  ;;  %v3824_v21 = vmul.f32 %v589_v2, %v3780_v36  ;;  %v3827_v29 = vmul.f32 %v590_v23, %v3787_v50 }
  0xf9   :  { %2663 = vrsqrt.f32 %v518_v60  ;;  %v594_v3 = vadd.f32 1.0, %v592_v45 }
  0xfa   :  { %v3831_v63 = vsub.f32 %v3684_v31, %v3824_v21  ;;  %v3835_v35 = vsub.f32 %v3690_v7, %v3827_v29  ;;  %2665 = vrsqrt.f32 %v593_v30 }
  0xfb   :  { %2667 = vrsqrt.f32 %v594_v3 }
  0xfc   :  { %v3839_v36 = vsub.f32 %v3815_v26, %v3831_v63  ;;  %v3843_v50 = vsub.f32 %v3821_v25, %v3835_v35 }
  0xfe   :  { %vm651_vm8 = vcmp.ge.f32.partialorder %v3839_v36, 0.0  ;;  %vm652_vm9 = vcmp.ge.f32.partialorder %v3843_v50, 0.0 }
 0x102   :  { %v2662_v46 = vpop.eup %2661 }
 0x103   :  { %v2664_v13 = vpop.eup %2663  ;;  %v521_v10 = vmul.f32 %v2662_v46, %v513_v53  ;;  %v529_v31 = vmul.f32 %v2662_v46, %v3778_v15  ;;  %v537_v52 = vmul.f32 %v2662_v46, %v3721_v6  ;;  %v541_v62 = vmul.f32 0.0, %v2662_v46 }
 0x104   :  { %v522_v7 = vmul.f32 %v2664_v13, %v514_v55  ;;  %v530_v34 = vmul.f32 %v2664_v13, %v3785_v16  ;;  %v538_v41 = vmul.f32 %v2664_v13, %v3725_v59  ;;  %v542_v14 = vmul.f32 0.0, %v2664_v13  ;;  %v2666_v5 = vpop.eup %2665 }
 0x105   :  { %v531_v37 = vmul.f32 %v521_v10, %v3721_v6  ;;  %v535_v47 = vmul.f32 %v521_v10, %v3778_v15  ;;  %v543_v4 = vmul.f32 %v521_v10, %v3792_v22  ;;  %v547_v20 = vmul.f32 0.0, %v521_v10  ;;  %v2668_v33 = vpop.eup %2667 }
 0x106   :  { %v532_v51 = vmul.f32 %v522_v7, %v3725_v59  ;;  %v536_v17 = vmul.f32 %v522_v7, %v3785_v16  ;;  %v544_v1 = vmul.f32 %v522_v7, %v3799_v19  ;;  %v548_v39 = vmul.f32 0.0, %v522_v7 }
 0x107   :  { %v533_v32 = vsub.f32 %v529_v31, %v531_v37  ;;  %v539_v57 = vadd.f32 %v537_v52, %v535_v47  ;;  %v545_v9 = vsub.f32 %v541_v62, %v543_v4  ;;  %v549_v38 = vmul.f32 %v2662_v46, %v3792_v22 }
 0x108   :  { %v534_v44 = vsub.f32 %v530_v34, %v532_v51  ;;  %v540_v6 = vadd.f32 %v538_v41, %v536_v17  ;;  %v546_v48 = vsub.f32 %v542_v14, %v544_v1  ;;  %v550_v15 = vmul.f32 %v2664_v13, %v3799_v19 }
 0x109   :  { %v551_v43 = vadd.f32 %v549_v38, %v547_v20  ;;  %v597_v27 = vmul.f32 %v2666_v5, %v589_v2  ;;  %v598_v54 = vmul.f32 %v2668_v33, %v590_v23  ;;  %v605_v53 = vmul.f32 %v2666_v5, %v533_v32 }
 0x10a   :  { %v552_v59 = vadd.f32 %v550_v15, %v548_v39  ;;  %v606_v0 = vmul.f32 %v2668_v33, %v534_v44  ;;  %v613_v16 = vmul.f32 %v2666_v5, %v545_v9  ;;  %v614_v55 = vmul.f32 %v2668_v33, %v546_v48 }
 0x10b   :  { %v607_v24 = vmul.f32 %v597_v27, %v545_v9  ;;  %v608_v56 = vmul.f32 %v598_v54, %v546_v48  ;;  %v611_v28 = vmul.f32 %v597_v27, %v533_v32  ;;  %v612_v49 = vmul.f32 %v598_v54, %v534_v44 }
 0x10c   :  { %v617_v8 = vmul.f32 %v2666_v5, %v539_v57  ;;  %v618_v18 = vmul.f32 %v2668_v33, %v540_v6  ;;  %v619_v22 = vmul.f32 %v597_v27, %v551_v43  ;;  %v620_v11 = vmul.f32 %v598_v54, %v552_v59 }
 0x10d   :  { %v3859_v60 = vsub.f32 %v605_v53, %v607_v24  ;;  %v3861_v45 = vsub.f32 %v606_v0, %v608_v56  ;;  %v3863_v19 = vadd.f32 %v613_v16, %v611_v28  ;;  %v3865_v2 = vadd.f32 %v614_v55, %v612_v49 }
 0x10e   :  { %v621_v23 = vsub.f32 %v617_v8, %v619_v22  ;;  %v622_v30 = vsub.f32 %v618_v18, %v620_v11  ;;  %v623_v3 = vmul.f32 %v597_v27, %v539_v57  ;;  %v624_v46 = vmul.f32 %v598_v54, %v540_v6 }
 0x10f   :  { %v625_v13 = vmul.f32 %v2666_v5, %v551_v43  ;;  %v626_v10 = vmul.f32 %v2668_v33, %v552_v59  ;;  %v653_v31 = vsel %vm651_vm8, 1.0, %v2993_v58  ;;  %v654_v52 = vsel %vm652_vm9, 1.0, %v2993_v58 }
 0x110   :  { %v631_v62 = vmul.f32 2.0, %v621_v23  ;;  %v632_v7 = vmul.f32 2.0, %v622_v30  ;;  %v633_v34 = vmul.f32 %v3839_v36, %v3839_v36  ;;  %v634_v41 = vmul.f32 %v3843_v50, %v3843_v50 }
 0x111   :  { %v3877_v14 = vadd.f32 %v625_v13, %v623_v3  ;;  %v3879_v5 = vadd.f32 %v626_v10, %v624_v46  ;;  %v645_v39 = vand.u32 2147483647, %v3839_v36  ;;  %v646_v57 = vand.u32 2147483647, %v3843_v50 }
 0x112   :  { %v635_v37 = vmul.f32 %v631_v62, %v631_v62  ;;  %v636_v47 = vmul.f32 %v632_v7, %v632_v7  ;;  %v663_v4 = vmul.f32 %v653_v31, %v631_v62  ;;  %v664_v20 = vmul.f32 %v654_v52, %v632_v7 }
 0x113   :  { %v3885_v50 = vadd.f32 %v3824_v21, %v3731_v42  ;;  %v3889_v8 = vadd.f32 %v3827_v29, %v3737_v40 }
 0x114   :  { %v637_v33 = vadd.f32 %v635_v37, %v633_v34  ;;  %v638_v51 = vadd.f32 %v636_v47, %v634_v41 }
 0x116   :  { %v639_v17 = vadd.f32 1e-30, %v637_v33  ;;  %v640_v1 = vadd.f32 1e-30, %v638_v51 }
 0x118   :  { %2669 = vrsqrt.f32 %v639_v17 }
 0x119   :  { %2671 = vrsqrt.f32 %v640_v1 }
 0x122   :  { %v2670_v32 = vpop.eup %2669 }
 0x123   :  { %v2672_v9 = vpop.eup %2671  ;;  %v643_v38 = vmul.f32 %v2670_v32, %v637_v33 }
 0x124   :  { %v644_v44 = vmul.f32 %v2672_v9, %v638_v51 }
 0x125   :  { %v647_v6 = vadd.f32 %v645_v39, %v643_v38 }
 0x126   :  { %v648_v48 = vadd.f32 %v646_v57, %v644_v44 }
 0x127   :  { %v649_v15 = vadd.f32 1e-30, %v647_v6 }
 0x128   :  { %v650_v43 = vadd.f32 1e-30, %v648_v48 }
 0x129   :  { %2673 = vrcp.f32 %v649_v15 }
 0x12a   :  { %2675 = vrcp.f32 %v650_v43 }
 0x133   :  { %v2674_v27 = vpop.eup %2673 }
 0x134   :  { %v2676_v54 = vpop.eup %2675  ;;  %v657_v53 = vmul.f32 %v2674_v27, %v649_v15 }
 0x135   :  { %v658_v59 = vmul.f32 %v2676_v54, %v650_v43 }
 0x136   :  { %v659_v0 = vsub.f32 2.0, %v657_v53 }
 0x137   :  { %v660_v16 = vsub.f32 2.0, %v658_v59 }
 0x138   :  { %v661_v55 = vmul.f32 %v2674_v27, %v659_v0 }
 0x139   :  { %v662_v36 = vmul.f32 %v2676_v54, %v660_v16 }
 0x13a   :  { %v665_v24 = vmul.f32 %v663_v4, %v661_v55 }
 0x13b   :  { %v666_v56 = vmul.f32 %v664_v20, %v662_v36 }
 0x13c   :  { %v667_v28 = vmul.f32 %v665_v24, %v665_v24  ;;  %v675_v49 = vmul.f32 %v665_v24, %v621_v23 }
 0x13d   :  { %v668_v18 = vmul.f32 %v666_v56, %v666_v56  ;;  %v676_v22 = vmul.f32 %v666_v56, %v622_v30 }
 0x13e   :  { %v669_v11 = vadd.f32 1.0, %v667_v28  ;;  %v3892_v3 = vadd.f32 %v675_v49, %v3815_v26  ;;  %v3906_v21 = vsub.f32 %v3831_v63, %v675_v49 }
 0x13f   :  { %v670_v46 = vadd.f32 1.0, %v668_v18  ;;  %v3895_v13 = vadd.f32 %v676_v22, %v3821_v25  ;;  %v3909_v26 = vsub.f32 %v3835_v35, %v676_v22 }
 0x140   :  { %2677 = vrsqrt.f32 %v669_v11  ;;  %v3899_v42 = vsub.f32 %v3892_v3, %v3885_v50  ;;  %v3913_v25 = vsub.f32 %v3906_v21, %v3812_v12 }
 0x141   :  { %2679 = vrsqrt.f32 %v670_v46  ;;  %v3903_v40 = vsub.f32 %v3895_v13, %v3889_v8  ;;  %v3920_v23 = vsub.f32 %v3909_v26, %v3818_v61 }
 0x142   :  { %vm723_vm10 = vcmp.ge.f32.partialorder %v3899_v42, 0.0  ;;  %v705_v29 = vmul.f32 %v3899_v42, %v3899_v42  ;;  %v781_v35 = vmul.f32 %v3913_v25, %v3913_v25  ;;  %vm799_vm12 = vcmp.ge.f32.partialorder %v3913_v25, 0.0 }
 0x143   :  { %vm724_vm11 = vcmp.ge.f32.partialorder %v3903_v40, 0.0  ;;  %v725_v63 = vsel %vm723_vm10, 1.0, %v2993_v58  ;;  %vm800_vm13 = vcmp.ge.f32.partialorder %v3920_v23, 0.0  ;;  %v801_v39 = vsel %vm799_vm12, 1.0, %v2993_v58 }
 0x144   :  { %v726_v6 = vsel %vm724_vm11, 1.0, %v2993_v58  ;;  %v802_v15 = vsel %vm800_vm13, 1.0, %v2993_v58  ;;  %v706_v27 = vmul.f32 %v3903_v40, %v3903_v40  ;;  %v782_v53 = vmul.f32 %v3920_v23, %v3920_v23 }
 0x14a   :  { %v2678_v30 = vpop.eup %2677 }
 0x14b   :  { %v2680_v10 = vpop.eup %2679  ;;  %v673_v31 = vmul.f32 %v2678_v30, %v665_v24  ;;  %v681_v52 = vmul.f32 %v2678_v30, %v3859_v60  ;;  %v689_v62 = vmul.f32 0.0, %v2678_v30  ;;  %v697_v7 = vmul.f32 %v2678_v30, %v3877_v14 }
 0x14c   :  { %v674_v34 = vmul.f32 %v2680_v10, %v666_v56  ;;  %v682_v41 = vmul.f32 %v2680_v10, %v3861_v45  ;;  %v690_v37 = vmul.f32 0.0, %v2680_v10  ;;  %v698_v47 = vmul.f32 %v2680_v10, %v3879_v5 }
 0x14d   :  { %v683_v4 = vmul.f32 0.0, %v673_v31  ;;  %v687_v20 = vmul.f32 %v673_v31, %v3859_v60  ;;  %v693_v33 = vmul.f32 %v673_v31, %v3877_v14 }
 0x14e   :  { %v684_v51 = vmul.f32 0.0, %v674_v34  ;;  %v688_v17 = vmul.f32 %v674_v34, %v3861_v45  ;;  %v694_v1 = vmul.f32 %v674_v34, %v3879_v5 }
 0x14f   :  { %v3939_v32 = vsub.f32 %v681_v52, %v683_v4  ;;  %v3941_v57 = vadd.f32 %v689_v62, %v687_v20  ;;  %v3943_v9 = vsub.f32 %v689_v62, %v693_v33  ;;  %v3945_v60 = vadd.f32 %v697_v7, %v683_v4 }
 0x150   :  { %v3947_v14 = vsub.f32 %v682_v41, %v684_v51  ;;  %v3949_v38 = vadd.f32 %v690_v37, %v688_v17  ;;  %v3951_v44 = vsub.f32 %v690_v37, %v694_v1  ;;  %v3953_v45 = vadd.f32 %v698_v47, %v684_v51 }
 0x151   :  { %v703_v5 = vmul.f32 2.0, %v3945_v60  ;;  %v779_v48 = vmul.f32 2.0, %v3939_v32  ;;  %v718_v62 = vand.u32 2147483647, %v3903_v40  ;;  %v794_v37 = vand.u32 2147483647, %v3920_v23 }
 0x152   :  { %v704_v43 = vmul.f32 2.0, %v3953_v45  ;;  %v780_v54 = vmul.f32 2.0, %v3947_v14 }
 0x153   :  { %v707_v59 = vmul.f32 %v703_v5, %v703_v5  ;;  %v735_v0 = vmul.f32 %v725_v63, %v703_v5  ;;  %v783_v16 = vmul.f32 %v779_v48, %v779_v48  ;;  %v811_v55 = vmul.f32 %v801_v39, %v779_v48 }
 0x154   :  { %v708_v36 = vmul.f32 %v704_v43, %v704_v43  ;;  %v736_v24 = vmul.f32 %v726_v6, %v704_v43  ;;  %v784_v56 = vmul.f32 %v780_v54, %v780_v54  ;;  %v812_v28 = vmul.f32 %v802_v15, %v780_v54 }
 0x155   :  { %v709_v49 = vadd.f32 %v707_v59, %v705_v29  ;;  %v785_v18 = vadd.f32 %v783_v16, %v781_v35  ;;  %v717_v63 = vand.u32 2147483647, %v3899_v42  ;;  %v793_v29 = vand.u32 2147483647, %v3913_v25 }
 0x156   :  { %v710_v22 = vadd.f32 %v708_v36, %v706_v27  ;;  %v786_v11 = vadd.f32 %v784_v56, %v782_v53 }
 0x157   :  { %v711_v46 = vadd.f32 1e-30, %v709_v49  ;;  %v787_v30 = vadd.f32 1e-30, %v785_v18 }
 0x158   :  { %v712_v10 = vadd.f32 1e-30, %v710_v22  ;;  %v788_v31 = vadd.f32 1e-30, %v786_v11 }
 0x159   :  { %2681 = vrsqrt.f32 %v711_v46 }
 0x15a   :  { %2683 = vrsqrt.f32 %v712_v10 }
 0x15b   :  { %2685 = vrsqrt.f32 %v787_v30 }
 0x15c   :  { %2687 = vrsqrt.f32 %v788_v31 }
 0x163   :  { %v2682_v52 = vpop.eup %2681 }
 0x164   :  { %v2684_v7 = vpop.eup %2683  ;;  %v715_v34 = vmul.f32 %v2682_v52, %v709_v49 }
 0x165   :  { %v2686_v35 = vpop.eup %2685  ;;  %v716_v41 = vmul.f32 %v2684_v7, %v710_v22 }
 0x166   :  { %v2688_v47 = vpop.eup %2687  ;;  %v719_v4 = vadd.f32 %v717_v63, %v715_v34  ;;  %v791_v20 = vmul.f32 %v2686_v35, %v785_v18 }
 0x167   :  { %v720_v33 = vadd.f32 %v718_v62, %v716_v41  ;;  %v792_v51 = vmul.f32 %v2688_v47, %v786_v11 }
 0x168   :  { %v721_v17 = vadd.f32 1e-30, %v719_v4  ;;  %v795_v1 = vadd.f32 %v793_v29, %v791_v20 }
 0x169   :  { %v722_v39 = vadd.f32 1e-30, %v720_v33  ;;  %v796_v42 = vadd.f32 %v794_v37, %v792_v51 }
 0x16a   :  { %2689 = vrcp.f32 %v721_v17  ;;  %v797_v5 = vadd.f32 1e-30, %v795_v1 }
 0x16b   :  { %2691 = vrcp.f32 %v722_v39  ;;  %v798_v40 = vadd.f32 1e-30, %v796_v42 }
 0x16c   :  { %2693 = vrcp.f32 %v797_v5 }
 0x16d   :  { %2695 = vrcp.f32 %v798_v40 }
 0x174   :  { %v2690_v25 = vpop.eup %2689 }
 0x175   :  { %v2692_v6 = vpop.eup %2691  ;;  %v729_v48 = vmul.f32 %v2690_v25, %v721_v17 }
 0x176   :  { %v2694_v15 = vpop.eup %2693  ;;  %v730_v23 = vmul.f32 %v2692_v6, %v722_v39 }
 0x177   :  { %v2696_v43 = vpop.eup %2695  ;;  %v731_v27 = vsub.f32 2.0, %v729_v48  ;;  %v805_v54 = vmul.f32 %v2694_v15, %v797_v5 }
 0x178   :  { %v732_v53 = vsub.f32 2.0, %v730_v23  ;;  %v806_v59 = vmul.f32 %v2696_v43, %v798_v40 }
 0x179   :  { %v733_v16 = vmul.f32 %v2690_v25, %v731_v27  ;;  %v807_v36 = vsub.f32 2.0, %v805_v54 }
 0x17a   :  { %v734_v56 = vmul.f32 %v2692_v6, %v732_v53  ;;  %v808_v49 = vsub.f32 2.0, %v806_v59 }
 0x17b   :  { %v737_v18 = vmul.f32 %v735_v0, %v733_v16  ;;  %v809_v22 = vmul.f32 %v2694_v15, %v807_v36 }
 0x17c   :  { %v738_v11 = vmul.f32 %v736_v24, %v734_v56  ;;  %v810_v46 = vmul.f32 %v2696_v43, %v808_v49 }
 0x17d   :  { %v739_v30 = vmul.f32 %v737_v18, %v737_v18  ;;  %v747_v10 = vmul.f32 %v737_v18, %v3945_v60  ;;  %v813_v31 = vmul.f32 %v811_v55, %v809_v22 }
 0x17e   :  { %v740_v63 = vmul.f32 %v738_v11, %v738_v11  ;;  %v748_v52 = vmul.f32 %v738_v11, %v3953_v45  ;;  %v814_v62 = vmul.f32 %v812_v28, %v810_v46 }
 0x17f   :  { %v741_v7 = vadd.f32 1.0, %v739_v30  ;;  %v3976_v34 = vsub.f32 %v3885_v50, %v747_v10  ;;  %v3979_v29 = vadd.f32 %v747_v10, %v3892_v3  ;;  %v815_v35 = vmul.f32 %v813_v31, %v813_v31 }
 0x180   :  { %v742_v0 = vadd.f32 1.0, %v740_v63  ;;  %v3982_v24 = vsub.f32 %v3889_v8, %v748_v52  ;;  %v3985_v41 = vadd.f32 %v748_v52, %v3895_v13  ;;  %v816_v60 = vmul.f32 %v814_v62, %v814_v62 }
 0x181   :  { %2697 = vrsqrt.f32 %v741_v7  ;;  %v817_v55 = vadd.f32 1.0, %v815_v35  ;;  %v3988_v45 = vmul.f32 %v813_v31, %v3939_v32  ;;  %v3991_v50 = vmul.f32 %v814_v62, %v3947_v14 }
 0x182   :  { %2699 = vrsqrt.f32 %v742_v0  ;;  %v818_v3 = vadd.f32 1.0, %v816_v60 }
 0x183   :  { %v3995_v28 = vsub.f32 %v3812_v12, %v3988_v45  ;;  %v3999_v8 = vsub.f32 %v3818_v61, %v3991_v50  ;;  %2701 = vrsqrt.f32 %v817_v55 }
 0x184   :  { %2703 = vrsqrt.f32 %v818_v3 }
 0x185   :  { %v4003_v13 = vsub.f32 %v3976_v34, %v3995_v28  ;;  %v4007_v32 = vsub.f32 %v3982_v24, %v3999_v8 }
 0x187   :  { %vm875_vm14 = vcmp.ge.f32.partialorder %v4003_v13, 0.0  ;;  %vm876_vm15 = vcmp.ge.f32.partialorder %v4007_v32, 0.0  ;;  %v4013_v14 = vmul.f32 %v4003_v13, %v4003_v13  ;;  %v4017_v61 = vmul.f32 %v4007_v32, %v4007_v32 }
 0x188   :  { %v877_v37 = vsel %vm875_vm14, 1.0, %v2993_v58  ;;  %v878_v47 = vsel %vm876_vm15, 1.0, %v2993_v58 }
 0x18b   :  { %v2698_v12 = vpop.eup %2697 }
 0x18c   :  { %v2700_v4 = vpop.eup %2699  ;;  %v745_v20 = vmul.f32 %v2698_v12, %v737_v18  ;;  %v753_v33 = vmul.f32 %v2698_v12, %v3863_v19  ;;  %v761_v51 = vmul.f32 %v2698_v12, %v3941_v57  ;;  %v765_v17 = vmul.f32 %v2698_v12, %v3943_v9 }
 0x18d   :  { %v746_v1 = vmul.f32 %v2700_v4, %v738_v11  ;;  %v754_v39 = vmul.f32 %v2700_v4, %v3865_v2  ;;  %v762_v42 = vmul.f32 %v2700_v4, %v3949_v38  ;;  %v766_v5 = vmul.f32 %v2700_v4, %v3951_v44  ;;  %v2702_v40 = vpop.eup %2701 }
 0x18e   :  { %v755_v25 = vmul.f32 %v745_v20, %v3941_v57  ;;  %v759_v6 = vmul.f32 %v745_v20, %v3863_v19  ;;  %v767_v48 = vmul.f32 0.0, %v745_v20  ;;  %v771_v15 = vmul.f32 %v745_v20, %v3943_v9  ;;  %v2704_v23 = vpop.eup %2703 }
 0x18f   :  { %v756_v43 = vmul.f32 %v746_v1, %v3949_v38  ;;  %v760_v27 = vmul.f32 %v746_v1, %v3865_v2  ;;  %v768_v54 = vmul.f32 0.0, %v746_v1  ;;  %v772_v53 = vmul.f32 %v746_v1, %v3951_v44 }
 0x190   :  { %v757_v59 = vsub.f32 %v753_v33, %v755_v25  ;;  %v763_v16 = vadd.f32 %v761_v51, %v759_v6  ;;  %v769_v36 = vsub.f32 %v765_v17, %v767_v48  ;;  %v773_v56 = vmul.f32 0.0, %v2698_v12 }
 0x191   :  { %v758_v49 = vsub.f32 %v754_v39, %v756_v43  ;;  %v764_v18 = vadd.f32 %v762_v42, %v760_v27  ;;  %v770_v57 = vsub.f32 %v766_v5, %v768_v54  ;;  %v774_v22 = vmul.f32 0.0, %v2700_v4 }
 0x192   :  { %v775_v19 = vadd.f32 %v773_v56, %v771_v15  ;;  %v821_v11 = vmul.f32 %v2702_v40, %v813_v31  ;;  %v822_v46 = vmul.f32 %v2704_v23, %v814_v62  ;;  %v829_v9 = vmul.f32 %v2702_v40, %v757_v59 }
 0x193   :  { %v776_v30 = vadd.f32 %v774_v22, %v772_v53  ;;  %v830_v10 = vmul.f32 %v2704_v23, %v758_v49  ;;  %v837_v38 = vmul.f32 %v2702_v40, %v769_v36  ;;  %v838_v63 = vmul.f32 %v2704_v23, %v770_v57 }
 0x194   :  { %v831_v2 = vmul.f32 %v821_v11, %v769_v36  ;;  %v832_v52 = vmul.f32 %v822_v46, %v770_v57  ;;  %v835_v7 = vmul.f32 %v821_v11, %v757_v59  ;;  %v836_v44 = vmul.f32 %v822_v46, %v758_v49 }
 0x195   :  { %v841_v35 = vmul.f32 %v2702_v40, %v763_v16  ;;  %v842_v0 = vmul.f32 %v2704_v23, %v764_v18  ;;  %v843_v60 = vmul.f32 %v821_v11, %v775_v19  ;;  %v844_v55 = vmul.f32 %v822_v46, %v776_v30 }
 0x196   :  { %v833_v3 = vsub.f32 %v829_v9, %v831_v2  ;;  %v834_v12 = vsub.f32 %v830_v10, %v832_v52  ;;  %v4033_v20 = vadd.f32 %v837_v38, %v835_v7  ;;  %v4035_v4 = vadd.f32 %v838_v63, %v836_v44 }
 0x197   :  { %v4037_v31 = vsub.f32 %v841_v35, %v843_v60  ;;  %v4039_v62 = vsub.f32 %v842_v0, %v844_v55  ;;  %v847_v33 = vmul.f32 %v821_v11, %v763_v16  ;;  %v848_v51 = vmul.f32 %v822_v46, %v764_v18 }
 0x198   :  { %v849_v17 = vmul.f32 %v2702_v40, %v775_v19  ;;  %v850_v1 = vmul.f32 %v2704_v23, %v776_v30  ;;  %v855_v39 = vmul.f32 2.0, %v833_v3  ;;  %v856_v42 = vmul.f32 2.0, %v834_v12 }
 0x199   :  { %v869_v40 = vand.u32 2147483647, %v4003_v13  ;;  %v870_v16 = vand.u32 2147483647, %v4007_v32  ;;  %v4065_v55 = vadd.f32 %v3988_v45, %v3906_v21 }
 0x19a   :  { %v4041_v5 = vadd.f32 %v849_v17, %v847_v33  ;;  %v4043_v25 = vadd.f32 %v850_v1, %v848_v51  ;;  %v859_v6 = vmul.f32 %v855_v39, %v855_v39  ;;  %v860_v48 = vmul.f32 %v856_v42, %v856_v42 }
 0x19b   :  { %v887_v15 = vmul.f32 %v877_v37, %v855_v39  ;;  %v888_v43 = vmul.f32 %v878_v47, %v856_v42 }
 0x19c   :  { %v861_v27 = vadd.f32 %v859_v6, %v4013_v14  ;;  %v862_v54 = vadd.f32 %v860_v48, %v4017_v61 }
 0x19e   :  { %v863_v53 = vadd.f32 1e-30, %v861_v27  ;;  %v864_v59 = vadd.f32 1e-30, %v862_v54 }
 0x1a0   :  { %2705 = vrsqrt.f32 %v863_v53 }
 0x1a1   :  { %2707 = vrsqrt.f32 %v864_v59 }
 0x1aa   :  { %v2706_v23 = vpop.eup %2705 }
 0x1ab   :  { %v2708_v36 = vpop.eup %2707  ;;  %v867_v56 = vmul.f32 %v2706_v23, %v861_v27 }
 0x1ac   :  { %v868_v49 = vmul.f32 %v2708_v36, %v862_v54 }
 0x1ad   :  { %v871_v18 = vadd.f32 %v869_v40, %v867_v56 }
 0x1ae   :  { %v872_v57 = vadd.f32 %v870_v16, %v868_v49 }
 0x1af   :  { %v873_v37 = vadd.f32 1e-30, %v871_v18 }
 0x1b0   :  { %v874_v47 = vadd.f32 1e-30, %v872_v57 }
 0x1b1   :  { %2709 = vrcp.f32 %v873_v37 }
 0x1b2   :  { %2711 = vrcp.f32 %v874_v47 }
 0x1bb   :  { %v2710_v14 = vpop.eup %2709 }
 0x1bc   :  { %v2712_v61 = vpop.eup %2711  ;;  %v881_v22 = vmul.f32 %v2710_v14, %v873_v37 }
 0x1bd   :  { %v882_v19 = vmul.f32 %v2712_v61, %v874_v47 }
 0x1be   :  { %v883_v11 = vsub.f32 2.0, %v881_v22 }
 0x1bf   :  { %v884_v46 = vsub.f32 2.0, %v882_v19 }
 0x1c0   :  { %v885_v9 = vmul.f32 %v2710_v14, %v883_v11 }
 0x1c1   :  { %v886_v13 = vmul.f32 %v2712_v61, %v884_v46 }
 0x1c2   :  { %v889_v30 = vmul.f32 %v887_v15, %v885_v9 }
 0x1c3   :  { %v890_v10 = vmul.f32 %v888_v43, %v886_v13 }
 0x1c4   :  { %v891_v32 = vmul.f32 %v889_v30, %v889_v30  ;;  %v899_v38 = vmul.f32 %v889_v30, %v833_v3 }
 0x1c5   :  { %v892_v63 = vmul.f32 %v890_v10, %v890_v10  ;;  %v900_v2 = vmul.f32 %v890_v10, %v834_v12 }
 0x1c6   :  { %v893_v52 = vadd.f32 1.0, %v891_v32  ;;  %v4050_v7 = vsub.f32 %v3995_v28, %v899_v38  ;;  %v4068_v28 = vadd.f32 %v899_v38, %v3976_v34 }
 0x1c7   :  { %v894_v44 = vadd.f32 1.0, %v892_v63  ;;  %v4053_v35 = vsub.f32 %v3999_v8, %v900_v2  ;;  %v4072_v8 = vadd.f32 %v3991_v50, %v3909_v26  ;;  %v4075_v3 = vadd.f32 %v900_v2, %v3982_v24 }
 0x1c8   :  { %2713 = vrsqrt.f32 %v893_v52  ;;  %v4057_v0 = vsub.f32 %v3979_v29, %v4050_v7  ;;  %v4079_v12 = vsub.f32 %v4068_v28, %v4065_v55 }
 0x1c9   :  { %2715 = vrsqrt.f32 %v894_v44  ;;  %v4061_v60 = vsub.f32 %v3985_v41, %v4053_v35  ;;  %v4086_v34 = vsub.f32 %v4075_v3, %v4072_v8 }
 0x1ca   :  { %vm947_vm0 = vcmp.ge.f32.partialorder %v4057_v0, 0.0  ;;  %v929_v21 = vmul.f32 %v4057_v0, %v4057_v0  ;;  %v1005_v24 = vmul.f32 %v4079_v12, %v4079_v12  ;;  %vm1023_vm2 = vcmp.ge.f32.partialorder %v4079_v12, 0.0 }
 0x1cb   :  { %vm948_vm1 = vcmp.ge.f32.partialorder %v4061_v60, 0.0  ;;  %v949_v26 = vsel %vm947_vm0, 1.0, %v2993_v58  ;;  %vm1024_vm3 = vcmp.ge.f32.partialorder %v4086_v34, 0.0  ;;  %v1025_v40 = vsel %vm1023_vm2, 1.0, %v2993_v58 }
 0x1cc   :  { %v950_v18 = vsel %vm948_vm1, 1.0, %v2993_v58  ;;  %v1026_v37 = vsel %vm1024_vm3, 1.0, %v2993_v58  ;;  %v930_v14 = vmul.f32 %v4061_v60, %v4061_v60  ;;  %v1006_v22 = vmul.f32 %v4086_v34, %v4086_v34 }
 0x1d2   :  { %v2714_v45 = vpop.eup %2713 }
 0x1d3   :  { %v2716_v50 = vpop.eup %2715  ;;  %v897_v33 = vmul.f32 %v2714_v45, %v889_v30  ;;  %v905_v51 = vmul.f32 0.0, %v2714_v45  ;;  %v913_v17 = vmul.f32 %v2714_v45, %v4033_v20  ;;  %v917_v1 = vmul.f32 %v2714_v45, %v4037_v31 }
 0x1d4   :  { %v898_v39 = vmul.f32 %v2716_v50, %v890_v10  ;;  %v906_v42 = vmul.f32 0.0, %v2716_v50  ;;  %v914_v6 = vmul.f32 %v2716_v50, %v4035_v4  ;;  %v918_v48 = vmul.f32 %v2716_v50, %v4039_v62 }
 0x1d5   :  { %v907_v15 = vmul.f32 %v897_v33, %v4033_v20  ;;  %v911_v43 = vmul.f32 0.0, %v897_v33  ;;  %v921_v27 = vmul.f32 %v897_v33, %v4037_v31 }
 0x1d6   :  { %v908_v54 = vmul.f32 %v898_v39, %v4035_v4  ;;  %v912_v53 = vmul.f32 0.0, %v898_v39  ;;  %v922_v59 = vmul.f32 %v898_v39, %v4039_v62 }
 0x1d7   :  { %v4105_v23 = vsub.f32 %v905_v51, %v907_v15  ;;  %v4107_v16 = vadd.f32 %v913_v17, %v911_v43  ;;  %v4109_v36 = vsub.f32 %v917_v1, %v911_v43  ;;  %v4111_v20 = vadd.f32 %v921_v27, %v905_v51 }
 0x1d8   :  { %v4113_v31 = vsub.f32 %v906_v42, %v908_v54  ;;  %v4115_v56 = vadd.f32 %v914_v6, %v912_v53  ;;  %v4117_v4 = vsub.f32 %v918_v48, %v912_v53  ;;  %v4119_v49 = vadd.f32 %v922_v59, %v906_v42 }
 0x1d9   :  { %v927_v62 = vmul.f32 2.0, %v4109_v36  ;;  %v1003_v57 = vmul.f32 2.0, %v4107_v16  ;;  %v942_v17 = vand.u32 2147483647, %v4061_v60  ;;  %v1018_v6 = vand.u32 2147483647, %v4086_v34 }
 0x1da   :  { %v928_v47 = vmul.f32 2.0, %v4117_v4  ;;  %v1004_v61 = vmul.f32 2.0, %v4115_v56 }
 0x1db   :  { %v931_v19 = vmul.f32 %v927_v62, %v927_v62  ;;  %v959_v11 = vmul.f32 %v949_v26, %v927_v62  ;;  %v1007_v46 = vmul.f32 %v1003_v57, %v1003_v57  ;;  %v1035_v9 = vmul.f32 %v1025_v40, %v1003_v57 }
 0x1dc   :  { %v932_v13 = vmul.f32 %v928_v47, %v928_v47  ;;  %v960_v30 = vmul.f32 %v950_v18, %v928_v47  ;;  %v1008_v10 = vmul.f32 %v1004_v61, %v1004_v61  ;;  %v1036_v32 = vmul.f32 %v1026_v37, %v1004_v61 }
 0x1dd   :  { %v933_v38 = vadd.f32 %v931_v19, %v929_v21  ;;  %v1009_v63 = vadd.f32 %v1007_v46, %v1005_v24  ;;  %v941_v26 = vand.u32 2147483647, %v4057_v0  ;;  %v1017_v21 = vand.u32 2147483647, %v4079_v12 }
 0x1de   :  { %v934_v2 = vadd.f32 %v932_v13, %v930_v14  ;;  %v1010_v52 = vadd.f32 %v1008_v10, %v1006_v22 }
 0x1df   :  { %v935_v44 = vadd.f32 1e-30, %v933_v38  ;;  %v1011_v45 = vadd.f32 1e-30, %v1009_v63 }
 0x1e0   :  { %v936_v50 = vadd.f32 1e-30, %v934_v2  ;;  %v1012_v33 = vadd.f32 1e-30, %v1010_v52 }
 0x1e1   :  { %2717 = vrsqrt.f32 %v935_v44 }
 0x1e2   :  { %2719 = vrsqrt.f32 %v936_v50 }
 0x1e3   :  { %2721 = vrsqrt.f32 %v1011_v45 }
 0x1e4   :  { %2723 = vrsqrt.f32 %v1012_v33 }
 0x1eb   :  { %v2718_v51 = vpop.eup %2717 }
 0x1ec   :  { %v2720_v1 = vpop.eup %2719  ;;  %v939_v39 = vmul.f32 %v2718_v51, %v933_v38 }
 0x1ed   :  { %v2722_v24 = vpop.eup %2721  ;;  %v940_v42 = vmul.f32 %v2720_v1, %v934_v2 }
 0x1ee   :  { %v2724_v48 = vpop.eup %2723  ;;  %v943_v15 = vadd.f32 %v941_v26, %v939_v39  ;;  %v1015_v43 = vmul.f32 %v2722_v24, %v1009_v63 }
 0x1ef   :  { %v944_v27 = vadd.f32 %v942_v17, %v940_v42  ;;  %v1016_v54 = vmul.f32 %v2724_v48, %v1010_v52 }
 0x1f0   :  { %v945_v53 = vadd.f32 1e-30, %v943_v15  ;;  %v1019_v59 = vadd.f32 %v1017_v21, %v1015_v43 }
 0x1f1   :  { %v946_v40 = vadd.f32 1e-30, %v944_v27  ;;  %v1020_v0 = vadd.f32 %v1018_v6, %v1016_v54 }
 0x1f2   :  { %2725 = vrcp.f32 %v945_v53  ;;  %v1021_v62 = vadd.f32 1e-30, %v1019_v59 }
 0x1f3   :  { %2727 = vrcp.f32 %v946_v40  ;;  %v1022_v60 = vadd.f32 1e-30, %v1020_v0 }
 0x1f4   :  { %2729 = vrcp.f32 %v1021_v62 }
 0x1f5   :  { %2731 = vrcp.f32 %v1022_v60 }
 0x1fc   :  { %v2726_v12 = vpop.eup %2725 }
 0x1fd   :  { %v2728_v18 = vpop.eup %2727  ;;  %v953_v57 = vmul.f32 %v2726_v12, %v945_v53 }
 0x1fe   :  { %v2730_v37 = vpop.eup %2729  ;;  %v954_v34 = vmul.f32 %v2728_v18, %v946_v40 }
 0x1ff   :  { %v2732_v47 = vpop.eup %2731  ;;  %v955_v14 = vsub.f32 2.0, %v953_v57  ;;  %v1029_v61 = vmul.f32 %v2730_v37, %v1021_v62 }
 0x200   :  { %v956_v22 = vsub.f32 2.0, %v954_v34  ;;  %v1030_v19 = vmul.f32 %v2732_v47, %v1022_v60 }
 0x201   :  { %v957_v46 = vmul.f32 %v2726_v12, %v955_v14  ;;  %v1031_v13 = vsub.f32 2.0, %v1029_v61 }
 0x202   :  { %v958_v10 = vmul.f32 %v2728_v18, %v956_v22  ;;  %v1032_v38 = vsub.f32 2.0, %v1030_v19 }
 0x203   :  { %v961_v63 = vmul.f32 %v959_v11, %v957_v46  ;;  %v1033_v2 = vmul.f32 %v2730_v37, %v1031_v13 }
 0x204   :  { %v962_v52 = vmul.f32 %v960_v30, %v958_v10  ;;  %v1034_v44 = vmul.f32 %v2732_v47, %v1032_v38 }
 0x205   :  { %v963_v45 = vmul.f32 %v961_v63, %v961_v63  ;;  %v971_v50 = vmul.f32 %v961_v63, %v4109_v36  ;;  %v1037_v33 = vmul.f32 %v1035_v9, %v1033_v2 }
 0x206   :  { %v964_v26 = vmul.f32 %v962_v52, %v962_v52  ;;  %v972_v51 = vmul.f32 %v962_v52, %v4117_v4  ;;  %v1038_v17 = vmul.f32 %v1036_v32, %v1034_v44 }
 0x207   :  { %v965_v1 = vadd.f32 1.0, %v963_v45  ;;  %v4142_v39 = vsub.f32 %v4050_v7, %v971_v50  ;;  %v4145_v21 = vadd.f32 %v971_v50, %v3979_v29  ;;  %v1039_v24 = vmul.f32 %v1037_v33, %v1037_v33 }
 0x208   :  { %v966_v11 = vadd.f32 1.0, %v964_v26  ;;  %v4148_v30 = vsub.f32 %v4053_v35, %v972_v51  ;;  %v4151_v42 = vadd.f32 %v972_v51, %v3985_v41  ;;  %v1040_v36 = vmul.f32 %v1038_v17, %v1038_v17 }
 0x209   :  { %2733 = vrsqrt.f32 %v965_v1  ;;  %v1041_v9 = vadd.f32 1.0, %v1039_v24  ;;  %v4154_v4 = vmul.f32 %v1037_v33, %v4107_v16  ;;  %v4157_v7 = vmul.f32 %v1038_v17, %v4115_v56 }
 0x20a   :  { %2735 = vrsqrt.f32 %v966_v11  ;;  %v1042_v29 = vadd.f32 1.0, %v1040_v36 }
 0x20b   :  { %v4161_v32 = vsub.f32 %v4065_v55, %v4154_v4  ;;  %v4165_v35 = vsub.f32 %v4072_v8, %v4157_v7  ;;  %2737 = vrsqrt.f32 %v1041_v9 }
 0x20c   :  { %2739 = vrsqrt.f32 %v1042_v29 }
 0x20d   :  { %v4169_v16 = vsub.f32 %v4145_v21, %v4161_v32  ;;  %v4173_v56 = vsub.f32 %v4151_v42, %v4165_v35 }
 0x20f   :  { %vm1099_vm4 = vcmp.ge.f32.partialorder %v4169_v16, 0.0  ;;  %vm1100_vm5 = vcmp.ge.f32.partialorder %v4173_v56, 0.0 }
 0x213   :  { %v2734_v41 = vpop.eup %2733 }
 0x214   :  { %v2736_v6 = vpop.eup %2735  ;;  %v969_v48 = vmul.f32 %v2734_v41, %v961_v63  ;;  %v977_v55 = vmul.f32 %v2734_v41, %v4105_v23  ;;  %v985_v15 = vmul.f32 %v2734_v41, %v4041_v5  ;;  %v989_v43 = vmul.f32 0.0, %v2734_v41 }
 0x215   :  { %v970_v8 = vmul.f32 %v2736_v6, %v962_v52  ;;  %v978_v27 = vmul.f32 %v2736_v6, %v4113_v31  ;;  %v986_v54 = vmul.f32 %v2736_v6, %v4043_v25  ;;  %v990_v53 = vmul.f32 0.0, %v2736_v6  ;;  %v2738_v59 = vpop.eup %2737 }
 0x216   :  { %v979_v40 = vmul.f32 %v969_v48, %v4041_v5  ;;  %v983_v0 = vmul.f32 %v969_v48, %v4105_v23  ;;  %v991_v62 = vmul.f32 %v969_v48, %v4111_v20  ;;  %v995_v60 = vmul.f32 0.0, %v969_v48  ;;  %v2740_v12 = vpop.eup %2739 }
 0x217   :  { %v980_v18 = vmul.f32 %v970_v8, %v4043_v25  ;;  %v984_v57 = vmul.f32 %v970_v8, %v4113_v31  ;;  %v992_v37 = vmul.f32 %v970_v8, %v4119_v49  ;;  %v996_v34 = vmul.f32 0.0, %v970_v8 }
 0x218   :  { %v981_v47 = vsub.f32 %v977_v55, %v979_v40  ;;  %v987_v14 = vadd.f32 %v985_v15, %v983_v0  ;;  %v993_v61 = vsub.f32 %v989_v43, %v991_v62  ;;  %v997_v22 = vmul.f32 %v2734_v41, %v4111_v20 }
 0x219   :  { %v982_v19 = vsub.f32 %v978_v27, %v980_v18  ;;  %v988_v5 = vadd.f32 %v986_v54, %v984_v57  ;;  %v994_v46 = vsub.f32 %v990_v53, %v992_v37  ;;  %v998_v23 = vmul.f32 %v2736_v6, %v4119_v49 }
 0x21a   :  { %v999_v13 = vadd.f32 %v997_v22, %v995_v60  ;;  %v1045_v10 = vmul.f32 %v2738_v59, %v1037_v33  ;;  %v1046_v38 = vmul.f32 %v2740_v12, %v1038_v17  ;;  %v1053_v63 = vmul.f32 %v2738_v59, %v981_v47 }
 0x21b   :  { %v1000_v25 = vadd.f32 %v998_v23, %v996_v34  ;;  %v1054_v2 = vmul.f32 %v2740_v12, %v982_v19  ;;  %v1061_v31 = vmul.f32 %v2738_v59, %v993_v61  ;;  %v1062_v52 = vmul.f32 %v2740_v12, %v994_v46 }
 0x21c   :  { %v1055_v44 = vmul.f32 %v1045_v10, %v993_v61  ;;  %v1056_v45 = vmul.f32 %v1046_v38, %v994_v46  ;;  %v1059_v50 = vmul.f32 %v1045_v10, %v981_v47  ;;  %v1060_v26 = vmul.f32 %v1046_v38, %v982_v19 }
 0x21d   :  { %v1065_v51 = vmul.f32 %v2738_v59, %v987_v14  ;;  %v1066_v1 = vmul.f32 %v2740_v12, %v988_v5  ;;  %v1067_v20 = vmul.f32 %v1045_v10, %v999_v13  ;;  %v1068_v24 = vmul.f32 %v1046_v38, %v1000_v25 }
 0x21e   :  { %v4189_v11 = vsub.f32 %v1053_v63, %v1055_v44  ;;  %v4191_v36 = vsub.f32 %v1054_v2, %v1056_v45  ;;  %v4193_v49 = vadd.f32 %v1061_v31, %v1059_v50  ;;  %v4195_v33 = vadd.f32 %v1062_v52, %v1060_v26 }
 0x21f   :  { %v1069_v17 = vsub.f32 %v1065_v51, %v1067_v20  ;;  %v1070_v9 = vsub.f32 %v1066_v1, %v1068_v24  ;;  %v1071_v29 = vmul.f32 %v1045_v10, %v987_v14  ;;  %v1072_v41 = vmul.f32 %v1046_v38, %v988_v5 }
 0x220   :  { %v1073_v6 = vmul.f32 %v2738_v59, %v999_v13  ;;  %v1074_v48 = vmul.f32 %v2740_v12, %v1000_v25  ;;  %v1101_v55 = vsel %vm1099_vm4, 1.0, %v2993_v58  ;;  %v1102_v15 = vsel %vm1100_vm5, 1.0, %v2993_v58 }
 0x221   :  { %v1079_v43 = vmul.f32 2.0, %v1069_v17  ;;  %v1080_v8 = vmul.f32 2.0, %v1070_v9  ;;  %v1081_v27 = vmul.f32 %v4169_v16, %v4169_v16  ;;  %v1082_v54 = vmul.f32 %v4173_v56, %v4173_v56 }
 0x222   :  { %v4207_v53 = vadd.f32 %v1073_v6, %v1071_v29  ;;  %v4209_v59 = vadd.f32 %v1074_v48, %v1072_v41  ;;  %v1093_v34 = vand.u32 2147483647, %v4169_v16  ;;  %v1094_v14 = vand.u32 2147483647, %v4173_v56 }
 0x223   :  { %v1083_v40 = vmul.f32 %v1079_v43, %v1079_v43  ;;  %v1084_v0 = vmul.f32 %v1080_v8, %v1080_v8  ;;  %v1111_v62 = vmul.f32 %v1101_v55, %v1079_v43  ;;  %v1112_v60 = vmul.f32 %v1102_v15, %v1080_v8 }
 0x224   :  { %v4215_v56 = vadd.f32 %v4154_v4, %v4068_v28  ;;  %v4219_v51 = vadd.f32 %v4157_v7, %v4075_v3 }
 0x225   :  { %v1085_v12 = vadd.f32 %v1083_v40, %v1081_v27  ;;  %v1086_v18 = vadd.f32 %v1084_v0, %v1082_v54 }
 0x227   :  { %v1087_v57 = vadd.f32 1e-30, %v1085_v12  ;;  %v1088_v37 = vadd.f32 1e-30, %v1086_v18 }
 0x229   :  { %2741 = vrsqrt.f32 %v1087_v57 }
 0x22a   :  { %2743 = vrsqrt.f32 %v1088_v37 }
 0x233   :  { %v2742_v47 = vpop.eup %2741 }
 0x234   :  { %v2744_v61 = vpop.eup %2743  ;;  %v1091_v22 = vmul.f32 %v2742_v47, %v1085_v12 }
 0x235   :  { %v1092_v19 = vmul.f32 %v2744_v61, %v1086_v18 }
 0x236   :  { %v1095_v5 = vadd.f32 %v1093_v34, %v1091_v22 }
 0x237   :  { %v1096_v46 = vadd.f32 %v1094_v14, %v1092_v19 }
 0x238   :  { %v1097_v23 = vadd.f32 1e-30, %v1095_v5 }
 0x239   :  { %v1098_v13 = vadd.f32 1e-30, %v1096_v46 }
 0x23a   :  { %2745 = vrcp.f32 %v1097_v23 }
 0x23b   :  { %2747 = vrcp.f32 %v1098_v13 }
 0x244   :  { %v2746_v10 = vpop.eup %2745 }
 0x245   :  { %v2748_v38 = vpop.eup %2747  ;;  %v1105_v63 = vmul.f32 %v2746_v10, %v1097_v23 }
 0x246   :  { %v1106_v25 = vmul.f32 %v2748_v38, %v1098_v13 }
 0x247   :  { %v1107_v2 = vsub.f32 2.0, %v1105_v63 }
 0x248   :  { %v1108_v31 = vsub.f32 2.0, %v1106_v25 }
 0x249   :  { %v1109_v52 = vmul.f32 %v2746_v10, %v1107_v2 }
 0x24a   :  { %v1110_v16 = vmul.f32 %v2748_v38, %v1108_v31 }
 0x24b   :  { %v1113_v44 = vmul.f32 %v1111_v62, %v1109_v52 }
 0x24c   :  { %v1114_v45 = vmul.f32 %v1112_v60, %v1110_v16 }
 0x24d   :  { %v1115_v50 = vmul.f32 %v1113_v44, %v1113_v44  ;;  %v1123_v26 = vmul.f32 %v1113_v44, %v1069_v17 }
 0x24e   :  { %v1116_v1 = vmul.f32 %v1114_v45, %v1114_v45  ;;  %v1124_v20 = vmul.f32 %v1114_v45, %v1070_v9 }
 0x24f   :  { %v1117_v24 = vadd.f32 1.0, %v1115_v50  ;;  %v4222_v29 = vadd.f32 %v1123_v26, %v4145_v21  ;;  %v4236_v4 = vsub.f32 %v4161_v32, %v1123_v26 }
 0x250   :  { %v1118_v41 = vadd.f32 1.0, %v1116_v1  ;;  %v4225_v6 = vadd.f32 %v1124_v20, %v4151_v42  ;;  %v4239_v21 = vsub.f32 %v4165_v35, %v1124_v20 }
 0x251   :  { %2749 = vrsqrt.f32 %v1117_v24  ;;  %v4229_v28 = vsub.f32 %v4222_v29, %v4215_v56  ;;  %v4243_v42 = vsub.f32 %v4236_v4, %v4142_v39 }
 0x252   :  { %2751 = vrsqrt.f32 %v1118_v41  ;;  %v4233_v3 = vsub.f32 %v4225_v6, %v4219_v51  ;;  %v4250_v17 = vsub.f32 %v4239_v21, %v4148_v30 }
 0x253   :  { %vm1171_vm6 = vcmp.ge.f32.partialorder %v4229_v28, 0.0  ;;  %v1153_v7 = vmul.f32 %v4229_v28, %v4229_v28  ;;  %v1229_v35 = vmul.f32 %v4243_v42, %v4243_v42  ;;  %vm1247_vm8 = vcmp.ge.f32.partialorder %v4243_v42, 0.0 }
 0x254   :  { %vm1172_vm7 = vcmp.ge.f32.partialorder %v4233_v3, 0.0  ;;  %v1173_v32 = vsel %vm1171_vm6, 1.0, %v2993_v58  ;;  %vm1248_vm9 = vcmp.ge.f32.partialorder %v4250_v17, 0.0  ;;  %v1249_v34 = vsel %vm1247_vm8, 1.0, %v2993_v58 }
 0x255   :  { %v1174_v5 = vsel %vm1172_vm7, 1.0, %v2993_v58  ;;  %v1250_v23 = vsel %vm1248_vm9, 1.0, %v2993_v58  ;;  %v1154_v10 = vmul.f32 %v4233_v3, %v4233_v3  ;;  %v1230_v63 = vmul.f32 %v4250_v17, %v4250_v17 }
 0x25b   :  { %v2750_v9 = vpop.eup %2749 }
 0x25c   :  { %v2752_v48 = vpop.eup %2751  ;;  %v1121_v55 = vmul.f32 %v2750_v9, %v1113_v44  ;;  %v1129_v15 = vmul.f32 %v2750_v9, %v4189_v11  ;;  %v1137_v43 = vmul.f32 0.0, %v2750_v9  ;;  %v1145_v8 = vmul.f32 %v2750_v9, %v4207_v53 }
 0x25d   :  { %v1122_v27 = vmul.f32 %v2752_v48, %v1114_v45  ;;  %v1130_v54 = vmul.f32 %v2752_v48, %v4191_v36  ;;  %v1138_v40 = vmul.f32 0.0, %v2752_v48  ;;  %v1146_v0 = vmul.f32 %v2752_v48, %v4209_v59 }
 0x25e   :  { %v1131_v62 = vmul.f32 0.0, %v1121_v55  ;;  %v1135_v60 = vmul.f32 %v1121_v55, %v4189_v11  ;;  %v1141_v12 = vmul.f32 %v1121_v55, %v4207_v53 }
 0x25f   :  { %v1132_v18 = vmul.f32 0.0, %v1122_v27  ;;  %v1136_v57 = vmul.f32 %v1122_v27, %v4191_v36  ;;  %v1142_v37 = vmul.f32 %v1122_v27, %v4209_v59 }
 0x260   :  { %v4269_v47 = vsub.f32 %v1129_v15, %v1131_v62  ;;  %v4271_v14 = vadd.f32 %v1137_v43, %v1135_v60  ;;  %v4273_v61 = vsub.f32 %v1137_v43, %v1141_v12  ;;  %v4275_v11 = vadd.f32 %v1145_v8, %v1131_v62 }
 0x261   :  { %v4277_v53 = vsub.f32 %v1130_v54, %v1132_v18  ;;  %v4279_v22 = vadd.f32 %v1138_v40, %v1136_v57  ;;  %v4281_v19 = vsub.f32 %v1138_v40, %v1142_v37  ;;  %v4283_v36 = vadd.f32 %v1146_v0, %v1132_v18 }
 0x262   :  { %v1151_v59 = vmul.f32 2.0, %v4275_v11  ;;  %v1227_v46 = vmul.f32 2.0, %v4269_v47  ;;  %v1166_v43 = vand.u32 2147483647, %v4233_v3  ;;  %v1242_v40 = vand.u32 2147483647, %v4250_v17 }
 0x263   :  { %v1152_v13 = vmul.f32 2.0, %v4283_v36  ;;  %v1228_v38 = vmul.f32 2.0, %v4277_v53 }
 0x264   :  { %v1155_v25 = vmul.f32 %v1151_v59, %v1151_v59  ;;  %v1183_v2 = vmul.f32 %v1173_v32, %v1151_v59  ;;  %v1231_v31 = vmul.f32 %v1227_v46, %v1227_v46  ;;  %v1259_v52 = vmul.f32 %v1249_v34, %v1227_v46 }
 0x265   :  { %v1156_v16 = vmul.f32 %v1152_v13, %v1152_v13  ;;  %v1184_v44 = vmul.f32 %v1174_v5, %v1152_v13  ;;  %v1232_v45 = vmul.f32 %v1228_v38, %v1228_v38  ;;  %v1260_v50 = vmul.f32 %v1250_v23, %v1228_v38 }
 0x266   :  { %v1157_v26 = vadd.f32 %v1155_v25, %v1153_v7  ;;  %v1233_v1 = vadd.f32 %v1231_v31, %v1229_v35  ;;  %v1165_v32 = vand.u32 2147483647, %v4229_v28  ;;  %v1241_v7 = vand.u32 2147483647, %v4243_v42 }
 0x267   :  { %v1158_v20 = vadd.f32 %v1156_v16, %v1154_v10  ;;  %v1234_v24 = vadd.f32 %v1232_v45, %v1230_v63 }
 0x268   :  { %v1159_v41 = vadd.f32 1e-30, %v1157_v26  ;;  %v1235_v9 = vadd.f32 1e-30, %v1233_v1 }
 0x269   :  { %v1160_v48 = vadd.f32 1e-30, %v1158_v20  ;;  %v1236_v55 = vadd.f32 1e-30, %v1234_v24 }
 0x26a   :  { %2753 = vrsqrt.f32 %v1159_v41 }
 0x26b   :  { %2755 = vrsqrt.f32 %v1160_v48 }
 0x26c   :  { %2757 = vrsqrt.f32 %v1235_v9 }
 0x26d   :  { %2759 = vrsqrt.f32 %v1236_v55 }
 0x274   :  { %v2754_v15 = vpop.eup %2753 }
 0x275   :  { %v2756_v8 = vpop.eup %2755  ;;  %v1163_v27 = vmul.f32 %v2754_v15, %v1157_v26 }
 0x276   :  { %v2758_v35 = vpop.eup %2757  ;;  %v1164_v54 = vmul.f32 %v2756_v8, %v1158_v20 }
 0x277   :  { %v2760_v0 = vpop.eup %2759  ;;  %v1167_v62 = vadd.f32 %v1165_v32, %v1163_v27  ;;  %v1239_v60 = vmul.f32 %v2758_v35, %v1233_v1 }
 0x278   :  { %v1168_v12 = vadd.f32 %v1166_v43, %v1164_v54  ;;  %v1240_v18 = vmul.f32 %v2760_v0, %v1234_v24 }
 0x279   :  { %v1169_v57 = vadd.f32 1e-30, %v1167_v62  ;;  %v1243_v37 = vadd.f32 %v1241_v7, %v1239_v60 }
 0x27a   :  { %v1170_v34 = vadd.f32 1e-30, %v1168_v12  ;;  %v1244_v28 = vadd.f32 %v1242_v40, %v1240_v18 }
 0x27b   :  { %2761 = vrcp.f32 %v1169_v57  ;;  %v1245_v59 = vadd.f32 1e-30, %v1243_v37 }
 0x27c   :  { %2763 = vrcp.f32 %v1170_v34  ;;  %v1246_v3 = vadd.f32 1e-30, %v1244_v28 }
 0x27d   :  { %2765 = vrcp.f32 %v1245_v59 }
 0x27e   :  { %2767 = vrcp.f32 %v1246_v3 }
 0x285   :  { %v2762_v42 = vpop.eup %2761 }
 0x286   :  { %v2764_v5 = vpop.eup %2763  ;;  %v1177_v46 = vmul.f32 %v2762_v42, %v1169_v57 }
 0x287   :  { %v2766_v23 = vpop.eup %2765  ;;  %v1178_v17 = vmul.f32 %v2764_v5, %v1170_v34 }
 0x288   :  { %v2768_v13 = vpop.eup %2767  ;;  %v1179_v10 = vsub.f32 2.0, %v1177_v46  ;;  %v1253_v38 = vmul.f32 %v2766_v23, %v1245_v59 }
 0x289   :  { %v1180_v63 = vsub.f32 2.0, %v1178_v17  ;;  %v1254_v25 = vmul.f32 %v2768_v13, %v1246_v3 }
 0x28a   :  { %v1181_v31 = vmul.f32 %v2762_v42, %v1179_v10  ;;  %v1255_v16 = vsub.f32 2.0, %v1253_v38 }
 0x28b   :  { %v1182_v45 = vmul.f32 %v2764_v5, %v1180_v63  ;;  %v1256_v26 = vsub.f32 2.0, %v1254_v25 }
 0x28c   :  { %v1185_v1 = vmul.f32 %v1183_v2, %v1181_v31  ;;  %v1257_v20 = vmul.f32 %v2766_v23, %v1255_v16 }
 0x28d   :  { %v1186_v24 = vmul.f32 %v1184_v44, %v1182_v45  ;;  %v1258_v41 = vmul.f32 %v2768_v13, %v1256_v26 }
 0x28e   :  { %v1187_v9 = vmul.f32 %v1185_v1, %v1185_v1  ;;  %v1195_v48 = vmul.f32 %v1185_v1, %v4275_v11  ;;  %v1261_v55 = vmul.f32 %v1259_v52, %v1257_v20 }
 0x28f   :  { %v1188_v32 = vmul.f32 %v1186_v24, %v1186_v24  ;;  %v1196_v15 = vmul.f32 %v1186_v24, %v4283_v36  ;;  %v1262_v43 = vmul.f32 %v1260_v50, %v1258_v41 }
 0x290   :  { %v1189_v8 = vadd.f32 1.0, %v1187_v9  ;;  %v4306_v27 = vsub.f32 %v4215_v56, %v1195_v48  ;;  %v4309_v7 = vadd.f32 %v1195_v48, %v4222_v29  ;;  %v1263_v35 = vmul.f32 %v1261_v55, %v1261_v55 }
 0x291   :  { %v1190_v2 = vadd.f32 1.0, %v1188_v32  ;;  %v4312_v44 = vsub.f32 %v4219_v51, %v1196_v15  ;;  %v4315_v54 = vadd.f32 %v1196_v15, %v4225_v6  ;;  %v1264_v11 = vmul.f32 %v1262_v43, %v1262_v43 }
 0x292   :  { %2769 = vrsqrt.f32 %v1189_v8  ;;  %v1265_v52 = vadd.f32 1.0, %v1263_v35  ;;  %v4318_v36 = vmul.f32 %v1261_v55, %v4269_v47  ;;  %v4321_v56 = vmul.f32 %v1262_v43, %v4277_v53 }
 0x293   :  { %2771 = vrsqrt.f32 %v1190_v2  ;;  %v1266_v29 = vadd.f32 1.0, %v1264_v11 }
 0x294   :  { %v4325_v50 = vsub.f32 %v4142_v39, %v4318_v36  ;;  %v4329_v51 = vsub.f32 %v4148_v30, %v4321_v56  ;;  %2773 = vrsqrt.f32 %v1265_v52 }
 0x295   :  { %2775 = vrsqrt.f32 %v1266_v29 }
 0x296   :  { %v4333_v6 = vsub.f32 %v4306_v27, %v4325_v50  ;;  %v4337_v47 = vsub.f32 %v4312_v44, %v4329_v51 }
 0x298   :  { %vm1323_vm10 = vcmp.ge.f32.partialorder %v4333_v6, 0.0  ;;  %vm1324_vm11 = vcmp.ge.f32.partialorder %v4337_v47, 0.0  ;;  %v4343_v53 = vmul.f32 %v4333_v6, %v4333_v6  ;;  %v4347_v30 = vmul.f32 %v4337_v47, %v4337_v47 }
 0x299   :  { %v1325_v40 = vsel %vm1323_vm10, 1.0, %v2993_v58  ;;  %v1326_v0 = vsel %vm1324_vm11, 1.0, %v2993_v58 }
 0x29c   :  { %v2770_v39 = vpop.eup %2769 }
 0x29d   :  { %v2772_v62 = vpop.eup %2771  ;;  %v1193_v60 = vmul.f32 %v2770_v39, %v1185_v1  ;;  %v1201_v12 = vmul.f32 %v2770_v39, %v4193_v49  ;;  %v1209_v18 = vmul.f32 %v2770_v39, %v4271_v14  ;;  %v1213_v57 = vmul.f32 %v2770_v39, %v4273_v61 }
 0x29e   :  { %v1194_v37 = vmul.f32 %v2772_v62, %v1186_v24  ;;  %v1202_v34 = vmul.f32 %v2772_v62, %v4195_v33  ;;  %v1210_v28 = vmul.f32 %v2772_v62, %v4279_v22  ;;  %v1214_v59 = vmul.f32 %v2772_v62, %v4281_v19  ;;  %v2774_v3 = vpop.eup %2773 }
 0x29f   :  { %v1203_v42 = vmul.f32 %v1193_v60, %v4271_v14  ;;  %v1207_v5 = vmul.f32 %v1193_v60, %v4193_v49  ;;  %v1215_v46 = vmul.f32 0.0, %v1193_v60  ;;  %v1219_v23 = vmul.f32 %v1193_v60, %v4273_v61  ;;  %v2776_v17 = vpop.eup %2775 }
 0x2a0   :  { %v1204_v13 = vmul.f32 %v1194_v37, %v4279_v22  ;;  %v1208_v10 = vmul.f32 %v1194_v37, %v4195_v33  ;;  %v1216_v38 = vmul.f32 0.0, %v1194_v37  ;;  %v1220_v63 = vmul.f32 %v1194_v37, %v4281_v19 }
 0x2a1   :  { %v1205_v25 = vsub.f32 %v1201_v12, %v1203_v42  ;;  %v1211_v31 = vadd.f32 %v1209_v18, %v1207_v5  ;;  %v1217_v16 = vsub.f32 %v1213_v57, %v1215_v46  ;;  %v1221_v45 = vmul.f32 0.0, %v2770_v39 }
 0x2a2   :  { %v1206_v26 = vsub.f32 %v1202_v34, %v1204_v13  ;;  %v1212_v1 = vadd.f32 %v1210_v28, %v1208_v10  ;;  %v1218_v14 = vsub.f32 %v1214_v59, %v1216_v38  ;;  %v1222_v20 = vmul.f32 0.0, %v2772_v62 }
 0x2a3   :  { %v1223_v49 = vadd.f32 %v1221_v45, %v1219_v23  ;;  %v1269_v24 = vmul.f32 %v2774_v3, %v1261_v55  ;;  %v1270_v41 = vmul.f32 %v2776_v17, %v1262_v43  ;;  %v1277_v61 = vmul.f32 %v2774_v3, %v1205_v25 }
 0x2a4   :  { %v1224_v9 = vadd.f32 %v1222_v20, %v1220_v63  ;;  %v1278_v48 = vmul.f32 %v2776_v17, %v1206_v26  ;;  %v1285_v22 = vmul.f32 %v2774_v3, %v1217_v16  ;;  %v1286_v32 = vmul.f32 %v2776_v17, %v1218_v14 }
 0x2a5   :  { %v1279_v33 = vmul.f32 %v1269_v24, %v1217_v16  ;;  %v1280_v15 = vmul.f32 %v1270_v41, %v1218_v14  ;;  %v1283_v8 = vmul.f32 %v1269_v24, %v1205_v25  ;;  %v1284_v19 = vmul.f32 %v1270_v41, %v1206_v26 }
 0x2a6   :  { %v1289_v35 = vmul.f32 %v2774_v3, %v1211_v31  ;;  %v1290_v2 = vmul.f32 %v2776_v17, %v1212_v1  ;;  %v1291_v11 = vmul.f32 %v1269_v24, %v1223_v49  ;;  %v1292_v52 = vmul.f32 %v1270_v41, %v1224_v9 }
 0x2a7   :  { %v1281_v29 = vsub.f32 %v1277_v61, %v1279_v33  ;;  %v1282_v39 = vsub.f32 %v1278_v48, %v1280_v15  ;;  %v4363_v60 = vadd.f32 %v1285_v22, %v1283_v8  ;;  %v4365_v62 = vadd.f32 %v1286_v32, %v1284_v19 }
 0x2a8   :  { %v4367_v55 = vsub.f32 %v1289_v35, %v1291_v11  ;;  %v4369_v43 = vsub.f32 %v1290_v2, %v1292_v52  ;;  %v1295_v12 = vmul.f32 %v1269_v24, %v1211_v31  ;;  %v1296_v18 = vmul.f32 %v1270_v41, %v1212_v1 }
 0x2a9   :  { %v1297_v57 = vmul.f32 %v2774_v3, %v1223_v49  ;;  %v1298_v37 = vmul.f32 %v2776_v17, %v1224_v9  ;;  %v1303_v34 = vmul.f32 2.0, %v1281_v29  ;;  %v1304_v28 = vmul.f32 2.0, %v1282_v39 }
 0x2aa   :  { %v1317_v3 = vand.u32 2147483647, %v4333_v6  ;;  %v1318_v31 = vand.u32 2147483647, %v4337_v47  ;;  %v4395_v52 = vadd.f32 %v4318_v36, %v4236_v4 }
 0x2ab   :  { %v4371_v59 = vadd.f32 %v1297_v57, %v1295_v12  ;;  %v4373_v42 = vadd.f32 %v1298_v37, %v1296_v18  ;;  %v1307_v5 = vmul.f32 %v1303_v34, %v1303_v34  ;;  %v1308_v46 = vmul.f32 %v1304_v28, %v1304_v28 }
 0x2ac   :  { %v1335_v23 = vmul.f32 %v1325_v40, %v1303_v34  ;;  %v1336_v13 = vmul.f32 %v1326_v0, %v1304_v28 }
 0x2ad   :  { %v1309_v10 = vadd.f32 %v1307_v5, %v4343_v53  ;;  %v1310_v38 = vadd.f32 %v1308_v46, %v4347_v30 }
 0x2af   :  { %v1311_v63 = vadd.f32 1e-30, %v1309_v10  ;;  %v1312_v25 = vadd.f32 1e-30, %v1310_v38 }
 0x2b1   :  { %2777 = vrsqrt.f32 %v1311_v63 }
 0x2b2   :  { %2779 = vrsqrt.f32 %v1312_v25 }
 0x2bb   :  { %v2778_v17 = vpop.eup %2777 }
 0x2bc   :  { %v2780_v16 = vpop.eup %2779  ;;  %v1315_v45 = vmul.f32 %v2778_v17, %v1309_v10 }
 0x2bd   :  { %v1316_v26 = vmul.f32 %v2780_v16, %v1310_v38 }
 0x2be   :  { %v1319_v1 = vadd.f32 %v1317_v3, %v1315_v45 }
 0x2bf   :  { %v1320_v14 = vadd.f32 %v1318_v31, %v1316_v26 }
 0x2c0   :  { %v1321_v40 = vadd.f32 1e-30, %v1319_v1 }
 0x2c1   :  { %v1322_v0 = vadd.f32 1e-30, %v1320_v14 }
 0x2c2   :  { %2781 = vrcp.f32 %v1321_v40 }
 0x2c3   :  { %2783 = vrcp.f32 %v1322_v0 }
 0x2cc   :  { %v2782_v53 = vpop.eup %2781 }
 0x2cd   :  { %v2784_v30 = vpop.eup %2783  ;;  %v1329_v20 = vmul.f32 %v2782_v53, %v1321_v40 }
 0x2ce   :  { %v1330_v49 = vmul.f32 %v2784_v30, %v1322_v0 }
 0x2cf   :  { %v1331_v24 = vsub.f32 2.0, %v1329_v20 }
 0x2d0   :  { %v1332_v41 = vsub.f32 2.0, %v1330_v49 }
 0x2d1   :  { %v1333_v61 = vmul.f32 %v2782_v53, %v1331_v24 }
 0x2d2   :  { %v1334_v6 = vmul.f32 %v2784_v30, %v1332_v41 }
 0x2d3   :  { %v1337_v9 = vmul.f32 %v1335_v23, %v1333_v61 }
 0x2d4   :  { %v1338_v48 = vmul.f32 %v1336_v13, %v1334_v6 }
 0x2d5   :  { %v1339_v47 = vmul.f32 %v1337_v9, %v1337_v9  ;;  %v1347_v22 = vmul.f32 %v1337_v9, %v1281_v29 }
 0x2d6   :  { %v1340_v32 = vmul.f32 %v1338_v48, %v1338_v48  ;;  %v1348_v33 = vmul.f32 %v1338_v48, %v1282_v39 }
 0x2d7   :  { %v1341_v15 = vadd.f32 1.0, %v1339_v47  ;;  %v4380_v8 = vsub.f32 %v4325_v50, %v1347_v22  ;;  %v4398_v50 = vadd.f32 %v1347_v22, %v4306_v27 }
 0x2d8   :  { %v1342_v19 = vadd.f32 1.0, %v1340_v32  ;;  %v4383_v35 = vsub.f32 %v4329_v51, %v1348_v33  ;;  %v4402_v51 = vadd.f32 %v4321_v56, %v4239_v21  ;;  %v4405_v29 = vadd.f32 %v1348_v33, %v4312_v44 }
 0x2d9   :  { %2785 = vrsqrt.f32 %v1341_v15  ;;  %v4387_v2 = vsub.f32 %v4309_v7, %v4380_v8  ;;  %v4409_v39 = vsub.f32 %v4398_v50, %v4395_v52 }
 0x2da   :  { %2787 = vrsqrt.f32 %v1342_v19  ;;  %v4391_v11 = vsub.f32 %v4315_v54, %v4383_v35  ;;  %v4416_v27 = vsub.f32 %v4405_v29, %v4402_v51 }
 0x2db   :  { %vm1395_vm12 = vcmp.ge.f32.partialorder %v4387_v2, 0.0  ;;  %v1377_v4 = vmul.f32 %v4387_v2, %v4387_v2  ;;  %v1453_v44 = vmul.f32 %v4409_v39, %v4409_v39  ;;  %vm1471_vm14 = vcmp.ge.f32.partialorder %v4409_v39, 0.0 }
 0x2dc   :  { %vm1396_vm13 = vcmp.ge.f32.partialorder %v4391_v11, 0.0  ;;  %v1397_v21 = vsel %vm1395_vm12, 1.0, %v2993_v58  ;;  %vm1472_vm15 = vcmp.ge.f32.partialorder %v4416_v27, 0.0  ;;  %v1473_v3 = vsel %vm1471_vm14, 1.0, %v2993_v58 }
 0x2dd   :  { %v1398_v1 = vsel %vm1396_vm13, 1.0, %v2993_v58  ;;  %v1474_v40 = vsel %vm1472_vm15, 1.0, %v2993_v58  ;;  %v1378_v53 = vmul.f32 %v4391_v11, %v4391_v11  ;;  %v1454_v20 = vmul.f32 %v4416_v27, %v4416_v27 }
 0x2e3   :  { %v2786_v36 = vpop.eup %2785 }
 0x2e4   :  { %v2788_v56 = vpop.eup %2787  ;;  %v1345_v12 = vmul.f32 %v2786_v36, %v1337_v9  ;;  %v1353_v18 = vmul.f32 0.0, %v2786_v36  ;;  %v1361_v57 = vmul.f32 %v2786_v36, %v4363_v60  ;;  %v1365_v37 = vmul.f32 %v2786_v36, %v4367_v55 }
 0x2e5   :  { %v1346_v34 = vmul.f32 %v2788_v56, %v1338_v48  ;;  %v1354_v28 = vmul.f32 0.0, %v2788_v56  ;;  %v1362_v5 = vmul.f32 %v2788_v56, %v4365_v62  ;;  %v1366_v46 = vmul.f32 %v2788_v56, %v4369_v43 }
 0x2e6   :  { %v1355_v23 = vmul.f32 %v1345_v12, %v4363_v60  ;;  %v1359_v13 = vmul.f32 0.0, %v1345_v12  ;;  %v1369_v10 = vmul.f32 %v1345_v12, %v4367_v55 }
 0x2e7   :  { %v1356_v38 = vmul.f32 %v1346_v34, %v4365_v62  ;;  %v1360_v63 = vmul.f32 0.0, %v1346_v34  ;;  %v1370_v25 = vmul.f32 %v1346_v34, %v4369_v43 }
 0x2e8   :  { %v4435_v17 = vsub.f32 %v1353_v18, %v1355_v23  ;;  %v4437_v31 = vadd.f32 %v1361_v57, %v1359_v13  ;;  %v4439_v16 = vsub.f32 %v1365_v37, %v1359_v13  ;;  %v4441_v60 = vadd.f32 %v1369_v10, %v1353_v18 }
 0x2e9   :  { %v4443_v55 = vsub.f32 %v1354_v28, %v1356_v38  ;;  %v4445_v45 = vadd.f32 %v1362_v5, %v1360_v63  ;;  %v4447_v62 = vsub.f32 %v1366_v46, %v1360_v63  ;;  %v4449_v26 = vadd.f32 %v1370_v25, %v1354_v28 }
 0x2ea   :  { %v1375_v43 = vmul.f32 2.0, %v4439_v16  ;;  %v1451_v14 = vmul.f32 2.0, %v4437_v31  ;;  %v1390_v57 = vand.u32 2147483647, %v4391_v11  ;;  %v1466_v5 = vand.u32 2147483647, %v4416_v27 }
 0x2eb   :  { %v1376_v0 = vmul.f32 2.0, %v4447_v62  ;;  %v1452_v30 = vmul.f32 2.0, %v4445_v45 }
 0x2ec   :  { %v1379_v49 = vmul.f32 %v1375_v43, %v1375_v43  ;;  %v1407_v24 = vmul.f32 %v1397_v21, %v1375_v43  ;;  %v1455_v41 = vmul.f32 %v1451_v14, %v1451_v14  ;;  %v1483_v61 = vmul.f32 %v1473_v3, %v1451_v14 }
 0x2ed   :  { %v1380_v6 = vmul.f32 %v1376_v0, %v1376_v0  ;;  %v1408_v9 = vmul.f32 %v1398_v1, %v1376_v0  ;;  %v1456_v48 = vmul.f32 %v1452_v30, %v1452_v30  ;;  %v1484_v47 = vmul.f32 %v1474_v40, %v1452_v30 }
 0x2ee   :  { %v1381_v22 = vadd.f32 %v1379_v49, %v1377_v4  ;;  %v1457_v32 = vadd.f32 %v1455_v41, %v1453_v44  ;;  %v1389_v21 = vand.u32 2147483647, %v4387_v2  ;;  %v1465_v4 = vand.u32 2147483647, %v4409_v39 }
 0x2ef   :  { %v1382_v33 = vadd.f32 %v1380_v6, %v1378_v53  ;;  %v1458_v15 = vadd.f32 %v1456_v48, %v1454_v20 }
 0x2f0   :  { %v1383_v19 = vadd.f32 1e-30, %v1381_v22  ;;  %v1459_v36 = vadd.f32 1e-30, %v1457_v32 }
 0x2f1   :  { %v1384_v56 = vadd.f32 1e-30, %v1382_v33  ;;  %v1460_v12 = vadd.f32 1e-30, %v1458_v15 }
 0x2f2   :  { %2789 = vrsqrt.f32 %v1383_v19 }
 0x2f3   :  { %2791 = vrsqrt.f32 %v1384_v56 }
 0x2f4   :  { %2793 = vrsqrt.f32 %v1459_v36 }
 0x2f5   :  { %2795 = vrsqrt.f32 %v1460_v12 }
 0x2fc   :  { %v2790_v18 = vpop.eup %2789 }
 0x2fd   :  { %v2792_v37 = vpop.eup %2791  ;;  %v1387_v34 = vmul.f32 %v2790_v18, %v1381_v22 }
 0x2fe   :  { %v2794_v44 = vpop.eup %2793  ;;  %v1388_v28 = vmul.f32 %v2792_v37, %v1382_v33 }
 0x2ff   :  { %v2796_v46 = vpop.eup %2795  ;;  %v1391_v23 = vadd.f32 %v1389_v21, %v1387_v34  ;;  %v1463_v13 = vmul.f32 %v2794_v44, %v1457_v32 }
 0x300   :  { %v1392_v10 = vadd.f32 %v1390_v57, %v1388_v28  ;;  %v1464_v38 = vmul.f32 %v2796_v46, %v1458_v15 }
 0x301   :  { %v1393_v63 = vadd.f32 1e-30, %v1391_v23  ;;  %v1467_v25 = vadd.f32 %v1465_v4, %v1463_v13 }
 0x302   :  { %v1394_v3 = vadd.f32 1e-30, %v1392_v10  ;;  %v1468_v2 = vadd.f32 %v1466_v5, %v1464_v38 }
 0x303   :  { %2797 = vrcp.f32 %v1393_v63  ;;  %v1469_v43 = vadd.f32 1e-30, %v1467_v25 }
 0x304   :  { %2799 = vrcp.f32 %v1394_v3  ;;  %v1470_v11 = vadd.f32 1e-30, %v1468_v2 }
 0x305   :  { %2801 = vrcp.f32 %v1469_v43 }
 0x306   :  { %2803 = vrcp.f32 %v1470_v11 }
 0x30d   :  { %v2798_v39 = vpop.eup %2797 }
 0x30e   :  { %v2800_v1 = vpop.eup %2799  ;;  %v1401_v14 = vmul.f32 %v2798_v39, %v1393_v63 }
 0x30f   :  { %v2802_v40 = vpop.eup %2801  ;;  %v1402_v27 = vmul.f32 %v2800_v1, %v1394_v3 }
 0x310   :  { %v2804_v0 = vpop.eup %2803  ;;  %v1403_v53 = vsub.f32 2.0, %v1401_v14  ;;  %v1477_v30 = vmul.f32 %v2802_v40, %v1469_v43 }
 0x311   :  { %v1404_v20 = vsub.f32 2.0, %v1402_v27  ;;  %v1478_v49 = vmul.f32 %v2804_v0, %v1470_v11 }
 0x312   :  { %v1405_v41 = vmul.f32 %v2798_v39, %v1403_v53  ;;  %v1479_v6 = vsub.f32 2.0, %v1477_v30 }
 0x313   :  { %v1406_v48 = vmul.f32 %v2800_v1, %v1404_v20  ;;  %v1480_v22 = vsub.f32 2.0, %v1478_v49 }
 0x314   :  { %v1409_v32 = vmul.f32 %v1407_v24, %v1405_v41  ;;  %v1481_v33 = vmul.f32 %v2802_v40, %v1479_v6 }
 0x315   :  { %v1410_v15 = vmul.f32 %v1408_v9, %v1406_v48  ;;  %v1482_v19 = vmul.f32 %v2804_v0, %v1480_v22 }
 0x316   :  { %v1411_v36 = vmul.f32 %v1409_v32, %v1409_v32  ;;  %v1419_v56 = vmul.f32 %v1409_v32, %v4439_v16  ;;  %v1485_v12 = vmul.f32 %v1483_v61, %v1481_v33 }
 0x317   :  { %v1412_v21 = vmul.f32 %v1410_v15, %v1410_v15  ;;  %v1420_v18 = vmul.f32 %v1410_v15, %v4447_v62  ;;  %v1486_v57 = vmul.f32 %v1484_v47, %v1482_v19 }
 0x318   :  { %v1413_v37 = vadd.f32 1.0, %v1411_v36  ;;  %v4472_v34 = vsub.f32 %v4380_v8, %v1419_v56  ;;  %v4475_v4 = vadd.f32 %v1419_v56, %v4309_v7  ;;  %v1487_v44 = vmul.f32 %v1485_v12, %v1485_v12 }
 0x319   :  { %v1414_v24 = vadd.f32 1.0, %v1412_v21  ;;  %v4478_v9 = vsub.f32 %v4383_v35, %v1420_v18  ;;  %v4481_v28 = vadd.f32 %v1420_v18, %v4315_v54  ;;  %v1488_v16 = vmul.f32 %v1486_v57, %v1486_v57 }
 0x31a   :  { %2805 = vrsqrt.f32 %v1413_v37  ;;  %v1489_v61 = vadd.f32 1.0, %v1487_v44  ;;  %v4484_v62 = vmul.f32 %v1485_v12, %v4437_v31  ;;  %v4487_v8 = vmul.f32 %v1486_v57, %v4445_v45 }
 0x31b   :  { %2807 = vrsqrt.f32 %v1414_v24  ;;  %v1490_v7 = vadd.f32 1.0, %v1488_v16 }
 0x31c   :  { %v4491_v47 = vsub.f32 %v4395_v52, %v4484_v62  ;;  %v4495_v35 = vsub.f32 %v4402_v51, %v4487_v8  ;;  %2809 = vrsqrt.f32 %v1489_v61 }
 0x31d   :  { %2811 = vrsqrt.f32 %v1490_v7 }
 0x31e   :  { %v4499_v31 = vsub.f32 %v4475_v4, %v4491_v47  ;;  %v4503_v45 = vsub.f32 %v4481_v28, %v4495_v35 }
 0x320   :  { %vm1547_vm0 = vcmp.ge.f32.partialorder %v4499_v31, 0.0  ;;  %vm1548_vm1 = vcmp.ge.f32.partialorder %v4503_v45, 0.0 }
 0x324   :  { %v2806_v54 = vpop.eup %2805 }
 0x325   :  { %v2808_v5 = vpop.eup %2807  ;;  %v1417_v46 = vmul.f32 %v2806_v54, %v1409_v32  ;;  %v1425_v52 = vmul.f32 %v2806_v54, %v4435_v17  ;;  %v1433_v23 = vmul.f32 %v2806_v54, %v4371_v59  ;;  %v1437_v13 = vmul.f32 0.0, %v2806_v54 }
 0x326   :  { %v1418_v51 = vmul.f32 %v2808_v5, %v1410_v15  ;;  %v1426_v10 = vmul.f32 %v2808_v5, %v4443_v55  ;;  %v1434_v38 = vmul.f32 %v2808_v5, %v4373_v42  ;;  %v1438_v63 = vmul.f32 0.0, %v2808_v5  ;;  %v2810_v25 = vpop.eup %2809 }
 0x327   :  { %v1427_v3 = vmul.f32 %v1417_v46, %v4371_v59  ;;  %v1431_v2 = vmul.f32 %v1417_v46, %v4435_v17  ;;  %v1439_v43 = vmul.f32 %v1417_v46, %v4441_v60  ;;  %v1443_v11 = vmul.f32 0.0, %v1417_v46  ;;  %v2812_v39 = vpop.eup %2811 }
 0x328   :  { %v1428_v1 = vmul.f32 %v1418_v51, %v4373_v42  ;;  %v1432_v14 = vmul.f32 %v1418_v51, %v4443_v55  ;;  %v1440_v40 = vmul.f32 %v1418_v51, %v4449_v26  ;;  %v1444_v27 = vmul.f32 0.0, %v1418_v51 }
 0x329   :  { %v1429_v0 = vsub.f32 %v1425_v52, %v1427_v3  ;;  %v1435_v53 = vadd.f32 %v1433_v23, %v1431_v2  ;;  %v1441_v30 = vsub.f32 %v1437_v13, %v1439_v43  ;;  %v1445_v20 = vmul.f32 %v2806_v54, %v4441_v60 }
 0x32a   :  { %v1430_v49 = vsub.f32 %v1426_v10, %v1428_v1  ;;  %v1436_v59 = vadd.f32 %v1434_v38, %v1432_v14  ;;  %v1442_v41 = vsub.f32 %v1438_v63, %v1440_v40  ;;  %v1446_v17 = vmul.f32 %v2808_v5, %v4449_v26 }
 0x32b   :  { %v1447_v6 = vadd.f32 %v1445_v20, %v1443_v11  ;;  %v1493_v48 = vmul.f32 %v2810_v25, %v1485_v12  ;;  %v1494_v22 = vmul.f32 %v2812_v39, %v1486_v57  ;;  %v1501_v32 = vmul.f32 %v2810_v25, %v1429_v0 }
 0x32c   :  { %v1448_v42 = vadd.f32 %v1446_v17, %v1444_v27  ;;  %v1502_v33 = vmul.f32 %v2812_v39, %v1430_v49  ;;  %v1509_v55 = vmul.f32 %v2810_v25, %v1441_v30  ;;  %v1510_v15 = vmul.f32 %v2812_v39, %v1442_v41 }
 0x32d   :  { %v1503_v19 = vmul.f32 %v1493_v48, %v1441_v30  ;;  %v1504_v36 = vmul.f32 %v1494_v22, %v1442_v41  ;;  %v1507_v56 = vmul.f32 %v1493_v48, %v1429_v0  ;;  %v1508_v21 = vmul.f32 %v1494_v22, %v1430_v49 }
 0x32e   :  { %v1513_v18 = vmul.f32 %v2810_v25, %v1435_v53  ;;  %v1514_v37 = vmul.f32 %v2812_v39, %v1436_v59  ;;  %v1515_v60 = vmul.f32 %v1493_v48, %v1447_v6  ;;  %v1516_v44 = vmul.f32 %v1494_v22, %v1448_v42 }
 0x32f   :  { %v4519_v24 = vsub.f32 %v1501_v32, %v1503_v19  ;;  %v4521_v16 = vsub.f32 %v1502_v33, %v1504_v36  ;;  %v4523_v26 = vadd.f32 %v1509_v55, %v1507_v56  ;;  %v4525_v12 = vadd.f32 %v1510_v15, %v1508_v21 }
 0x330   :  { %v1517_v57 = vsub.f32 %v1513_v18, %v1515_v60  ;;  %v1518_v61 = vsub.f32 %v1514_v37, %v1516_v44  ;;  %v1519_v7 = vmul.f32 %v1493_v48, %v1435_v53  ;;  %v1520_v54 = vmul.f32 %v1494_v22, %v1436_v59 }
 0x331   :  { %v1521_v5 = vmul.f32 %v2810_v25, %v1447_v6  ;;  %v1522_v46 = vmul.f32 %v2812_v39, %v1448_v42  ;;  %v1549_v52 = vsel %vm1547_vm0, 1.0, %v2993_v58  ;;  %v1550_v23 = vsel %vm1548_vm1, 1.0, %v2993_v58 }
 0x332   :  { %v1527_v13 = vmul.f32 2.0, %v1517_v57  ;;  %v1528_v51 = vmul.f32 2.0, %v1518_v61  ;;  %v1529_v10 = vmul.f32 %v4499_v31, %v4499_v31  ;;  %v1530_v38 = vmul.f32 %v4503_v45, %v4503_v45 }
 0x333   :  { %v4537_v63 = vadd.f32 %v1521_v5, %v1519_v7  ;;  %v4539_v25 = vadd.f32 %v1522_v46, %v1520_v54  ;;  %v1541_v27 = vand.u32 2147483647, %v4499_v31  ;;  %v1542_v53 = vand.u32 2147483647, %v4503_v45 }
 0x334   :  { %v1531_v3 = vmul.f32 %v1527_v13, %v1527_v13  ;;  %v1532_v2 = vmul.f32 %v1528_v51, %v1528_v51  ;;  %v1559_v43 = vmul.f32 %v1549_v52, %v1527_v13  ;;  %v1560_v11 = vmul.f32 %v1550_v23, %v1528_v51 }
 0x335   :  { %v4545_v45 = vadd.f32 %v4484_v62, %v4398_v50  ;;  %v4549_v18 = vadd.f32 %v4487_v8, %v4405_v29 }
 0x336   :  { %v1533_v39 = vadd.f32 %v1531_v3, %v1529_v10  ;;  %v1534_v1 = vadd.f32 %v1532_v2, %v1530_v38 }
 0x338   :  { %v1535_v14 = vadd.f32 1e-30, %v1533_v39  ;;  %v1536_v40 = vadd.f32 1e-30, %v1534_v1 }
 0x33a   :  { %2813 = vrsqrt.f32 %v1535_v14 }
 0x33b   :  { %2815 = vrsqrt.f32 %v1536_v40 }
 0x344   :  { %v2814_v0 = vpop.eup %2813 }
 0x345   :  { %v2816_v30 = vpop.eup %2815  ;;  %v1539_v20 = vmul.f32 %v2814_v0, %v1533_v39 }
 0x346   :  { %v1540_v49 = vmul.f32 %v2816_v30, %v1534_v1 }
 0x347   :  { %v1543_v59 = vadd.f32 %v1541_v27, %v1539_v20 }
 0x348   :  { %v1544_v41 = vadd.f32 %v1542_v53, %v1540_v49 }
 0x349   :  { %v1545_v17 = vadd.f32 1e-30, %v1543_v59 }
 0x34a   :  { %v1546_v6 = vadd.f32 1e-30, %v1544_v41 }
 0x34b   :  { %2817 = vrcp.f32 %v1545_v17 }
 0x34c   :  { %2819 = vrcp.f32 %v1546_v6 }
 0x355   :  { %v2818_v48 = vpop.eup %2817 }
 0x356   :  { %v2820_v22 = vpop.eup %2819  ;;  %v1553_v32 = vmul.f32 %v2818_v48, %v1545_v17 }
 0x357   :  { %v1554_v42 = vmul.f32 %v2820_v22, %v1546_v6 }
 0x358   :  { %v1555_v33 = vsub.f32 2.0, %v1553_v32 }
 0x359   :  { %v1556_v55 = vsub.f32 2.0, %v1554_v42 }
 0x35a   :  { %v1557_v15 = vmul.f32 %v2818_v48, %v1555_v33 }
 0x35b   :  { %v1558_v31 = vmul.f32 %v2820_v22, %v1556_v55 }
 0x35c   :  { %v1561_v19 = vmul.f32 %v1559_v43, %v1557_v15 }
 0x35d   :  { %v1562_v36 = vmul.f32 %v1560_v11, %v1558_v31 }
 0x35e   :  { %v1563_v56 = vmul.f32 %v1561_v19, %v1561_v19  ;;  %v1571_v21 = vmul.f32 %v1561_v19, %v1517_v57 }
 0x35f   :  { %v1564_v37 = vmul.f32 %v1562_v36, %v1562_v36  ;;  %v1572_v60 = vmul.f32 %v1562_v36, %v1518_v61 }
 0x360   :  { %v1565_v44 = vadd.f32 1.0, %v1563_v56  ;;  %v4552_v7 = vadd.f32 %v1571_v21, %v4475_v4  ;;  %v4566_v62 = vsub.f32 %v4491_v47, %v1571_v21 }
 0x361   :  { %v1566_v54 = vadd.f32 1.0, %v1564_v37  ;;  %v4555_v5 = vadd.f32 %v1572_v60, %v4481_v28  ;;  %v4569_v4 = vsub.f32 %v4495_v35, %v1572_v60 }
 0x362   :  { %2821 = vrsqrt.f32 %v1565_v44  ;;  %v4559_v50 = vsub.f32 %v4552_v7, %v4545_v45  ;;  %v4573_v28 = vsub.f32 %v4566_v62, %v4472_v34 }
 0x363   :  { %2823 = vrsqrt.f32 %v1566_v54  ;;  %v4563_v29 = vsub.f32 %v4555_v5, %v4549_v18  ;;  %v4580_v57 = vsub.f32 %v4569_v4, %v4478_v9 }
 0x364   :  { %vm1619_vm2 = vcmp.ge.f32.partialorder %v4559_v50, 0.0  ;;  %v1601_v8 = vmul.f32 %v4559_v50, %v4559_v50  ;;  %v1677_v35 = vmul.f32 %v4573_v28, %v4573_v28  ;;  %vm1695_vm4 = vcmp.ge.f32.partialorder %v4573_v28, 0.0 }
 0x365   :  { %vm1620_vm3 = vcmp.ge.f32.partialorder %v4563_v29, 0.0  ;;  %v1621_v47 = vsel %vm1619_vm2, 1.0, %v2993_v58  ;;  %vm1696_vm5 = vcmp.ge.f32.partialorder %v4580_v57, 0.0  ;;  %v1697_v27 = vsel %vm1695_vm4, 1.0, %v2993_v58 }
 0x366   :  { %v1622_v59 = vsel %vm1620_vm3, 1.0, %v2993_v58  ;;  %v1698_v17 = vsel %vm1696_vm5, 1.0, %v2993_v58  ;;  %v1602_v48 = vmul.f32 %v4563_v29, %v4563_v29  ;;  %v1678_v32 = vmul.f32 %v4580_v57, %v4580_v57 }
 0x36c   :  { %v2822_v61 = vpop.eup %2821 }
 0x36d   :  { %v2824_v46 = vpop.eup %2823  ;;  %v1569_v52 = vmul.f32 %v2822_v61, %v1561_v19  ;;  %v1577_v23 = vmul.f32 %v2822_v61, %v4519_v24  ;;  %v1585_v13 = vmul.f32 0.0, %v2822_v61  ;;  %v1593_v51 = vmul.f32 %v2822_v61, %v4537_v63 }
 0x36e   :  { %v1570_v10 = vmul.f32 %v2824_v46, %v1562_v36  ;;  %v1578_v38 = vmul.f32 %v2824_v46, %v4521_v16  ;;  %v1586_v3 = vmul.f32 0.0, %v2824_v46  ;;  %v1594_v2 = vmul.f32 %v2824_v46, %v4539_v25 }
 0x36f   :  { %v1579_v43 = vmul.f32 0.0, %v1569_v52  ;;  %v1583_v11 = vmul.f32 %v1569_v52, %v4519_v24  ;;  %v1589_v39 = vmul.f32 %v1569_v52, %v4537_v63 }
 0x370   :  { %v1580_v1 = vmul.f32 0.0, %v1570_v10  ;;  %v1584_v14 = vmul.f32 %v1570_v10, %v4521_v16  ;;  %v1590_v40 = vmul.f32 %v1570_v10, %v4539_v25 }
 0x371   :  { %v4599_v0 = vsub.f32 %v1577_v23, %v1579_v43  ;;  %v4601_v53 = vadd.f32 %v1585_v13, %v1583_v11  ;;  %v4603_v30 = vsub.f32 %v1585_v13, %v1589_v39  ;;  %v4605_v24 = vadd.f32 %v1593_v51, %v1579_v43 }
 0x372   :  { %v4607_v63 = vsub.f32 %v1578_v38, %v1580_v1  ;;  %v4609_v20 = vadd.f32 %v1586_v3, %v1584_v14  ;;  %v4611_v49 = vsub.f32 %v1586_v3, %v1590_v40  ;;  %v4613_v16 = vadd.f32 %v1594_v2, %v1580_v1 }
 0x373   :  { %v1599_v25 = vmul.f32 2.0, %v4605_v24  ;;  %v1675_v41 = vmul.f32 2.0, %v4599_v0  ;;  %v1614_v13 = vand.u32 2147483647, %v4563_v29  ;;  %v1690_v3 = vand.u32 2147483647, %v4580_v57 }
 0x374   :  { %v1600_v6 = vmul.f32 2.0, %v4613_v16  ;;  %v1676_v22 = vmul.f32 2.0, %v4607_v63 }
 0x375   :  { %v1603_v42 = vmul.f32 %v1599_v25, %v1599_v25  ;;  %v1631_v33 = vmul.f32 %v1621_v47, %v1599_v25  ;;  %v1679_v55 = vmul.f32 %v1675_v41, %v1675_v41  ;;  %v1707_v15 = vmul.f32 %v1697_v27, %v1675_v41 }
 0x376   :  { %v1604_v31 = vmul.f32 %v1600_v6, %v1600_v6  ;;  %v1632_v19 = vmul.f32 %v1622_v59, %v1600_v6  ;;  %v1680_v36 = vmul.f32 %v1676_v22, %v1676_v22  ;;  %v1708_v56 = vmul.f32 %v1698_v17, %v1676_v22 }
 0x377   :  { %v1605_v21 = vadd.f32 %v1603_v42, %v1601_v8  ;;  %v1681_v37 = vadd.f32 %v1679_v55, %v1677_v35  ;;  %v1613_v47 = vand.u32 2147483647, %v4559_v50  ;;  %v1689_v8 = vand.u32 2147483647, %v4573_v28 }
 0x378   :  { %v1606_v60 = vadd.f32 %v1604_v31, %v1602_v48  ;;  %v1682_v44 = vadd.f32 %v1680_v36, %v1678_v32 }
 0x379   :  { %v1607_v54 = vadd.f32 1e-30, %v1605_v21  ;;  %v1683_v61 = vadd.f32 1e-30, %v1681_v37 }
 0x37a   :  { %v1608_v46 = vadd.f32 1e-30, %v1606_v60  ;;  %v1684_v52 = vadd.f32 1e-30, %v1682_v44 }
 0x37b   :  { %2825 = vrsqrt.f32 %v1607_v54 }
 0x37c   :  { %2827 = vrsqrt.f32 %v1608_v46 }
 0x37d   :  { %2829 = vrsqrt.f32 %v1683_v61 }
 0x37e   :  { %2831 = vrsqrt.f32 %v1684_v52 }
 0x385   :  { %v2826_v23 = vpop.eup %2825 }
 0x386   :  { %v2828_v51 = vpop.eup %2827  ;;  %v1611_v10 = vmul.f32 %v2826_v23, %v1605_v21 }
 0x387   :  { %v2830_v35 = vpop.eup %2829  ;;  %v1612_v38 = vmul.f32 %v2828_v51, %v1606_v60 }
 0x388   :  { %v2832_v2 = vpop.eup %2831  ;;  %v1615_v43 = vadd.f32 %v1613_v47, %v1611_v10  ;;  %v1687_v11 = vmul.f32 %v2830_v35, %v1681_v37 }
 0x389   :  { %v1616_v39 = vadd.f32 %v1614_v13, %v1612_v38  ;;  %v1688_v1 = vmul.f32 %v2832_v2, %v1682_v44 }
 0x38a   :  { %v1617_v14 = vadd.f32 1e-30, %v1615_v43  ;;  %v1691_v40 = vadd.f32 %v1689_v8, %v1687_v11 }
 0x38b   :  { %v1618_v27 = vadd.f32 1e-30, %v1616_v39  ;;  %v1692_v50 = vadd.f32 %v1690_v3, %v1688_v1 }
 0x38c   :  { %2833 = vrcp.f32 %v1617_v14  ;;  %v1693_v25 = vadd.f32 1e-30, %v1691_v40 }
 0x38d   :  { %2835 = vrcp.f32 %v1618_v27  ;;  %v1694_v29 = vadd.f32 1e-30, %v1692_v50 }
 0x38e   :  { %2837 = vrcp.f32 %v1693_v25 }
 0x38f   :  { %2839 = vrcp.f32 %v1694_v29 }
 0x396   :  { %v2834_v28 = vpop.eup %2833 }
 0x397   :  { %v2836_v59 = vpop.eup %2835  ;;  %v1625_v41 = vmul.f32 %v2834_v28, %v1617_v14 }
 0x398   :  { %v2838_v17 = vpop.eup %2837  ;;  %v1626_v57 = vmul.f32 %v2836_v59, %v1618_v27 }
 0x399   :  { %v2840_v6 = vpop.eup %2839  ;;  %v1627_v48 = vsub.f32 2.0, %v1625_v41  ;;  %v1701_v22 = vmul.f32 %v2838_v17, %v1693_v25 }
 0x39a   :  { %v1628_v32 = vsub.f32 2.0, %v1626_v57  ;;  %v1702_v42 = vmul.f32 %v2840_v6, %v1694_v29 }
 0x39b   :  { %v1629_v55 = vmul.f32 %v2834_v28, %v1627_v48  ;;  %v1703_v31 = vsub.f32 2.0, %v1701_v22 }
 0x39c   :  { %v1630_v36 = vmul.f32 %v2836_v59, %v1628_v32  ;;  %v1704_v21 = vsub.f32 2.0, %v1702_v42 }
 0x39d   :  { %v1633_v37 = vmul.f32 %v1631_v33, %v1629_v55  ;;  %v1705_v60 = vmul.f32 %v2838_v17, %v1703_v31 }
 0x39e   :  { %v1634_v44 = vmul.f32 %v1632_v19, %v1630_v36  ;;  %v1706_v54 = vmul.f32 %v2840_v6, %v1704_v21 }
 0x39f   :  { %v1635_v61 = vmul.f32 %v1633_v37, %v1633_v37  ;;  %v1643_v46 = vmul.f32 %v1633_v37, %v4605_v24  ;;  %v1709_v52 = vmul.f32 %v1707_v15, %v1705_v60 }
 0x3a0   :  { %v1636_v47 = vmul.f32 %v1634_v44, %v1634_v44  ;;  %v1644_v23 = vmul.f32 %v1634_v44, %v4613_v16  ;;  %v1710_v13 = vmul.f32 %v1708_v56, %v1706_v54 }
 0x3a1   :  { %v1637_v51 = vadd.f32 1.0, %v1635_v61  ;;  %v4636_v10 = vsub.f32 %v4545_v45, %v1643_v46  ;;  %v4639_v8 = vadd.f32 %v1643_v46, %v4552_v7  ;;  %v1711_v35 = vmul.f32 %v1709_v52, %v1709_v52 }
 0x3a2   :  { %v1638_v33 = vadd.f32 1.0, %v1636_v47  ;;  %v4642_v19 = vsub.f32 %v4549_v18, %v1644_v23  ;;  %v4645_v38 = vadd.f32 %v1644_v23, %v4555_v5  ;;  %v1712_v24 = vmul.f32 %v1710_v13, %v1710_v13 }
 0x3a3   :  { %2841 = vrsqrt.f32 %v1637_v51  ;;  %v1713_v15 = vadd.f32 1.0, %v1711_v35  ;;  %v4648_v16 = vmul.f32 %v1709_v52, %v4599_v0  ;;  %v4651_v45 = vmul.f32 %v1710_v13, %v4607_v63 }
 0x3a4   :  { %2843 = vrsqrt.f32 %v1638_v33  ;;  %v1714_v7 = vadd.f32 1.0, %v1712_v24 }
 0x3a5   :  { %v4655_v56 = vsub.f32 %v4472_v34, %v4648_v16  ;;  %v4659_v18 = vsub.f32 %v4478_v9, %v4651_v45  ;;  %2845 = vrsqrt.f32 %v1713_v15 }
 0x3a6   :  { %2847 = vrsqrt.f32 %v1714_v7 }
 0x3a7   :  { %v4663_v5 = vsub.f32 %v4636_v10, %v4655_v56  ;;  %v4667_v0 = vsub.f32 %v4642_v19, %v4659_v18 }
 0x3a9   :  { %vm1771_vm6 = vcmp.ge.f32.partialorder %v4663_v5, 0.0  ;;  %vm1772_vm7 = vcmp.ge.f32.partialorder %v4667_v0, 0.0  ;;  %v4673_v63 = vmul.f32 %v4663_v5, %v4663_v5  ;;  %v4677_v9 = vmul.f32 %v4667_v0, %v4667_v0 }
 0x3aa   :  { %v1773_v3 = vsel %vm1771_vm6, 1.0, %v2993_v58  ;;  %v1774_v2 = vsel %vm1772_vm7, 1.0, %v2993_v58 }
 0x3ad   :  { %v2842_v34 = vpop.eup %2841 }
 0x3ae   :  { %v2844_v43 = vpop.eup %2843  ;;  %v1641_v11 = vmul.f32 %v2842_v34, %v1633_v37  ;;  %v1649_v39 = vmul.f32 %v2842_v34, %v4523_v26  ;;  %v1657_v1 = vmul.f32 %v2842_v34, %v4601_v53  ;;  %v1661_v14 = vmul.f32 %v2842_v34, %v4603_v30 }
 0x3af   :  { %v1642_v40 = vmul.f32 %v2844_v43, %v1634_v44  ;;  %v1650_v27 = vmul.f32 %v2844_v43, %v4525_v12  ;;  %v1658_v50 = vmul.f32 %v2844_v43, %v4609_v20  ;;  %v1662_v25 = vmul.f32 %v2844_v43, %v4611_v49  ;;  %v2846_v29 = vpop.eup %2845 }
 0x3b0   :  { %v1651_v28 = vmul.f32 %v1641_v11, %v4601_v53  ;;  %v1655_v59 = vmul.f32 %v1641_v11, %v4523_v26  ;;  %v1663_v41 = vmul.f32 0.0, %v1641_v11  ;;  %v1667_v17 = vmul.f32 %v1641_v11, %v4603_v30  ;;  %v2848_v57 = vpop.eup %2847 }
 0x3b1   :  { %v1652_v6 = vmul.f32 %v1642_v40, %v4609_v20  ;;  %v1656_v48 = vmul.f32 %v1642_v40, %v4525_v12  ;;  %v1664_v22 = vmul.f32 0.0, %v1642_v40  ;;  %v1668_v32 = vmul.f32 %v1642_v40, %v4611_v49 }
 0x3b2   :  { %v1653_v42 = vsub.f32 %v1649_v39, %v1651_v28  ;;  %v1659_v55 = vadd.f32 %v1657_v1, %v1655_v59  ;;  %v1665_v31 = vsub.f32 %v1661_v14, %v1663_v41  ;;  %v1669_v36 = vmul.f32 0.0, %v2842_v34 }
 0x3b3   :  { %v1654_v21 = vsub.f32 %v1650_v27, %v1652_v6  ;;  %v1660_v37 = vadd.f32 %v1658_v50, %v1656_v48  ;;  %v1666_v53 = vsub.f32 %v1662_v25, %v1664_v22  ;;  %v1670_v60 = vmul.f32 0.0, %v2844_v43 }
 0x3b4   :  { %v1671_v26 = vadd.f32 %v1669_v36, %v1667_v17  ;;  %v1717_v44 = vmul.f32 %v2846_v29, %v1709_v52  ;;  %v1718_v54 = vmul.f32 %v2848_v57, %v1710_v13  ;;  %v1725_v30 = vmul.f32 %v2846_v29, %v1653_v42 }
 0x3b5   :  { %v1672_v61 = vadd.f32 %v1670_v60, %v1668_v32  ;;  %v1726_v46 = vmul.f32 %v2848_v57, %v1654_v21  ;;  %v1733_v20 = vmul.f32 %v2846_v29, %v1665_v31  ;;  %v1734_v47 = vmul.f32 %v2848_v57, %v1666_v53 }
 0x3b6   :  { %v1727_v12 = vmul.f32 %v1717_v44, %v1665_v31  ;;  %v1728_v23 = vmul.f32 %v1718_v54, %v1666_v53  ;;  %v1731_v51 = vmul.f32 %v1717_v44, %v1653_v42  ;;  %v1732_v49 = vmul.f32 %v1718_v54, %v1654_v21 }
 0x3b7   :  { %v1737_v35 = vmul.f32 %v2846_v29, %v1659_v55  ;;  %v1738_v33 = vmul.f32 %v2848_v57, %v1660_v37  ;;  %v1739_v24 = vmul.f32 %v1717_v44, %v1671_v26  ;;  %v1740_v15 = vmul.f32 %v1718_v54, %v1672_v61 }
 0x3b8   :  { %v1729_v7 = vsub.f32 %v1725_v30, %v1727_v12  ;;  %v1730_v34 = vsub.f32 %v1726_v46, %v1728_v23  ;;  %v4693_v11 = vadd.f32 %v1733_v20, %v1731_v51  ;;  %v4695_v43 = vadd.f32 %v1734_v47, %v1732_v49 }
 0x3b9   :  { %v4697_v52 = vsub.f32 %v1737_v35, %v1739_v24  ;;  %v4699_v13 = vsub.f32 %v1738_v33, %v1740_v15  ;;  %v1743_v39 = vmul.f32 %v1717_v44, %v1659_v55  ;;  %v1744_v1 = vmul.f32 %v1718_v54, %v1660_v37 }
 0x3ba   :  { %v1745_v14 = vmul.f32 %v2846_v29, %v1671_v26  ;;  %v1746_v40 = vmul.f32 %v2848_v57, %v1672_v61  ;;  %v1751_v27 = vmul.f32 2.0, %v1729_v7  ;;  %v1752_v50 = vmul.f32 2.0, %v1730_v34 }
 0x3bb   :  { %v1765_v29 = vand.u32 2147483647, %v4663_v5  ;;  %v1766_v55 = vand.u32 2147483647, %v4667_v0  ;;  %v4725_v15 = vadd.f32 %v4648_v16, %v4566_v62 }
 0x3bc   :  { %v4701_v25 = vadd.f32 %v1745_v14, %v1743_v39  ;;  %v4703_v28 = vadd.f32 %v1746_v40, %v1744_v1  ;;  %v1755_v59 = vmul.f32 %v1751_v27, %v1751_v27  ;;  %v1756_v41 = vmul.f32 %v1752_v50, %v1752_v50 }
 0x3bd   :  { %v1783_v17 = vmul.f32 %v1773_v3, %v1751_v27  ;;  %v1784_v6 = vmul.f32 %v1774_v2, %v1752_v50 }
 0x3be   :  { %v1757_v48 = vadd.f32 %v1755_v59, %v4673_v63  ;;  %v1758_v22 = vadd.f32 %v1756_v41, %v4677_v9 }
 0x3c0   :  { %v1759_v32 = vadd.f32 1e-30, %v1757_v48  ;;  %v1760_v42 = vadd.f32 1e-30, %v1758_v22 }
 0x3c2   :  { %2849 = vrsqrt.f32 %v1759_v32 }
 0x3c3   :  { %2851 = vrsqrt.f32 %v1760_v42 }
 0x3cc   :  { %v2850_v57 = vpop.eup %2849 }
 0x3cd   :  { %v2852_v31 = vpop.eup %2851  ;;  %v1763_v36 = vmul.f32 %v2850_v57, %v1757_v48 }
 0x3ce   :  { %v1764_v21 = vmul.f32 %v2852_v31, %v1758_v22 }
 0x3cf   :  { %v1767_v37 = vadd.f32 %v1765_v29, %v1763_v36 }
 0x3d0   :  { %v1768_v53 = vadd.f32 %v1766_v55, %v1764_v21 }
 0x3d1   :  { %v1769_v3 = vadd.f32 1e-30, %v1767_v37 }
 0x3d2   :  { %v1770_v2 = vadd.f32 1e-30, %v1768_v53 }
 0x3d3   :  { %2853 = vrcp.f32 %v1769_v3 }
 0x3d4   :  { %2855 = vrcp.f32 %v1770_v2 }
 0x3dd   :  { %v2854_v63 = vpop.eup %2853 }
 0x3de   :  { %v2856_v9 = vpop.eup %2855  ;;  %v1777_v60 = vmul.f32 %v2854_v63, %v1769_v3 }
 0x3df   :  { %v1778_v26 = vmul.f32 %v2856_v9, %v1770_v2 }
 0x3e0   :  { %v1779_v44 = vsub.f32 2.0, %v1777_v60 }
 0x3e1   :  { %v1780_v54 = vsub.f32 2.0, %v1778_v26 }
 0x3e2   :  { %v1781_v30 = vmul.f32 %v2854_v63, %v1779_v44 }
 0x3e3   :  { %v1782_v5 = vmul.f32 %v2856_v9, %v1780_v54 }
 0x3e4   :  { %v1785_v61 = vmul.f32 %v1783_v17, %v1781_v30 }
 0x3e5   :  { %v1786_v46 = vmul.f32 %v1784_v6, %v1782_v5 }
 0x3e6   :  { %v1787_v0 = vmul.f32 %v1785_v61, %v1785_v61  ;;  %v1795_v20 = vmul.f32 %v1785_v61, %v1729_v7 }
 0x3e7   :  { %v1788_v47 = vmul.f32 %v1786_v46, %v1786_v46  ;;  %v1796_v12 = vmul.f32 %v1786_v46, %v1730_v34 }
 0x3e8   :  { %v1789_v23 = vadd.f32 1.0, %v1787_v0  ;;  %v4710_v51 = vsub.f32 %v4655_v56, %v1795_v20  ;;  %v4728_v56 = vadd.f32 %v1795_v20, %v4636_v10 }
 0x3e9   :  { %v1790_v49 = vadd.f32 1.0, %v1788_v47  ;;  %v4713_v35 = vsub.f32 %v4659_v18, %v1796_v12  ;;  %v4732_v18 = vadd.f32 %v4651_v45, %v4569_v4  ;;  %v4735_v7 = vadd.f32 %v1796_v12, %v4642_v19 }
 0x3ea   :  { %2857 = vrsqrt.f32 %v1789_v23  ;;  %v4717_v33 = vsub.f32 %v4639_v8, %v4710_v51  ;;  %v4739_v34 = vsub.f32 %v4728_v56, %v4725_v15 }
 0x3eb   :  { %2859 = vrsqrt.f32 %v1790_v49  ;;  %v4721_v24 = vsub.f32 %v4645_v38, %v4713_v35  ;;  %v4746_v10 = vsub.f32 %v4735_v7, %v4732_v18 }
 0x3ec   :  { %vm1843_vm8 = vcmp.ge.f32.partialorder %v4717_v33, 0.0  ;;  %v1825_v62 = vmul.f32 %v4717_v33, %v4717_v33  ;;  %v1901_v19 = vmul.f32 %v4739_v34, %v4739_v34  ;;  %vm1919_vm10 = vcmp.ge.f32.partialorder %v4739_v34, 0.0 }
 0x3ed   :  { %vm1844_vm9 = vcmp.ge.f32.partialorder %v4721_v24, 0.0  ;;  %v1845_v4 = vsel %vm1843_vm8, 1.0, %v2993_v58  ;;  %vm1920_vm11 = vcmp.ge.f32.partialorder %v4746_v10, 0.0  ;;  %v1921_v29 = vsel %vm1919_vm10, 1.0, %v2993_v58 }
 0x3ee   :  { %v1846_v37 = vsel %vm1844_vm9, 1.0, %v2993_v58  ;;  %v1922_v3 = vsel %vm1920_vm11, 1.0, %v2993_v58  ;;  %v1826_v63 = vmul.f32 %v4721_v24, %v4721_v24  ;;  %v1902_v60 = vmul.f32 %v4746_v10, %v4746_v10 }
 0x3f4   :  { %v2858_v16 = vpop.eup %2857 }
 0x3f5   :  { %v2860_v45 = vpop.eup %2859  ;;  %v1793_v39 = vmul.f32 %v2858_v16, %v1785_v61  ;;  %v1801_v1 = vmul.f32 0.0, %v2858_v16  ;;  %v1809_v14 = vmul.f32 %v2858_v16, %v4693_v11  ;;  %v1813_v40 = vmul.f32 %v2858_v16, %v4697_v52 }
 0x3f6   :  { %v1794_v27 = vmul.f32 %v2860_v45, %v1786_v46  ;;  %v1802_v50 = vmul.f32 0.0, %v2860_v45  ;;  %v1810_v59 = vmul.f32 %v2860_v45, %v4695_v43  ;;  %v1814_v41 = vmul.f32 %v2860_v45, %v4699_v13 }
 0x3f7   :  { %v1803_v17 = vmul.f32 %v1793_v39, %v4693_v11  ;;  %v1807_v6 = vmul.f32 0.0, %v1793_v39  ;;  %v1817_v48 = vmul.f32 %v1793_v39, %v4697_v52 }
 0x3f8   :  { %v1804_v22 = vmul.f32 %v1794_v27, %v4695_v43  ;;  %v1808_v32 = vmul.f32 0.0, %v1794_v27  ;;  %v1818_v42 = vmul.f32 %v1794_v27, %v4699_v13 }
 0x3f9   :  { %v4765_v57 = vsub.f32 %v1801_v1, %v1803_v17  ;;  %v4767_v55 = vadd.f32 %v1809_v14, %v1807_v6  ;;  %v4769_v31 = vsub.f32 %v1813_v40, %v1807_v6  ;;  %v4771_v11 = vadd.f32 %v1817_v48, %v1801_v1 }
 0x3fa   :  { %v4773_v52 = vsub.f32 %v1802_v50, %v1804_v22  ;;  %v4775_v36 = vadd.f32 %v1810_v59, %v1808_v32  ;;  %v4777_v43 = vsub.f32 %v1814_v41, %v1808_v32  ;;  %v4779_v21 = vadd.f32 %v1818_v42, %v1802_v50 }
 0x3fb   :  { %v1823_v13 = vmul.f32 2.0, %v4769_v31  ;;  %v1899_v53 = vmul.f32 2.0, %v4767_v55  ;;  %v1838_v14 = vand.u32 2147483647, %v4721_v24  ;;  %v1914_v59 = vand.u32 2147483647, %v4746_v10 }
 0x3fc   :  { %v1824_v2 = vmul.f32 2.0, %v4777_v43  ;;  %v1900_v9 = vmul.f32 2.0, %v4775_v36 }
 0x3fd   :  { %v1827_v26 = vmul.f32 %v1823_v13, %v1823_v13  ;;  %v1855_v44 = vmul.f32 %v1845_v4, %v1823_v13  ;;  %v1903_v54 = vmul.f32 %v1899_v53, %v1899_v53  ;;  %v1931_v30 = vmul.f32 %v1921_v29, %v1899_v53 }
 0x3fe   :  { %v1828_v5 = vmul.f32 %v1824_v2, %v1824_v2  ;;  %v1856_v61 = vmul.f32 %v1846_v37, %v1824_v2  ;;  %v1904_v46 = vmul.f32 %v1900_v9, %v1900_v9  ;;  %v1932_v0 = vmul.f32 %v1922_v3, %v1900_v9 }
 0x3ff   :  { %v1829_v20 = vadd.f32 %v1827_v26, %v1825_v62  ;;  %v1905_v47 = vadd.f32 %v1903_v54, %v1901_v19  ;;  %v1837_v4 = vand.u32 2147483647, %v4717_v33  ;;  %v1913_v62 = vand.u32 2147483647, %v4739_v34 }
 0x400   :  { %v1830_v12 = vadd.f32 %v1828_v5, %v1826_v63  ;;  %v1906_v23 = vadd.f32 %v1904_v46, %v1902_v60 }
 0x401   :  { %v1831_v49 = vadd.f32 1e-30, %v1829_v20  ;;  %v1907_v16 = vadd.f32 1e-30, %v1905_v47 }
 0x402   :  { %v1832_v45 = vadd.f32 1e-30, %v1830_v12  ;;  %v1908_v39 = vadd.f32 1e-30, %v1906_v23 }
 0x403   :  { %2861 = vrsqrt.f32 %v1831_v49 }
 0x404   :  { %2863 = vrsqrt.f32 %v1832_v45 }
 0x405   :  { %2865 = vrsqrt.f32 %v1907_v16 }
 0x406   :  { %2867 = vrsqrt.f32 %v1908_v39 }
 0x40d   :  { %v2862_v1 = vpop.eup %2861 }
 0x40e   :  { %v2864_v40 = vpop.eup %2863  ;;  %v1835_v27 = vmul.f32 %v2862_v1, %v1829_v20 }
 0x40f   :  { %v2866_v19 = vpop.eup %2865  ;;  %v1836_v50 = vmul.f32 %v2864_v40, %v1830_v12 }
 0x410   :  { %v2868_v41 = vpop.eup %2867  ;;  %v1839_v17 = vadd.f32 %v1837_v4, %v1835_v27  ;;  %v1911_v6 = vmul.f32 %v2866_v19, %v1905_v47 }
 0x411   :  { %v1840_v48 = vadd.f32 %v1838_v14, %v1836_v50  ;;  %v1912_v22 = vmul.f32 %v2868_v41, %v1906_v23 }
 0x412   :  { %v1841_v32 = vadd.f32 1e-30, %v1839_v17  ;;  %v1915_v42 = vadd.f32 %v1913_v62, %v1911_v6 }
 0x413   :  { %v1842_v29 = vadd.f32 1e-30, %v1840_v48  ;;  %v1916_v33 = vadd.f32 %v1914_v59, %v1912_v22 }
 0x414   :  { %2869 = vrcp.f32 %v1841_v32  ;;  %v1917_v13 = vadd.f32 1e-30, %v1915_v42 }
 0x415   :  { %2871 = vrcp.f32 %v1842_v29  ;;  %v1918_v24 = vadd.f32 1e-30, %v1916_v33 }
 0x416   :  { %2873 = vrcp.f32 %v1917_v13 }
 0x417   :  { %2875 = vrcp.f32 %v1918_v24 }
 0x41e   :  { %v2870_v34 = vpop.eup %2869 }
 0x41f   :  { %v2872_v37 = vpop.eup %2871  ;;  %v1849_v53 = vmul.f32 %v2870_v34, %v1841_v32 }
 0x420   :  { %v2874_v3 = vpop.eup %2873  ;;  %v1850_v10 = vmul.f32 %v2872_v37, %v1842_v29 }
 0x421   :  { %v2876_v2 = vpop.eup %2875  ;;  %v1851_v63 = vsub.f32 2.0, %v1849_v53  ;;  %v1925_v9 = vmul.f32 %v2874_v3, %v1917_v13 }
 0x422   :  { %v1852_v60 = vsub.f32 2.0, %v1850_v10  ;;  %v1926_v26 = vmul.f32 %v2876_v2, %v1918_v24 }
 0x423   :  { %v1853_v54 = vmul.f32 %v2870_v34, %v1851_v63  ;;  %v1927_v5 = vsub.f32 2.0, %v1925_v9 }
 0x424   :  { %v1854_v46 = vmul.f32 %v2872_v37, %v1852_v60  ;;  %v1928_v20 = vsub.f32 2.0, %v1926_v26 }
 0x425   :  { %v1857_v47 = vmul.f32 %v1855_v44, %v1853_v54  ;;  %v1929_v12 = vmul.f32 %v2874_v3, %v1927_v5 }
 0x426   :  { %v1858_v23 = vmul.f32 %v1856_v61, %v1854_v46  ;;  %v1930_v49 = vmul.f32 %v2876_v2, %v1928_v20 }
 0x427   :  { %v1859_v16 = vmul.f32 %v1857_v47, %v1857_v47  ;;  %v1867_v45 = vmul.f32 %v1857_v47, %v4769_v31  ;;  %v1933_v39 = vmul.f32 %v1931_v30, %v1929_v12 }
 0x428   :  { %v1860_v4 = vmul.f32 %v1858_v23, %v1858_v23  ;;  %v1868_v1 = vmul.f32 %v1858_v23, %v4777_v43  ;;  %v1934_v14 = vmul.f32 %v1932_v0, %v1930_v49 }
 0x429   :  { %v1861_v40 = vadd.f32 1.0, %v1859_v16  ;;  %v4802_v27 = vsub.f32 %v4710_v51, %v1867_v45  ;;  %v4805_v62 = vadd.f32 %v1867_v45, %v4639_v8  ;;  %v1935_v19 = vmul.f32 %v1933_v39, %v1933_v39 }
 0x42a   :  { %v1862_v44 = vadd.f32 1.0, %v1860_v4  ;;  %v4808_v61 = vsub.f32 %v4713_v35, %v1868_v1  ;;  %v4811_v50 = vadd.f32 %v1868_v1, %v4645_v38  ;;  %v1936_v31 = vmul.f32 %v1934_v14, %v1934_v14 }
 0x42b   :  { %2877 = vrsqrt.f32 %v1861_v40  ;;  %v1937_v30 = vadd.f32 1.0, %v1935_v19  ;;  %v4814_v43 = vmul.f32 %v1933_v39, %v4767_v55  ;;  %v4817_v51 = vmul.f32 %v1934_v14, %v4775_v36 }
 0x42c   :  { %2879 = vrsqrt.f32 %v1862_v44  ;;  %v1938_v8 = vadd.f32 1.0, %v1936_v31 }
 0x42d   :  { %v4821_v0 = vsub.f32 %v4725_v15, %v4814_v43  ;;  %v4825_v35 = vsub.f32 %v4732_v18, %v4817_v51  ;;  %2881 = vrsqrt.f32 %v1937_v30 }
 0x42e   :  { %2883 = vrsqrt.f32 %v1938_v8 }
 0x42f   :  { %v4829_v55 = vsub.f32 %v4805_v62, %v4821_v0  ;;  %v4833_v36 = vsub.f32 %v4811_v50, %v4825_v35 }
 0x431   :  { %vm1995_vm12 = vcmp.ge.f32.partialorder %v4829_v55, 0.0  ;;  %vm1996_vm13 = vcmp.ge.f32.partialorder %v4833_v36, 0.0 }
 0x435   :  { %v2878_v38 = vpop.eup %2877 }
 0x436   :  { %v2880_v59 = vpop.eup %2879  ;;  %v1865_v41 = vmul.f32 %v2878_v38, %v1857_v47  ;;  %v1873_v15 = vmul.f32 %v2878_v38, %v4765_v57  ;;  %v1881_v17 = vmul.f32 %v2878_v38, %v4701_v25  ;;  %v1885_v6 = vmul.f32 0.0, %v2878_v38 }
 0x437   :  { %v1866_v18 = vmul.f32 %v2880_v59, %v1858_v23  ;;  %v1874_v48 = vmul.f32 %v2880_v59, %v4773_v52  ;;  %v1882_v22 = vmul.f32 %v2880_v59, %v4703_v28  ;;  %v1886_v32 = vmul.f32 0.0, %v2880_v59  ;;  %v2882_v42 = vpop.eup %2881 }
 0x438   :  { %v1875_v29 = vmul.f32 %v1865_v41, %v4701_v25  ;;  %v1879_v33 = vmul.f32 %v1865_v41, %v4765_v57  ;;  %v1887_v13 = vmul.f32 %v1865_v41, %v4771_v11  ;;  %v1891_v24 = vmul.f32 0.0, %v1865_v41  ;;  %v2884_v34 = vpop.eup %2883 }
 0x439   :  { %v1876_v37 = vmul.f32 %v1866_v18, %v4703_v28  ;;  %v1880_v53 = vmul.f32 %v1866_v18, %v4773_v52  ;;  %v1888_v3 = vmul.f32 %v1866_v18, %v4779_v21  ;;  %v1892_v10 = vmul.f32 0.0, %v1866_v18 }
 0x43a   :  { %v1877_v2 = vsub.f32 %v1873_v15, %v1875_v29  ;;  %v1883_v63 = vadd.f32 %v1881_v17, %v1879_v33  ;;  %v1889_v9 = vsub.f32 %v1885_v6, %v1887_v13  ;;  %v1893_v60 = vmul.f32 %v2878_v38, %v4771_v11 }
 0x43b   :  { %v1878_v26 = vsub.f32 %v1874_v48, %v1876_v37  ;;  %v1884_v25 = vadd.f32 %v1882_v22, %v1880_v53  ;;  %v1890_v54 = vsub.f32 %v1886_v32, %v1888_v3  ;;  %v1894_v57 = vmul.f32 %v2880_v59, %v4779_v21 }
 0x43c   :  { %v1895_v5 = vadd.f32 %v1893_v60, %v1891_v24  ;;  %v1941_v46 = vmul.f32 %v2882_v42, %v1933_v39  ;;  %v1942_v20 = vmul.f32 %v2884_v34, %v1934_v14  ;;  %v1949_v47 = vmul.f32 %v2882_v42, %v1877_v2 }
 0x43d   :  { %v1896_v28 = vadd.f32 %v1894_v57, %v1892_v10  ;;  %v1950_v12 = vmul.f32 %v2884_v34, %v1878_v26  ;;  %v1957_v52 = vmul.f32 %v2882_v42, %v1889_v9  ;;  %v1958_v23 = vmul.f32 %v2884_v34, %v1890_v54 }
 0x43e   :  { %v1951_v49 = vmul.f32 %v1941_v46, %v1889_v9  ;;  %v1952_v16 = vmul.f32 %v1942_v20, %v1890_v54  ;;  %v1955_v45 = vmul.f32 %v1941_v46, %v1877_v2  ;;  %v1956_v4 = vmul.f32 %v1942_v20, %v1878_v26 }
 0x43f   :  { %v1961_v1 = vmul.f32 %v2882_v42, %v1883_v63  ;;  %v1962_v40 = vmul.f32 %v2884_v34, %v1884_v25  ;;  %v1963_v11 = vmul.f32 %v1941_v46, %v1895_v5  ;;  %v1964_v19 = vmul.f32 %v1942_v20, %v1896_v28 }
 0x440   :  { %v4849_v44 = vsub.f32 %v1949_v47, %v1951_v49  ;;  %v4851_v31 = vsub.f32 %v1950_v12, %v1952_v16  ;;  %v4853_v21 = vadd.f32 %v1957_v52, %v1955_v45  ;;  %v4855_v39 = vadd.f32 %v1958_v23, %v1956_v4 }
 0x441   :  { %v1965_v14 = vsub.f32 %v1961_v1, %v1963_v11  ;;  %v1966_v30 = vsub.f32 %v1962_v40, %v1964_v19  ;;  %v1967_v8 = vmul.f32 %v1941_v46, %v1883_v63  ;;  %v1968_v38 = vmul.f32 %v1942_v20, %v1884_v25 }
 0x442   :  { %v1969_v59 = vmul.f32 %v2882_v42, %v1895_v5  ;;  %v1970_v41 = vmul.f32 %v2884_v34, %v1896_v28  ;;  %v1997_v15 = vsel %vm1995_vm12, 1.0, %v2993_v58  ;;  %v1998_v17 = vsel %vm1996_vm13, 1.0, %v2993_v58 }
 0x443   :  { %v1975_v6 = vmul.f32 2.0, %v1965_v14  ;;  %v1976_v18 = vmul.f32 2.0, %v1966_v30  ;;  %v1977_v48 = vmul.f32 %v4829_v55, %v4829_v55  ;;  %v1978_v22 = vmul.f32 %v4833_v36, %v4833_v36 }
 0x444   :  { %v4867_v32 = vadd.f32 %v1969_v59, %v1967_v8  ;;  %v4869_v42 = vadd.f32 %v1970_v41, %v1968_v38  ;;  %v1989_v10 = vand.u32 2147483647, %v4829_v55  ;;  %v1990_v63 = vand.u32 2147483647, %v4833_v36 }
 0x445   :  { %v1979_v29 = vmul.f32 %v1975_v6, %v1975_v6  ;;  %v1980_v33 = vmul.f32 %v1976_v18, %v1976_v18  ;;  %v2007_v13 = vmul.f32 %v1997_v15, %v1975_v6  ;;  %v2008_v24 = vmul.f32 %v1998_v17, %v1976_v18 }
 0x446   :  { %v4875_v36 = vadd.f32 %v4814_v43, %v4728_v56  ;;  %v4879_v1 = vadd.f32 %v4817_v51, %v4735_v7 }
 0x447   :  { %v1981_v34 = vadd.f32 %v1979_v29, %v1977_v48  ;;  %v1982_v37 = vadd.f32 %v1980_v33, %v1978_v22 }
 0x449   :  { %v1983_v53 = vadd.f32 1e-30, %v1981_v34  ;;  %v1984_v3 = vadd.f32 1e-30, %v1982_v37 }
 0x44b   :  { %2885 = vrsqrt.f32 %v1983_v53 }
 0x44c   :  { %2887 = vrsqrt.f32 %v1984_v3 }
 0x455   :  { %v2886_v2 = vpop.eup %2885 }
 0x456   :  { %v2888_v9 = vpop.eup %2887  ;;  %v1987_v60 = vmul.f32 %v2886_v2, %v1981_v34 }
 0x457   :  { %v1988_v26 = vmul.f32 %v2888_v9, %v1982_v37 }
 0x458   :  { %v1991_v25 = vadd.f32 %v1989_v10, %v1987_v60 }
 0x459   :  { %v1992_v54 = vadd.f32 %v1990_v63, %v1988_v26 }
 0x45a   :  { %v1993_v57 = vadd.f32 1e-30, %v1991_v25 }
 0x45b   :  { %v1994_v5 = vadd.f32 1e-30, %v1992_v54 }
 0x45c   :  { %2889 = vrcp.f32 %v1993_v57 }
 0x45d   :  { %2891 = vrcp.f32 %v1994_v5 }
 0x466   :  { %v2890_v46 = vpop.eup %2889 }
 0x467   :  { %v2892_v20 = vpop.eup %2891  ;;  %v2001_v47 = vmul.f32 %v2890_v46, %v1993_v57 }
 0x468   :  { %v2002_v28 = vmul.f32 %v2892_v20, %v1994_v5 }
 0x469   :  { %v2003_v12 = vsub.f32 2.0, %v2001_v47 }
 0x46a   :  { %v2004_v52 = vsub.f32 2.0, %v2002_v28 }
 0x46b   :  { %v2005_v23 = vmul.f32 %v2890_v46, %v2003_v12 }
 0x46c   :  { %v2006_v55 = vmul.f32 %v2892_v20, %v2004_v52 }
 0x46d   :  { %v2009_v49 = vmul.f32 %v2007_v13, %v2005_v23 }
 0x46e   :  { %v2010_v16 = vmul.f32 %v2008_v24, %v2006_v55 }
 0x46f   :  { %v2011_v45 = vmul.f32 %v2009_v49, %v2009_v49  ;;  %v2019_v4 = vmul.f32 %v2009_v49, %v1965_v14 }
 0x470   :  { %v2012_v40 = vmul.f32 %v2010_v16, %v2010_v16  ;;  %v2020_v11 = vmul.f32 %v2010_v16, %v1966_v30 }
 0x471   :  { %v2013_v19 = vadd.f32 1.0, %v2011_v45  ;;  %v4882_v8 = vadd.f32 %v2019_v4, %v4805_v62  ;;  %v4896_v43 = vsub.f32 %v4821_v0, %v2019_v4 }
 0x472   :  { %v2014_v38 = vadd.f32 1.0, %v2012_v40  ;;  %v4885_v59 = vadd.f32 %v2020_v11, %v4811_v50  ;;  %v4899_v62 = vsub.f32 %v4825_v35, %v2020_v11 }
 0x473   :  { %2893 = vrsqrt.f32 %v2013_v19  ;;  %v4889_v56 = vsub.f32 %v4882_v8, %v4875_v36  ;;  %v4903_v50 = vsub.f32 %v4896_v43, %v4802_v27 }
 0x474   :  { %2895 = vrsqrt.f32 %v2014_v38  ;;  %v4893_v7 = vsub.f32 %v4885_v59, %v4879_v1  ;;  %v4910_v14 = vsub.f32 %v4899_v62, %v4808_v61 }
 0x475   :  { %vm2067_vm14 = vcmp.ge.f32.partialorder %v4889_v56, 0.0  ;;  %v2049_v51 = vmul.f32 %v4889_v56, %v4889_v56  ;;  %v2125_v35 = vmul.f32 %v4903_v50, %v4903_v50  ;;  %vm2143_vm0 = vcmp.ge.f32.partialorder %v4903_v50, 0.0 }
 0x476   :  { %vm2068_vm15 = vcmp.ge.f32.partialorder %v4893_v7, 0.0  ;;  %v2069_v0 = vsel %vm2067_vm14, 1.0, %v2993_v58  ;;  %vm2144_vm1 = vcmp.ge.f32.partialorder %v4910_v14, 0.0  ;;  %v2145_v10 = vsel %vm2143_vm0, 1.0, %v2993_v58 }
 0x477   :  { %v2070_v25 = vsel %vm2068_vm15, 1.0, %v2993_v58  ;;  %v2146_v57 = vsel %vm2144_vm1, 1.0, %v2993_v58  ;;  %v2050_v46 = vmul.f32 %v4893_v7, %v4893_v7  ;;  %v2126_v47 = vmul.f32 %v4910_v14, %v4910_v14 }
 0x47d   :  { %v2894_v30 = vpop.eup %2893 }
 0x47e   :  { %v2896_v41 = vpop.eup %2895  ;;  %v2017_v15 = vmul.f32 %v2894_v30, %v2009_v49  ;;  %v2025_v17 = vmul.f32 %v2894_v30, %v4849_v44  ;;  %v2033_v6 = vmul.f32 0.0, %v2894_v30  ;;  %v2041_v18 = vmul.f32 %v2894_v30, %v4867_v32 }
 0x47f   :  { %v2018_v48 = vmul.f32 %v2896_v41, %v2010_v16  ;;  %v2026_v22 = vmul.f32 %v2896_v41, %v4851_v31  ;;  %v2034_v29 = vmul.f32 0.0, %v2896_v41  ;;  %v2042_v33 = vmul.f32 %v2896_v41, %v4869_v42 }
 0x480   :  { %v2027_v13 = vmul.f32 0.0, %v2017_v15  ;;  %v2031_v24 = vmul.f32 %v2017_v15, %v4849_v44  ;;  %v2037_v34 = vmul.f32 %v2017_v15, %v4867_v32 }
 0x481   :  { %v2028_v37 = vmul.f32 0.0, %v2018_v48  ;;  %v2032_v53 = vmul.f32 %v2018_v48, %v4851_v31  ;;  %v2038_v3 = vmul.f32 %v2018_v48, %v4869_v42 }
 0x482   :  { %v4929_v2 = vsub.f32 %v2025_v17, %v2027_v13  ;;  %v4931_v63 = vadd.f32 %v2033_v6, %v2031_v24  ;;  %v4933_v9 = vsub.f32 %v2033_v6, %v2037_v34  ;;  %v4935_v44 = vadd.f32 %v2041_v18, %v2027_v13 }
 0x483   :  { %v4937_v32 = vsub.f32 %v2026_v22, %v2028_v37  ;;  %v4939_v60 = vadd.f32 %v2034_v29, %v2032_v53  ;;  %v4941_v26 = vsub.f32 %v2034_v29, %v2038_v3  ;;  %v4943_v31 = vadd.f32 %v2042_v33, %v2028_v37 }
 0x484   :  { %v2047_v42 = vmul.f32 2.0, %v4935_v44  ;;  %v2123_v54 = vmul.f32 2.0, %v4929_v2  ;;  %v2062_v6 = vand.u32 2147483647, %v4893_v7  ;;  %v2138_v29 = vand.u32 2147483647, %v4910_v14 }
 0x485   :  { %v2048_v5 = vmul.f32 2.0, %v4943_v31  ;;  %v2124_v20 = vmul.f32 2.0, %v4937_v32 }
 0x486   :  { %v2051_v28 = vmul.f32 %v2047_v42, %v2047_v42  ;;  %v2079_v12 = vmul.f32 %v2069_v0, %v2047_v42  ;;  %v2127_v52 = vmul.f32 %v2123_v54, %v2123_v54  ;;  %v2155_v23 = vmul.f32 %v2145_v10, %v2123_v54 }
 0x487   :  { %v2052_v55 = vmul.f32 %v2048_v5, %v2048_v5  ;;  %v2080_v49 = vmul.f32 %v2070_v25, %v2048_v5  ;;  %v2128_v16 = vmul.f32 %v2124_v20, %v2124_v20  ;;  %v2156_v45 = vmul.f32 %v2146_v57, %v2124_v20 }
 0x488   :  { %v2053_v4 = vadd.f32 %v2051_v28, %v2049_v51  ;;  %v2129_v40 = vadd.f32 %v2127_v52, %v2125_v35  ;;  %v2061_v0 = vand.u32 2147483647, %v4889_v56  ;;  %v2137_v51 = vand.u32 2147483647, %v4903_v50 }
 0x489   :  { %v2054_v11 = vadd.f32 %v2052_v55, %v2050_v46  ;;  %v2130_v19 = vadd.f32 %v2128_v16, %v2126_v47 }
 0x48a   :  { %v2055_v38 = vadd.f32 1e-30, %v2053_v4  ;;  %v2131_v30 = vadd.f32 1e-30, %v2129_v40 }
 0x48b   :  { %v2056_v41 = vadd.f32 1e-30, %v2054_v11  ;;  %v2132_v15 = vadd.f32 1e-30, %v2130_v19 }
 0x48c   :  { %2897 = vrsqrt.f32 %v2055_v38 }
 0x48d   :  { %2899 = vrsqrt.f32 %v2056_v41 }
 0x48e   :  { %2901 = vrsqrt.f32 %v2131_v30 }
 0x48f   :  { %2903 = vrsqrt.f32 %v2132_v15 }
 0x496   :  { %v2898_v17 = vpop.eup %2897 }
 0x497   :  { %v2900_v18 = vpop.eup %2899  ;;  %v2059_v48 = vmul.f32 %v2898_v17, %v2053_v4 }
 0x498   :  { %v2902_v35 = vpop.eup %2901  ;;  %v2060_v22 = vmul.f32 %v2900_v18, %v2054_v11 }
 0x499   :  { %v2904_v33 = vpop.eup %2903  ;;  %v2063_v13 = vadd.f32 %v2061_v0, %v2059_v48  ;;  %v2135_v24 = vmul.f32 %v2902_v35, %v2129_v40 }
 0x49a   :  { %v2064_v34 = vadd.f32 %v2062_v6, %v2060_v22  ;;  %v2136_v37 = vmul.f32 %v2904_v33, %v2130_v19 }
 0x49b   :  { %v2065_v53 = vadd.f32 1e-30, %v2063_v13  ;;  %v2139_v3 = vadd.f32 %v2137_v51, %v2135_v24 }
 0x49c   :  { %v2066_v10 = vadd.f32 1e-30, %v2064_v34  ;;  %v2140_v56 = vadd.f32 %v2138_v29, %v2136_v37 }
 0x49d   :  { %2905 = vrcp.f32 %v2065_v53  ;;  %v2141_v42 = vadd.f32 1e-30, %v2139_v3 }
 0x49e   :  { %2907 = vrcp.f32 %v2066_v10  ;;  %v2142_v7 = vadd.f32 1e-30, %v2140_v56 }
 0x49f   :  { %2909 = vrcp.f32 %v2141_v42 }
 0x4a0   :  { %2911 = vrcp.f32 %v2142_v7 }
 0x4a7   :  { %v2906_v50 = vpop.eup %2905 }
 0x4a8   :  { %v2908_v25 = vpop.eup %2907  ;;  %v2073_v54 = vmul.f32 %v2906_v50, %v2065_v53 }
 0x4a9   :  { %v2910_v57 = vpop.eup %2909  ;;  %v2074_v14 = vmul.f32 %v2908_v25, %v2066_v10 }
 0x4aa   :  { %v2912_v5 = vpop.eup %2911  ;;  %v2075_v46 = vsub.f32 2.0, %v2073_v54  ;;  %v2149_v20 = vmul.f32 %v2910_v57, %v2141_v42 }
 0x4ab   :  { %v2076_v47 = vsub.f32 2.0, %v2074_v14  ;;  %v2150_v28 = vmul.f32 %v2912_v5, %v2142_v7 }
 0x4ac   :  { %v2077_v52 = vmul.f32 %v2906_v50, %v2075_v46  ;;  %v2151_v55 = vsub.f32 2.0, %v2149_v20 }
 0x4ad   :  { %v2078_v16 = vmul.f32 %v2908_v25, %v2076_v47  ;;  %v2152_v4 = vsub.f32 2.0, %v2150_v28 }
 0x4ae   :  { %v2081_v40 = vmul.f32 %v2079_v12, %v2077_v52  ;;  %v2153_v11 = vmul.f32 %v2910_v57, %v2151_v55 }
 0x4af   :  { %v2082_v19 = vmul.f32 %v2080_v49, %v2078_v16  ;;  %v2154_v38 = vmul.f32 %v2912_v5, %v2152_v4 }
 0x4b0   :  { %v2083_v30 = vmul.f32 %v2081_v40, %v2081_v40  ;;  %v2091_v41 = vmul.f32 %v2081_v40, %v4935_v44  ;;  %v2157_v15 = vmul.f32 %v2155_v23, %v2153_v11 }
 0x4b1   :  { %v2084_v0 = vmul.f32 %v2082_v19, %v2082_v19  ;;  %v2092_v17 = vmul.f32 %v2082_v19, %v4943_v31  ;;  %v2158_v6 = vmul.f32 %v2156_v45, %v2154_v38 }
 0x4b2   :  { %v2085_v18 = vadd.f32 1.0, %v2083_v30  ;;  %v4966_v48 = vsub.f32 %v4875_v36, %v2091_v41  ;;  %v4969_v51 = vadd.f32 %v2091_v41, %v4882_v8  ;;  %v2159_v35 = vmul.f32 %v2157_v15, %v2157_v15 }
 0x4b3   :  { %v2086_v12 = vadd.f32 1.0, %v2084_v0  ;;  %v4972_v49 = vsub.f32 %v4879_v1, %v2092_v17  ;;  %v4975_v22 = vadd.f32 %v2092_v17, %v4885_v59  ;;  %v2160_v44 = vmul.f32 %v2158_v6, %v2158_v6 }
 0x4b4   :  { %2913 = vrsqrt.f32 %v2085_v18  ;;  %v2161_v23 = vadd.f32 1.0, %v2159_v35  ;;  %v4978_v31 = vmul.f32 %v2157_v15, %v4929_v2  ;;  %v4981_v36 = vmul.f32 %v2158_v6, %v4937_v32 }
 0x4b5   :  { %2915 = vrsqrt.f32 %v2086_v12  ;;  %v2162_v8 = vadd.f32 1.0, %v2160_v44 }
 0x4b6   :  { %v4985_v45 = vsub.f32 %v4802_v27, %v4978_v31  ;;  %v4989_v1 = vsub.f32 %v4808_v61, %v4981_v36  ;;  %2917 = vrsqrt.f32 %v2161_v23 }
 0x4b7   :  { %2919 = vrsqrt.f32 %v2162_v8 }
 0x4b8   :  { %v4993_v59 = vsub.f32 %v4966_v48, %v4985_v45  ;;  %v4997_v2 = vsub.f32 %v4972_v49, %v4989_v1 }
 0x4ba   :  { %vm2219_vm2 = vcmp.ge.f32.partialorder %v4993_v59, 0.0  ;;  %vm2220_vm3 = vcmp.ge.f32.partialorder %v4997_v2, 0.0  ;;  %v5003_v32 = vmul.f32 %v4993_v59, %v4993_v59  ;;  %v5007_v61 = vmul.f32 %v4997_v2, %v4997_v2 }
 0x4bb   :  { %v2221_v29 = vsel %vm2219_vm2, 1.0, %v2993_v58  ;;  %v2222_v33 = vsel %vm2220_vm3, 1.0, %v2993_v58 }
 0x4be   :  { %v2914_v27 = vpop.eup %2913 }
 0x4bf   :  { %v2916_v13 = vpop.eup %2915  ;;  %v2089_v24 = vmul.f32 %v2914_v27, %v2081_v40  ;;  %v2097_v34 = vmul.f32 %v2914_v27, %v4853_v21  ;;  %v2105_v37 = vmul.f32 %v2914_v27, %v4931_v63  ;;  %v2109_v53 = vmul.f32 %v2914_v27, %v4933_v9 }
 0x4c0   :  { %v2090_v3 = vmul.f32 %v2916_v13, %v2082_v19  ;;  %v2098_v10 = vmul.f32 %v2916_v13, %v4855_v39  ;;  %v2106_v56 = vmul.f32 %v2916_v13, %v4939_v60  ;;  %v2110_v42 = vmul.f32 %v2916_v13, %v4941_v26  ;;  %v2918_v7 = vpop.eup %2917 }
 0x4c1   :  { %v2099_v50 = vmul.f32 %v2089_v24, %v4931_v63  ;;  %v2103_v25 = vmul.f32 %v2089_v24, %v4853_v21  ;;  %v2111_v54 = vmul.f32 0.0, %v2089_v24  ;;  %v2115_v57 = vmul.f32 %v2089_v24, %v4933_v9  ;;  %v2920_v14 = vpop.eup %2919 }
 0x4c2   :  { %v2100_v5 = vmul.f32 %v2090_v3, %v4939_v60  ;;  %v2104_v46 = vmul.f32 %v2090_v3, %v4855_v39  ;;  %v2112_v20 = vmul.f32 0.0, %v2090_v3  ;;  %v2116_v47 = vmul.f32 %v2090_v3, %v4941_v26 }
 0x4c3   :  { %v2101_v28 = vsub.f32 %v2097_v34, %v2099_v50  ;;  %v2107_v52 = vadd.f32 %v2105_v37, %v2103_v25  ;;  %v2113_v55 = vsub.f32 %v2109_v53, %v2111_v54  ;;  %v2117_v16 = vmul.f32 0.0, %v2914_v27 }
 0x4c4   :  { %v2102_v4 = vsub.f32 %v2098_v10, %v2100_v5  ;;  %v2108_v40 = vadd.f32 %v2106_v56, %v2104_v46  ;;  %v2114_v63 = vsub.f32 %v2110_v42, %v2112_v20  ;;  %v2118_v11 = vmul.f32 0.0, %v2916_v13 }
 0x4c5   :  { %v2119_v21 = vadd.f32 %v2117_v16, %v2115_v57  ;;  %v2165_v19 = vmul.f32 %v2918_v7, %v2157_v15  ;;  %v2166_v38 = vmul.f32 %v2920_v14, %v2158_v6  ;;  %v2173_v9 = vmul.f32 %v2918_v7, %v2101_v28 }
 0x4c6   :  { %v2120_v30 = vadd.f32 %v2118_v11, %v2116_v47  ;;  %v2174_v41 = vmul.f32 %v2920_v14, %v2102_v4  ;;  %v2181_v60 = vmul.f32 %v2918_v7, %v2113_v55  ;;  %v2182_v0 = vmul.f32 %v2920_v14, %v2114_v63 }
 0x4c7   :  { %v2175_v39 = vmul.f32 %v2165_v19, %v2113_v55  ;;  %v2176_v17 = vmul.f32 %v2166_v38, %v2114_v63  ;;  %v2179_v18 = vmul.f32 %v2165_v19, %v2101_v28  ;;  %v2180_v26 = vmul.f32 %v2166_v38, %v2102_v4 }
 0x4c8   :  { %v2185_v35 = vmul.f32 %v2918_v7, %v2107_v52  ;;  %v2186_v12 = vmul.f32 %v2920_v14, %v2108_v40  ;;  %v2187_v44 = vmul.f32 %v2165_v19, %v2119_v21  ;;  %v2188_v23 = vmul.f32 %v2166_v38, %v2120_v30 }
 0x4c9   :  { %v2177_v8 = vsub.f32 %v2173_v9, %v2175_v39  ;;  %v2178_v27 = vsub.f32 %v2174_v41, %v2176_v17  ;;  %v5023_v24 = vadd.f32 %v2181_v60, %v2179_v18  ;;  %v5025_v13 = vadd.f32 %v2182_v0, %v2180_v26 }
 0x4ca   :  { %v5027_v15 = vsub.f32 %v2185_v35, %v2187_v44  ;;  %v5029_v6 = vsub.f32 %v2186_v12, %v2188_v23  ;;  %v2191_v34 = vmul.f32 %v2165_v19, %v2107_v52  ;;  %v2192_v37 = vmul.f32 %v2166_v38, %v2108_v40 }
 0x4cb   :  { %v2193_v53 = vmul.f32 %v2918_v7, %v2119_v21  ;;  %v2194_v3 = vmul.f32 %v2920_v14, %v2120_v30  ;;  %v2199_v10 = vmul.f32 2.0, %v2177_v8  ;;  %v2200_v56 = vmul.f32 2.0, %v2178_v27 }
 0x4cc   :  { %v2213_v7 = vand.u32 2147483647, %v4993_v59  ;;  %v2214_v52 = vand.u32 2147483647, %v4997_v2  ;;  %v5055_v23 = vadd.f32 %v4978_v31, %v4896_v43 }
 0x4cd   :  { %v5031_v42 = vadd.f32 %v2193_v53, %v2191_v34  ;;  %v5033_v50 = vadd.f32 %v2194_v3, %v2192_v37  ;;  %v2203_v25 = vmul.f32 %v2199_v10, %v2199_v10  ;;  %v2204_v54 = vmul.f32 %v2200_v56, %v2200_v56 }
 0x4ce   :  { %v2231_v57 = vmul.f32 %v2221_v29, %v2199_v10  ;;  %v2232_v5 = vmul.f32 %v2222_v33, %v2200_v56 }
 0x4cf   :  { %v2205_v46 = vadd.f32 %v2203_v25, %v5003_v32  ;;  %v2206_v20 = vadd.f32 %v2204_v54, %v5007_v61 }
 0x4d1   :  { %v2207_v47 = vadd.f32 1e-30, %v2205_v46  ;;  %v2208_v28 = vadd.f32 1e-30, %v2206_v20 }
 0x4d3   :  { %2921 = vrsqrt.f32 %v2207_v47 }
 0x4d4   :  { %2923 = vrsqrt.f32 %v2208_v28 }
 0x4dd   :  { %v2922_v14 = vpop.eup %2921 }
 0x4de   :  { %v2924_v55 = vpop.eup %2923  ;;  %v2211_v16 = vmul.f32 %v2922_v14, %v2205_v46 }
 0x4df   :  { %v2212_v4 = vmul.f32 %v2924_v55, %v2206_v20 }
 0x4e0   :  { %v2215_v40 = vadd.f32 %v2213_v7, %v2211_v16 }
 0x4e1   :  { %v2216_v63 = vadd.f32 %v2214_v52, %v2212_v4 }
 0x4e2   :  { %v2217_v29 = vadd.f32 1e-30, %v2215_v40 }
 0x4e3   :  { %v2218_v33 = vadd.f32 1e-30, %v2216_v63 }
 0x4e4   :  { %2925 = vrcp.f32 %v2217_v29 }
 0x4e5   :  { %2927 = vrcp.f32 %v2218_v33 }
 0x4ee   :  { %v2926_v32 = vpop.eup %2925 }
 0x4ef   :  { %v2928_v61 = vpop.eup %2927  ;;  %v2225_v11 = vmul.f32 %v2926_v32, %v2217_v29 }
 0x4f0   :  { %v2226_v21 = vmul.f32 %v2928_v61, %v2218_v33 }
 0x4f1   :  { %v2227_v19 = vsub.f32 2.0, %v2225_v11 }
 0x4f2   :  { %v2228_v38 = vsub.f32 2.0, %v2226_v21 }
 0x4f3   :  { %v2229_v9 = vmul.f32 %v2926_v32, %v2227_v19 }
 0x4f4   :  { %v2230_v59 = vmul.f32 %v2928_v61, %v2228_v38 }
 0x4f5   :  { %v2233_v30 = vmul.f32 %v2231_v57, %v2229_v9 }
 0x4f6   :  { %v2234_v41 = vmul.f32 %v2232_v5, %v2230_v59 }
 0x4f7   :  { %v2235_v2 = vmul.f32 %v2233_v30, %v2233_v30  ;;  %v2243_v60 = vmul.f32 %v2233_v30, %v2177_v8 }
 0x4f8   :  { %v2236_v0 = vmul.f32 %v2234_v41, %v2234_v41  ;;  %v2244_v39 = vmul.f32 %v2234_v41, %v2178_v27 }
 0x4f9   :  { %v2237_v17 = vadd.f32 1.0, %v2235_v2  ;;  %v5040_v18 = vsub.f32 %v4985_v45, %v2243_v60  ;;  %v5058_v45 = vadd.f32 %v2243_v60, %v4966_v48 }
 0x4fa   :  { %v2238_v26 = vadd.f32 1.0, %v2236_v0  ;;  %v5043_v35 = vsub.f32 %v4989_v1, %v2244_v39  ;;  %v5062_v1 = vadd.f32 %v4981_v36, %v4899_v62  ;;  %v5065_v8 = vadd.f32 %v2244_v39, %v4972_v49 }
 0x4fb   :  { %2929 = vrsqrt.f32 %v2237_v17  ;;  %v5047_v12 = vsub.f32 %v4969_v51, %v5040_v18  ;;  %v5069_v27 = vsub.f32 %v5058_v45, %v5055_v23 }
 0x4fc   :  { %2931 = vrsqrt.f32 %v2238_v26  ;;  %v5051_v44 = vsub.f32 %v4975_v22, %v5043_v35  ;;  %v5076_v48 = vsub.f32 %v5065_v8, %v5062_v1 }
 0x4fd   :  { %vm2291_vm4 = vcmp.ge.f32.partialorder %v5047_v12, 0.0  ;;  %v2273_v43 = vmul.f32 %v5047_v12, %v5047_v12  ;;  %v2337_v49 = vmul.f32 %v5069_v27, %v5069_v27  ;;  %vm2355_vm6 = vcmp.ge.f32.partialorder %v5069_v27, 0.0 }
 0x4fe   :  { %vm2292_vm5 = vcmp.ge.f32.partialorder %v5051_v44, 0.0  ;;  %v2293_v62 = vsel %vm2291_vm4, 1.0, %v2993_v58  ;;  %vm2356_vm7 = vcmp.ge.f32.partialorder %v5076_v48, 0.0  ;;  %v2357_v7 = vsel %vm2355_vm6, 1.0, %v2993_v58 }
 0x4ff   :  { %v2294_v40 = vsel %vm2292_vm5, 1.0, %v2993_v58  ;;  %v2358_v29 = vsel %vm2356_vm7, 1.0, %v2993_v58  ;;  %v2274_v32 = vmul.f32 %v5051_v44, %v5051_v44  ;;  %v2338_v11 = vmul.f32 %v5076_v48, %v5076_v48 }
 0x505   :  { %v2930_v31 = vpop.eup %2929 }
 0x506   :  { %v2932_v36 = vpop.eup %2931  ;;  %v2241_v34 = vmul.f32 %v2930_v31, %v2233_v30  ;;  %v5083_v37 = vmul.f32 0.0, %v2930_v31  ;;  %v2257_v53 = vmul.f32 %v2930_v31, %v5023_v24  ;;  %v2261_v3 = vmul.f32 %v2930_v31, %v5027_v15 }
 0x507   :  { %v2242_v10 = vmul.f32 %v2932_v36, %v2234_v41  ;;  %v5087_v56 = vmul.f32 0.0, %v2932_v36  ;;  %v2258_v25 = vmul.f32 %v2932_v36, %v5025_v13  ;;  %v2262_v54 = vmul.f32 %v2932_v36, %v5029_v6 }
 0x508   :  { %v5092_v57 = vmul.f32 %v2241_v34, %v5023_v24  ;;  %v2255_v5 = vmul.f32 0.0, %v2241_v34  ;;  %v2265_v46 = vmul.f32 %v2241_v34, %v5027_v15 }
 0x509   :  { %v5097_v20 = vmul.f32 %v2242_v10, %v5025_v13  ;;  %v2256_v47 = vmul.f32 0.0, %v2242_v10  ;;  %v2266_v28 = vmul.f32 %v2242_v10, %v5029_v6 }
 0x50a   :  { %v2253_v14 = vsub.f32 %v5083_v37, %v5092_v57  ;;  %v5105_v24 = vadd.f32 %v2257_v53, %v2255_v5  ;;  %v5107_v52 = vsub.f32 %v2261_v3, %v2255_v5  ;;  %v5110_v15 = vadd.f32 %v2265_v46, %v5083_v37 }
 0x50b   :  { %v2254_v13 = vsub.f32 %v5087_v56, %v5097_v20  ;;  %v5114_v55 = vadd.f32 %v2258_v25, %v2256_v47  ;;  %v5116_v6 = vsub.f32 %v2262_v54, %v2256_v47  ;;  %v5119_v16 = vadd.f32 %v2266_v28, %v5087_v56 }
 0x50c   :  { %v2271_v4 = vmul.f32 2.0, %v5107_v52  ;;  %v2335_v63 = vmul.f32 2.0, %v5105_v24  ;;  %v2286_v3 = vand.u32 2147483647, %v5051_v44  ;;  %v2350_v5 = vand.u32 2147483647, %v5076_v48 }
 0x50d   :  { %v2272_v33 = vmul.f32 2.0, %v5116_v6  ;;  %v2336_v61 = vmul.f32 2.0, %v5114_v55 }
 0x50e   :  { %v2275_v21 = vmul.f32 %v2271_v4, %v2271_v4  ;;  %v2303_v19 = vmul.f32 %v2293_v62, %v2271_v4  ;;  %v2339_v38 = vmul.f32 %v2335_v63, %v2335_v63  ;;  %v2367_v9 = vmul.f32 %v2357_v7, %v2335_v63 }
 0x50f   :  { %v2276_v59 = vmul.f32 %v2272_v33, %v2272_v33  ;;  %v2304_v30 = vmul.f32 %v2294_v40, %v2272_v33  ;;  %v2340_v41 = vmul.f32 %v2336_v61, %v2336_v61  ;;  %v2368_v2 = vmul.f32 %v2358_v29, %v2336_v61 }
 0x510   :  { %v2277_v60 = vadd.f32 %v2275_v21, %v2273_v43  ;;  %v2341_v0 = vadd.f32 %v2339_v38, %v2337_v49  ;;  %v2285_v62 = vand.u32 2147483647, %v5047_v12  ;;  %v2349_v43 = vand.u32 2147483647, %v5069_v27 }
 0x511   :  { %v2278_v39 = vadd.f32 %v2276_v59, %v2274_v32  ;;  %v2342_v17 = vadd.f32 %v2340_v41, %v2338_v11 }
 0x512   :  { %v2279_v26 = vadd.f32 1e-30, %v2277_v60  ;;  %v2343_v31 = vadd.f32 1e-30, %v2341_v0 }
 0x513   :  { %v2280_v36 = vadd.f32 1e-30, %v2278_v39  ;;  %v2344_v34 = vadd.f32 1e-30, %v2342_v17 }
 0x514   :  { %2933 = vrsqrt.f32 %v2279_v26 }
 0x515   :  { %2935 = vrsqrt.f32 %v2280_v36 }
 0x516   :  { %2937 = vrsqrt.f32 %v2343_v31 }
 0x517   :  { %2939 = vrsqrt.f32 %v2344_v34 }
 0x51e   :  { %v2934_v53 = vpop.eup %2933 }
 0x51f   :  { %v2936_v10 = vpop.eup %2935  ;;  %v2283_v25 = vmul.f32 %v2934_v53, %v2277_v60 }
 0x520   :  { %v2938_v49 = vpop.eup %2937  ;;  %v2284_v54 = vmul.f32 %v2936_v10, %v2278_v39 }
 0x521   :  { %v2940_v46 = vpop.eup %2939  ;;  %v2287_v47 = vadd.f32 %v2285_v62, %v2283_v25  ;;  %v2347_v28 = vmul.f32 %v2938_v49, %v2341_v0 }
 0x522   :  { %v2288_v7 = vadd.f32 %v2286_v3, %v2284_v54  ;;  %v2348_v4 = vmul.f32 %v2940_v46, %v2342_v17 }
 0x523   :  { %v2289_v40 = vadd.f32 1e-30, %v2287_v47  ;;  %v2351_v63 = vadd.f32 %v2349_v43, %v2347_v28 }
 0x524   :  { %v2290_v29 = vadd.f32 1e-30, %v2288_v7  ;;  %v2352_v12 = vadd.f32 %v2350_v5, %v2348_v4 }
 0x525   :  { %2941 = vrcp.f32 %v2289_v40  ;;  %v2353_v33 = vadd.f32 1e-30, %v2351_v63 }
 0x526   :  { %2943 = vrcp.f32 %v2290_v29  ;;  %v2354_v44 = vadd.f32 1e-30, %v2352_v12 }
 0x527   :  { %2945 = vrcp.f32 %v2353_v33 }
 0x528   :  { %2947 = vrcp.f32 %v2354_v44 }
 0x52f   :  { %v2942_v27 = vpop.eup %2941 }
 0x530   :  { %v2944_v32 = vpop.eup %2943  ;;  %v2297_v61 = vmul.f32 %v2942_v27, %v2289_v40 }
 0x531   :  { %v2946_v11 = vpop.eup %2945  ;;  %v2298_v48 = vmul.f32 %v2944_v32, %v2290_v29 }
 0x532   :  { %v2948_v21 = vpop.eup %2947  ;;  %v2299_v38 = vsub.f32 2.0, %v2297_v61  ;;  %v2361_v59 = vmul.f32 %v2946_v11, %v2353_v33 }
 0x533   :  { %v2300_v41 = vsub.f32 2.0, %v2298_v48  ;;  %v2362_v60 = vmul.f32 %v2948_v21, %v2354_v44 }
 0x534   :  { %v2301_v0 = vmul.f32 %v2942_v27, %v2299_v38  ;;  %v2363_v39 = vsub.f32 2.0, %v2361_v59 }
 0x535   :  { %v2302_v17 = vmul.f32 %v2944_v32, %v2300_v41  ;;  %v2364_v26 = vsub.f32 2.0, %v2362_v60 }
 0x536   :  { %v2305_v31 = vmul.f32 %v2303_v19, %v2301_v0  ;;  %v2365_v36 = vmul.f32 %v2946_v11, %v2363_v39 }
 0x537   :  { %v2306_v34 = vmul.f32 %v2304_v30, %v2302_v17  ;;  %v2366_v62 = vmul.f32 %v2948_v21, %v2364_v26 }
 0x538   :  { %v2307_v53 = vmul.f32 %v2305_v31, %v2305_v31  ;;  %v2315_v3 = vmul.f32 %v2305_v31, %v5107_v52  ;;  %v2369_v10 = vmul.f32 %v2367_v9, %v2365_v36 }
 0x539   :  { %v2308_v25 = vmul.f32 %v2306_v34, %v2306_v34  ;;  %v2316_v43 = vmul.f32 %v2306_v34, %v5116_v6  ;;  %v2370_v49 = vmul.f32 %v2368_v2, %v2366_v62 }
 0x53a   :  { %v2309_v54 = vadd.f32 1.0, %v2307_v53  ;;  %v5142_v5 = vsub.f32 %v5040_v18, %v2315_v3  ;;  %v5145_v46 = vadd.f32 %v2315_v3, %v4969_v51  ;;  %v2371_v47 = vmul.f32 %v2369_v10, %v2369_v10 }
 0x53b   :  { %v2310_v19 = vadd.f32 1.0, %v2308_v25  ;;  %v5148_v30 = vsub.f32 %v5043_v35, %v2316_v43  ;;  %v5151_v28 = vadd.f32 %v2316_v43, %v4975_v22  ;;  %v2372_v52 = vmul.f32 %v2370_v49, %v2370_v49 }
 0x53c   :  { %2949 = vrsqrt.f32 %v2309_v54  ;;  %v2373_v9 = vadd.f32 1.0, %v2371_v47  ;;  %v5154_v6 = vmul.f32 %v2369_v10, %v5105_v24  ;;  %v5157_v18 = vmul.f32 %v2370_v49, %v5114_v55 }
 0x53d   :  { %2951 = vrsqrt.f32 %v2310_v19  ;;  %v2374_v51 = vadd.f32 1.0, %v2372_v52 }
 0x53e   :  { %2953 = vrsqrt.f32 %v2373_v9  ;;  %v5161_v2 = vsub.f32 %v5055_v23, %v5154_v6  ;;  %v5165_v22 = vsub.f32 %v5062_v1, %v5157_v18 }
 0x53f   :  { %2955 = vrsqrt.f32 %v2374_v51 }
 0x540   :  { %v2397_v35 = vsub.f32 %v5145_v46, %v5161_v2  ;;  %v2398_v24 = vsub.f32 %v5151_v28, %v5165_v22 }
 0x542   :  { %vm2419_vm8 = vcmp.ge.f32.partialorder %v2397_v35, 0.0  ;;  %vm2420_vm9 = vcmp.ge.f32.partialorder %v2398_v24, 0.0  ;;  %v2401_v26 = vmul.f32 %v2397_v35, %v2397_v35  ;;  %v2413_v47 = vand.u32 2147483647, %v2397_v35 }
 0x543   :  { %v2414_v52 = vand.u32 2147483647, %v2398_v24 }
 0x546   :  { %v2950_v55 = vpop.eup %2949 }
 0x547   :  { %v2952_v7 = vpop.eup %2951  ;;  %v2313_v4 = vmul.f32 %v2950_v55, %v2305_v31  ;;  %v2323_v40 = vmul.f32 %v2950_v55, %v5031_v42  ;;  %v2329_v63 = vmul.f32 %v2950_v55, %v5110_v15  ;;  %v2422_v31 = vsel %vm2420_vm9, 1.0, %v2993_v58 }
 0x548   :  { %v2954_v23 = vpop.eup %2953  ;;  %v2314_v29 = vmul.f32 %v2952_v7, %v2306_v34  ;;  %v2324_v12 = vmul.f32 %v2952_v7, %v5033_v50  ;;  %v2330_v1 = vmul.f32 %v2952_v7, %v5119_v16  ;;  %v2402_v34 = vmul.f32 %v2398_v24, %v2398_v24 }
 0x549   :  { %v2956_v33 = vpop.eup %2955  ;;  %v2321_v44 = vmul.f32 %v2313_v4, %v2253_v14  ;;  %v2327_v27 = vmul.f32 0.0, %v2313_v4  ;;  %v2377_v32 = vmul.f32 %v2954_v23, %v2369_v10  ;;  %v5190_v24 = vadd.f32 %v5154_v6, %v5058_v45 }
 0x54a   :  { %v2322_v61 = vmul.f32 %v2314_v29, %v2254_v13  ;;  %v2328_v42 = vmul.f32 0.0, %v2314_v29  ;;  %v2378_v11 = vmul.f32 %v2956_v33, %v2370_v49  ;;  %v2421_v13 = vsel %vm2419_vm8, 1.0, %v2993_v58 }
 0x54b   :  { %v2325_v15 = vadd.f32 %v2323_v40, %v2321_v44  ;;  %v2331_v48 = vadd.f32 %v2329_v63, %v2327_v27 }
 0x54c   :  { %v2326_v21 = vadd.f32 %v2324_v12, %v2322_v61  ;;  %v2332_v38 = vadd.f32 %v2330_v1, %v2328_v42 }
 0x54d   :  { %v2385_v50 = vmul.f32 %v2954_v23, %v2325_v15  ;;  %v2387_v16 = vmul.f32 %v2377_v32, %v2331_v48  ;;  %v2391_v59 = vmul.f32 %v2377_v32, %v2325_v15  ;;  %v2393_v41 = vmul.f32 %v2954_v23, %v2331_v48 }
 0x54e   :  { %v2386_v37 = vmul.f32 %v2956_v33, %v2326_v21  ;;  %v2388_v57 = vmul.f32 %v2378_v11, %v2332_v38  ;;  %v2392_v14 = vmul.f32 %v2378_v11, %v2326_v21  ;;  %v2394_v60 = vmul.f32 %v2956_v33, %v2332_v38 }
 0x54f   :  { %v2389_v0 = vsub.f32 %v2385_v50, %v2387_v16  ;;  %v5181_v39 = vadd.f32 %v2393_v41, %v2391_v59  ;;  %v5194_v15 = vadd.f32 %v5157_v18, %v5065_v8 }
 0x550   :  { %v2390_v56 = vsub.f32 %v2386_v37, %v2388_v57  ;;  %v5183_v20 = vadd.f32 %v2394_v60, %v2392_v14 }
 0x551   :  { %v2399_v17 = vmul.f32 2.0, %v2389_v0 }
 0x552   :  { %v2400_v36 = vmul.f32 2.0, %v2390_v56 }
 0x553   :  { %v2403_v62 = vmul.f32 %v2399_v17, %v2399_v17  ;;  %v2431_v53 = vmul.f32 %v2421_v13, %v2399_v17 }
 0x554   :  { %v2404_v3 = vmul.f32 %v2400_v36, %v2400_v36  ;;  %v2432_v10 = vmul.f32 %v2422_v31, %v2400_v36 }
 0x555   :  { %v2405_v25 = vadd.f32 %v2403_v62, %v2401_v26 }
 0x556   :  { %v2406_v43 = vadd.f32 %v2404_v3, %v2402_v34 }
 0x557   :  { %v2407_v49 = vadd.f32 1e-30, %v2405_v25 }
 0x558   :  { %v2408_v54 = vadd.f32 1e-30, %v2406_v43 }
 0x559   :  { %2957 = vrsqrt.f32 %v2407_v49 }
 0x55a   :  { %2959 = vrsqrt.f32 %v2408_v54 }
 0x563   :  { %v2958_v19 = vpop.eup %2957 }
 0x564   :  { %v2960_v9 = vpop.eup %2959  ;;  %v2411_v51 = vmul.f32 %v2958_v19, %v2405_v25 }
 0x565   :  { %v2412_v55 = vmul.f32 %v2960_v9, %v2406_v43 }
 0x566   :  { %v2415_v7 = vadd.f32 %v2413_v47, %v2411_v51 }
 0x567   :  { %v2416_v4 = vadd.f32 %v2414_v52, %v2412_v55 }
 0x568   :  { %v2417_v40 = vadd.f32 1e-30, %v2415_v7 }
 0x569   :  { %v2418_v63 = vadd.f32 1e-30, %v2416_v4 }
 0x56a   :  { %2961 = vrcp.f32 %v2417_v40 }
 0x56b   :  { %2963 = vrcp.f32 %v2418_v63 }
 0x574   :  { %v2962_v23 = vpop.eup %2961 }
 0x575   :  { %v2964_v29 = vpop.eup %2963  ;;  %v2425_v12 = vmul.f32 %v2962_v23, %v2417_v40 }
 0x576   :  { %v2426_v1 = vmul.f32 %v2964_v29, %v2418_v63 }
 0x577   :  { %v2427_v33 = vsub.f32 2.0, %v2425_v12 }
 0x578   :  { %v2428_v44 = vsub.f32 2.0, %v2426_v1 }
 0x579   :  { %v2429_v27 = vmul.f32 %v2962_v23, %v2427_v33 }
 0x57a   :  { %v2430_v32 = vmul.f32 %v2964_v29, %v2428_v44 }
 0x57b   :  { %v2433_v35 = vmul.f32 %v2431_v53, %v2429_v27 }
 0x57c   :  { %v2434_v61 = vmul.f32 %v2432_v10, %v2430_v32 }
 0x57d   :  { %v2435_v42 = vmul.f32 %v2433_v35, %v2433_v35  ;;  %v2443_v11 = vmul.f32 %v2433_v35, %v2389_v0 }
 0x57e   :  { %v2436_v48 = vmul.f32 %v2434_v61, %v2434_v61  ;;  %v2444_v21 = vmul.f32 %v2434_v61, %v2390_v56 }
 0x57f   :  { %v2437_v38 = vadd.f32 1.0, %v2435_v42  ;;  %v2445_v50 = vsub.f32 %v5161_v2, %v2443_v11  ;;  %v5198_v16 = vadd.f32 %v2443_v11, %v5145_v46 }
 0x580   :  { %v2438_v59 = vadd.f32 1.0, %v2436_v48  ;;  %v2446_v41 = vsub.f32 %v5165_v22, %v2444_v21  ;;  %v5202_v45 = vadd.f32 %v2444_v21, %v5151_v28 }
 0x581   :  { %2965 = vrsqrt.f32 %v2437_v38  ;;  %v2455_v6 = vsub.f32 %v5198_v16, %v5190_v24  ;;  %v5207_v8 = vmin.f32 %v5142_v5, %v2445_v50  ;;  %v5210_v18 = vmax.f32 %v5142_v5, %v2445_v50 }
 0x582   :  { %2967 = vrsqrt.f32 %v2438_v59  ;;  %v2456_v46 = vsub.f32 %v5202_v45, %v5194_v15  ;;  %v5215_v2 = vmin.f32 %v5148_v30, %v2446_v41  ;;  %v5218_v28 = vmax.f32 %v5148_v30, %v2446_v41 }
 0x583   :  { %vm2477_vm10 = vcmp.ge.f32.partialorder %v2455_v6, 0.0  ;;  %v2459_v36 = vmul.f32 %v2455_v6, %v2455_v6  ;;  %v2471_v54 = vand.u32 2147483647, %v2455_v6 }
 0x584   :  { %vm2478_vm11 = vcmp.ge.f32.partialorder %v2456_v46, 0.0  ;;  %v2479_v26 = vsel %vm2477_vm10, 1.0, %v2993_v58  ;;  %v2460_v62 = vmul.f32 %v2456_v46, %v2456_v46  ;;  %v2472_v19 = vand.u32 2147483647, %v2456_v46 }
 0x585   :  { %v2480_v30 = vsel %vm2478_vm11, 1.0, %v2993_v58 }
 0x58b   :  { %v2966_v22 = vpop.eup %2965 }
 0x58c   :  { %v2968_v37 = vpop.eup %2967  ;;  %v2441_v57 = vmul.f32 %v2966_v22, %v2433_v35  ;;  %v2451_v14 = vmul.f32 %v2966_v22, %v5181_v39 }
 0x58d   :  { %v2442_v60 = vmul.f32 %v2968_v37, %v2434_v61  ;;  %v2452_v0 = vmul.f32 %v2968_v37, %v5183_v20 }
 0x58e   :  { %v2449_v5 = vmul.f32 0.0, %v2441_v57 }
 0x58f   :  { %v2450_v56 = vmul.f32 0.0, %v2442_v60 }
 0x590   :  { %v2453_v13 = vadd.f32 %v2451_v14, %v2449_v5 }
 0x591   :  { %v2454_v17 = vadd.f32 %v2452_v0, %v2450_v56 }
 0x592   :  { %v2457_v31 = vmul.f32 2.0, %v2453_v13 }
 0x593   :  { %v2458_v34 = vmul.f32 2.0, %v2454_v17 }
 0x594   :  { %v2461_v53 = vmul.f32 %v2457_v31, %v2457_v31  ;;  %v2489_v3 = vmul.f32 %v2479_v26, %v2457_v31 }
 0x595   :  { %v2462_v39 = vmul.f32 %v2458_v34, %v2458_v34  ;;  %v2490_v10 = vmul.f32 %v2480_v30, %v2458_v34 }
 0x596   :  { %v2463_v25 = vadd.f32 %v2461_v53, %v2459_v36 }
 0x597   :  { %v2464_v20 = vadd.f32 %v2462_v39, %v2460_v62 }
 0x598   :  { %v2465_v43 = vadd.f32 1e-30, %v2463_v25 }
 0x599   :  { %v2466_v49 = vadd.f32 1e-30, %v2464_v20 }
 0x59a   :  { %2969 = vrsqrt.f32 %v2465_v43 }
 0x59b   :  { %2971 = vrsqrt.f32 %v2466_v49 }
 0x5a4   :  { %v2970_v47 = vpop.eup %2969 }
 0x5a5   :  { %v2972_v52 = vpop.eup %2971  ;;  %v2469_v9 = vmul.f32 %v2970_v47, %v2463_v25 }
 0x5a6   :  { %v2470_v51 = vmul.f32 %v2972_v52, %v2464_v20 }
 0x5a7   :  { %v2473_v55 = vadd.f32 %v2471_v54, %v2469_v9 }
 0x5a8   :  { %v2474_v58 = vadd.f32 %v2472_v19, %v2470_v51 }
 0x5a9   :  { %v2475_v7 = vadd.f32 1e-30, %v2473_v55 }
 0x5aa   :  { %v2476_v4 = vadd.f32 1e-30, %v2474_v58 }
 0x5ab   :  { %2973 = vrcp.f32 %v2475_v7 }
 0x5ac   :  { %2975 = vrcp.f32 %v2476_v4 }
 0x5b5   :  { %v2974_v40 = vpop.eup %2973 }
 0x5b6   :  { %v2976_v63 = vpop.eup %2975  ;;  %v2483_v23 = vmul.f32 %v2974_v40, %v2475_v7 }
 0x5b7   :  { %v2484_v29 = vmul.f32 %v2976_v63, %v2476_v4 }
 0x5b8   :  { %v2485_v12 = vsub.f32 2.0, %v2483_v23 }
 0x5b9   :  { %v2486_v1 = vsub.f32 2.0, %v2484_v29 }
 0x5ba   :  { %v2487_v33 = vmul.f32 %v2974_v40, %v2485_v12 }
 0x5bb   :  { %v2488_v44 = vmul.f32 %v2976_v63, %v2486_v1 }
 0x5bc   :  { %v2491_v27 = vmul.f32 %v2489_v3, %v2487_v33 }
 0x5bd   :  { %v2492_v32 = vmul.f32 %v2490_v10, %v2488_v44 }
 0x5be   :  { %v2493_v35 = vmul.f32 %v2491_v27, %v2453_v13 }
 0x5bf   :  { %v2494_v61 = vmul.f32 %v2492_v32, %v2454_v17 }
 0x5c0   :  { %v2495_v42 = vsub.f32 %v5190_v24, %v2493_v35  ;;  %v2497_v11 = vadd.f32 %v2493_v35, %v5198_v16 }
 0x5c1   :  { %v2496_v48 = vsub.f32 %v5194_v15, %v2494_v61  ;;  %v2498_v21 = vadd.f32 %v2494_v61, %v5202_v45 }
 0x5c2   :  { %v2503_v38 = vmin.f32 %v2495_v42, %v2497_v11  ;;  %v2505_v50 = vmax.f32 %v2495_v42, %v2497_v11 }
 0x5c3   :  { %v2504_v59 = vmin.f32 %v2496_v48, %v2498_v21  ;;  %v2506_v41 = vmax.f32 %v2496_v48, %v2498_v21 }
 0x5c4   :  { %v2507_v6 = vmin.f32 %v5210_v18, %v2503_v38  ;;  %v2509_v46 = vmax.f32 %v5210_v18, %v2503_v38 }
 0x5c5   :  { %v2508_v22 = vmin.f32 %v5218_v28, %v2504_v59  ;;  %v2510_v37 = vmax.f32 %v5218_v28, %v2504_v59 }
 0x5c6   :  { %v2511_v24 = vmin.f32 %v5207_v8, %v2507_v6  ;;  %v2513_v16 = vmax.f32 %v5207_v8, %v2507_v6  ;;  %v2515_v57 = vmin.f32 %v2509_v46, %v2505_v50  ;;  %v2517_v15 = vmax.f32 %v2509_v46, %v2505_v50 }
 0x5c7   :  { %v2512_v45 = vmin.f32 %v5215_v2, %v2508_v22  ;;  %v2514_v14 = vmax.f32 %v5215_v2, %v2508_v22  ;;  %v2516_v60 = vmin.f32 %v2510_v37, %v2506_v41  ;;  %v2518_v0 = vmax.f32 %v2510_v37, %v2506_v41 }
 0x5c8   :  { %v2519_v5 = vmin.f32 %v2513_v16, %v2515_v57  ;;  %v2521_v56 = vmax.f32 %v2513_v16, %v2515_v57  ;;  %v2523_v13 = vmax.f32 %v2511_v24, 1e-30  ;;  %v2549_v30 = vmax.f32 %v2517_v15, 1e-30 }
 0x5c9   :  { %v2520_v18 = vmin.f32 %v2514_v14, %v2516_v60  ;;  %v2522_v17 = vmax.f32 %v2514_v14, %v2516_v60  ;;  %v2524_v26 = vmax.f32 %v2512_v45, 1e-30  ;;  %v2550_v34 = vmax.f32 %v2518_v0, 1e-30 }
 0x5ca   :  { %2977 = vlog2.f32 %v2523_v13  ;;  %v2531_v28 = vmax.f32 %v2519_v5, 1e-30  ;;  %v2540_v31 = vmax.f32 %v2521_v56, 1e-30 }
 0x5cb   :  { %2979 = vlog2.f32 %v2524_v26  ;;  %v2532_v36 = vmax.f32 %v2520_v18, 1e-30  ;;  %v2541_v8 = vmax.f32 %v2522_v17, 1e-30 }
 0x5cc   :  { %2981 = vlog2.f32 %v2531_v28 }
 0x5cd   :  { %2983 = vlog2.f32 %v2532_v36 }
 0x5ce   :  { %2985 = vlog2.f32 %v2540_v31 }
 0x5cf   :  { %2987 = vlog2.f32 %v2541_v8 }
 0x5d0   :  { %2989 = vlog2.f32 %v2549_v30 }
 0x5d1   :  { %2991 = vlog2.f32 %v2550_v34 }
 0x5d4   :  { %v2978_v2 = vpop.eup %2977 }
 0x5d5   :  { %v2980_v62 = vpop.eup %2979  ;;  %v2526_v53 = vmul.f32 0.6931472, %v2978_v2 }
 0x5d6   :  { %v2982_v3 = vpop.eup %2981  ;;  %v2528_v39 = vmul.f32 0.6931472, %v2980_v62 }
 0x5d7   :  { %v2984_v10 = vpop.eup %2983  ;;  %2529 = vst [vmem:[%s5262_s2] sm:$0xff] %v2526_v53  ;;  %v2534_v25 = vmul.f32 0.6931472, %v2982_v3 }
 0x5d8   :  { %v2986_v20 = vpop.eup %2985  ;;  %2530 = vst [vmem:[%s5262_s2 + $0x8] sm:$0xff] %v2528_v39  ;;  %v2536_v43 = vmul.f32 0.6931472, %v2984_v10 }
 0x5d9   :  { %v2988_v49 = vpop.eup %2987  ;;  %2598 = vst [vmem:[%s5262_s2 + $0x10] sm:$0xff] %v2534_v25  ;;  %v2543_v54 = vmul.f32 0.6931472, %v2986_v20 }
 0x5da   :  { %v2990_v47 = vpop.eup %2989  ;;  %2599 = vst [vmem:[%s5262_s2 + $0x18] sm:$0xff] %v2536_v43  ;;  %v2545_v19 = vmul.f32 0.6931472, %v2988_v49 }
 0x5db   :  { %v2992_v52 = vpop.eup %2991  ;;  %2600 = vst [vmem:[%s5262_s2 + $0x20] sm:$0xff] %v2543_v54  ;;  %v2552_v9 = vmul.f32 0.6931472, %v2990_v47 }
 0x5dc   :  { %2601 = vst [vmem:[%s5262_s2 + $0x28] sm:$0xff] %v2545_v19  ;;  %v2554_v51 = vmul.f32 0.6931472, %v2992_v52 }
 0x5dd   :  { %2602 = vst [vmem:[%s5262_s2 + $0x30] sm:$0xff] %v2552_v9 }
 0x5de   :  { %2603 = vst [vmem:[%s5262_s2 + $0x38] sm:$0xff] %v2554_v51 }

</bundles_post_ra>
